<compile_context>
chip_gen: v6e
topology: v6e:2x2x1
jax: 0.10.0
libtpu: 0.0.40
codegen_flags: <defaults>
</compile_context>

<pallas_src>
import jax
import jax.numpy as jnp
from jax.experimental import pallas as pl
from jax.experimental.pallas import tpu as pltpu

# ---------------- small, forward-consistent hyperparameters ----------------
B = 2            # batch
S = 8            # total sequence length (sentence1 ++ sentence2)
LENGTH = 4       # args['padding_length'] : boundary between the two sentences
H = 32           # hidden_size
NH = 4           # attention heads
DH = H // NH     # head dim
FF = 64          # intermediate (FFN) size
NLAYERS = 2      # encoder layers (>=2 so hidden_states[1] feeds the pooling head)
VOCAB = 100
TYPE_VOCAB = 2
MAX_POS = 32
WORD_VOCAB = 50  # word_embedding_size (synthetic small)
WORD_DIM = 32    # config.word_embed_dim
NWORDS = 3       # matched words per token
LN_EPS = 1e-12

_COMPILER_PARAMS = pltpu.CompilerParams(dimension_semantics=("arbitrary",))


def _full_spec(shape):
    zeros = (0,) * len(shape)
    return pl.BlockSpec(tuple(shape), lambda i: zeros)


# ------------------------------ in-kernel math ------------------------------
def _layernorm(z, g, b):
    mu = jnp.mean(z, axis=-1, keepdims=True)
    var = jnp.mean((z - mu) * (z - mu), axis=-1, keepdims=True)
    return (z - mu) * jax.lax.rsqrt(var + LN_EPS) * g + b


def _gelu(y):
    # tanh-approx GELU  # TODO(synk): HF/ACBert BERT uses exact-erf GELU
    return 0.5 * y * (1.0 + jnp.tanh(0.7978845608028654 * (y + 0.044715 * y * y * y)))


def _layer_body(x, mask, wqkv, bqkv, wo, bo, ln1g, ln1b, w1, b1, w2, b2, ln2g, ln2b):
    """Full transformer layer on values; x: [B*S, H], mask: [B, S] float."""
    # fused QKV projection: one [B*S, H] @ [H, 3H] matmul
    qkv = jnp.dot(x, wqkv, preferred_element_type=jnp.float32) + bqkv      # [B*S, 3H]
    q = qkv[:, 0 * H:1 * H]
    k = qkv[:, 1 * H:2 * H]
    v = qkv[:, 2 * H:3 * H]

    scale = 1.0 / (DH ** 0.5)
    ctx_rows = []
    for b in range(B):                                    # static loops, all in one kernel
        bias = (1.0 - mask[b:b + 1, :]) * -1e9            # [1, S] key-side additive bias
        r0, r1 = b * S, (b + 1) * S
        heads = []
        for h in range(NH):
            c0, c1 = h * DH, (h + 1) * DH
            qh = q[r0:r1, c0:c1]                          # [S, DH]
            kh = k[r0:r1, c0:c1]
            vh = v[r0:r1, c0:c1]
            sc = jnp.dot(qh, kh.T, preferred_element_type=jnp.float32) * scale + bias
            sc = sc - jnp.max(sc, axis=-1, keepdims=True)
            p = jnp.exp(sc)
            p = p * pl.reciprocal(jnp.sum(p, axis=-1, keepdims=True), approx=True)
            heads.append(jnp.dot(p, vh, preferred_element_type=jnp.float32))
        ctx_rows.append(jnp.concatenate(heads, axis=1))   # [S, H]
    ctx = jnp.concatenate(ctx_rows, axis=0)               # [B*S, H]

    attn_out = jnp.dot(ctx, wo, preferred_element_type=jnp.float32) + bo
    x1 = _layernorm(x + attn_out, ln1g, ln1b)

    # fused FFN; intermediate [B*S, FF] stays on-chip
    hff = _gelu(jnp.dot(x1, w1, preferred_element_type=jnp.float32) + b1)
    ff = jnp.dot(hff, w2, preferred_element_type=jnp.float32) + b2
    return _layernorm(x1 + ff, ln2g, ln2b)


def _head_body(x2, h1, mask, clsw, clsb):
    """Classifier(softmax)[:,1], masked mean-pool halves of h1, cosine similarity."""
    # classifier on concat([CLS], token at padding_length):  o1@W[:H] + o2@W[H:]
    o1 = jnp.concatenate([x2[b * S:b * S + 1, :] for b in range(B)], axis=0)           # [B, H]
    o2 = jnp.concatenate(
        [x2[b * S + LENGTH:b * S + LENGTH + 1, :] for b in range(B)], axis=0)          # [B, H]
    logits = (jnp.dot(o1, clsw[:H, :], preferred_element_type=jnp.float32)
              + jnp.dot(o2, clsw[H:, :], preferred_element_type=jnp.float32) + clsb)    # [B, 2]
    logits = logits - jnp.max(logits, axis=-1, keepdims=True)
    e = jnp.exp(logits)
    p = e / jnp.sum(e, axis=-1, keepdims=True)            # exact divide (feeds BCE)
    pred = p[:, 1:2]                                                                    # [B, 1]

    # mean pooling of hidden_states[1] over the two sentence halves (masked)
    us, vs = [], []
    for b in range(B):
        h1b = h1[b * S:(b + 1) * S, :]                    # [S, H]
        mb = mask[b:b + 1, :]                             # [1, S]
        m1 = mb[:, :LENGTH]
        m2 = mb[:, LENGTH:]
        u = (jnp.dot(m1, h1b[:LENGTH, :], preferred_element_type=jnp.float32)
             / jnp.maximum(jnp.sum(m1, axis=-1, keepdims=True), 1e-9))                  # [1, H]
        v = (jnp.dot(m2, h1b[LENGTH:, :], preferred_element_type=jnp.float32)
             / jnp.maximum(jnp.sum(m2, axis=-1, keepdims=True), 1e-9))
        us.append(u)
        vs.append(v)
    u = jnp.concatenate(us, axis=0)                       # [B, H]
    v = jnp.concatenate(vs, axis=0)
    un = jnp.sqrt(jnp.sum(u * u, axis=-1, keepdims=True))
    vn = jnp.sqrt(jnp.sum(v * v, axis=-1, keepdims=True))
    cos = jnp.sum(u * v, axis=-1, keepdims=True) / (
        jnp.maximum(un, 1e-8) * jnp.maximum(vn, 1e-8))    # nn.CosineSimilarity eps

    # pack into one lane-dense [B, 128] row: col0 = pred, col1 = cos
    pad = jnp.zeros((B, 128 - 2), jnp.float32)
    return jnp.concatenate([pred, cos, pad], axis=1)


# --------------------------- ONE fused Pallas kernel ---------------------------
def acbert_fused_kernel(base_ref, mw_ref, wp_ref, bp_ref, eg_ref, eb_ref,
                        mask_ref,
                        wqkv_ref, bqkv_ref, wo_ref, bo_ref,
                        ln1g_ref, ln1b_ref, w1_ref, b1_ref, w2_ref, b2_ref,
                        ln2g_ref, ln2b_ref,
                        clsw_ref, clsb_ref,
                        head_ref):
    # ---- embedding: word-lattice projection + add + LayerNorm ----
    x = (base_ref[...]
         + jnp.dot(mw_ref[...], wp_ref[...], preferred_element_type=jnp.float32)
         + bp_ref[...])
    x = _layernorm(x, eg_ref[...], eb_ref[...])           # hidden_states[0]

    mask = mask_ref[...]                                  # [B, S] float

    # ---- load row-stacked layer weights once; slice per layer (static) ----
    wqkv_all = wqkv_ref[...]
    bqkv_all = bqkv_ref[...]
    wo_all = wo_ref[...]
    bo_all = bo_ref[...]
    ln1g_all = ln1g_ref[...]
    ln1b_all = ln1b_ref[...]
    w1_all = w1_ref[...]
    b1_all = b1_ref[...]
    w2_all = w2_ref[...]
    b2_all = b2_ref[...]
    ln2g_all = ln2g_ref[...]
    ln2b_all = ln2b_ref[...]

    h1 = None
    for l in range(NLAYERS):                              # static loop; all on-chip
        x = _layer_body(
            x, mask,
            wqkv_all[l * H:(l + 1) * H, :], bqkv_all[l:l + 1, :],
            wo_all[l * H:(l + 1) * H, :], bo_all[l:l + 1, :],
            ln1g_all[l:l + 1, :], ln1b_all[l:l + 1, :],
            w1_all[l * H:(l + 1) * H, :], b1_all[l:l + 1, :],
            w2_all[l * FF:(l + 1) * FF, :], b2_all[l:l + 1, :],
            ln2g_all[l:l + 1, :], ln2b_all[l:l + 1, :])
        if l == 0:
            h1 = x                                        # hidden_states[1]

    head_ref[...] = _head_body(x, h1, mask, clsw_ref[...], clsb_ref[...]
                               ).astype(head_ref.dtype)


def acbert_fused_op(base, mw_mean, mask_f, params):
    args = (base, mw_mean,
            params["word_proj_w"], params["word_proj_b"],
            params["emb_ln_g"], params["emb_ln_b"],
            mask_f,
            params["wqkv"], params["bqkv"], params["wo"], params["bo"],
            params["ln1_g"], params["ln1_b"], params["w1"], params["b1"],
            params["w2"], params["b2"], params["ln2_g"], params["ln2_b"],
            params["cls_w"], params["cls_b"])
    return pl.pallas_call(
        acbert_fused_kernel,
        out_shape=jax.ShapeDtypeStruct((B, 128), jnp.float32),
        grid=(1,),
        in_specs=[_full_spec(a.shape) for a in args],
        out_specs=_full_spec((B, 128)),
        compiler_params=_COMPILER_PARAMS,
    )(*args)


# ------------------------------ model (glue) ------------------------------
def acbert_forward(params, input_ids, attention_mask, token_type_ids,
                   matched_word_ids, matched_word_mask, labels=None):
    assert NLAYERS >= 2  # head uses hidden_states[1]
    mask_f = attention_mask.astype(jnp.float32)              # [B, S]

    # embedding gathers stay in JAX (table lookups), adds fuse into one XLA op
    tok = params["tok_emb"][input_ids]                       # [B, S, H]
    pos = params["pos_emb"][jnp.arange(S)][None, :, :]       # [1, S, H]
    typ = params["type_emb"][token_type_ids]                 # [B, S, H]
    base = (tok + pos + typ).reshape(B * S, H)

    # self.word_embeddings(matched_word_ids) -> fused into the encoder input.
    # TODO(synk): exact ACBertModel word-lattice fusion internals are not in the
    # reference source; masked-mean over matched words + linear projection stand-in.
    mw = params["word_emb"][matched_word_ids]                # [B, S, W, WORD_DIM]
    wm = matched_word_mask.astype(jnp.float32)[..., None]
    mw_mean = (jnp.sum(mw * wm, axis=2)
               / jnp.maximum(jnp.sum(wm, axis=2), 1e-9)).reshape(B * S, WORD_DIM)

    head = acbert_fused_op(base, mw_mean, mask_f, params)    # single pallas_call

    pred = head[:, 0]            # softmax(classifier([o1; o2]))[:, 1]
    cos_sim = head[:, 1]         # cosine(mean-pool halves of hidden_states[1])
    final_score = (pred + cos_sim) / 2.0

    if labels is not None:
        lab = labels.astype(jnp.float32).reshape(-1)
        mse = jnp.mean((cos_sim - lab) ** 2)
        p_c = jnp.clip(pred, 1e-7, 1.0 - 1e-7)
        bce = -jnp.mean(lab * jnp.log(p_c) + (1.0 - lab) * jnp.log(1.0 - p_c))
        loss = mse + bce
    else:
        loss = jnp.float32(0.0)
    return {"loss": loss, "pred": final_score}


# ------------------------------ parameter init ------------------------------
def init_params(key):
    keys = iter(jax.random.split(key, 32))

    def nrm(shape, scale=0.02):
        return jax.random.normal(next(keys), shape, dtype=jnp.float32) * scale

    return {
        "tok_emb": nrm((VOCAB, H)),
        "pos_emb": nrm((MAX_POS, H)),
        "type_emb": nrm((TYPE_VOCAB, H)),
        "word_emb": nrm((WORD_VOCAB, WORD_DIM)),       # self.word_embeddings
        "word_proj_w": nrm((WORD_DIM, H)),
        "word_proj_b": jnp.zeros((1, H), jnp.float32),
        "emb_ln_g": jnp.ones((1, H), jnp.float32),
        "emb_ln_b": jnp.zeros((1, H), jnp.float32),
        "cls_w": nrm((2 * H, 2)),                      # self.classifier
        "cls_b": jnp.zeros((1, 2), jnp.float32),
        # row-stacked per-layer weights (layer l = rows [l*H:(l+1)*H] etc.)
        # fused QKV columns: [0:H]=Q, [H:2H]=K, [2H:3H]=V (same math as separate proj)
        "wqkv": nrm((NLAYERS * H, 3 * H)),
        "bqkv": jnp.zeros((NLAYERS, 3 * H), jnp.float32),
        "wo": nrm((NLAYERS * H, H)),
        "bo": jnp.zeros((NLAYERS, H), jnp.float32),
        "ln1_g": jnp.ones((NLAYERS, H), jnp.float32),
        "ln1_b": jnp.zeros((NLAYERS, H), jnp.float32),
        "w1": nrm((NLAYERS * H, FF)),
        "b1": jnp.zeros((NLAYERS, FF), jnp.float32),
        "w2": nrm((NLAYERS * FF, H)),
        "b2": jnp.zeros((NLAYERS, H), jnp.float32),
        "ln2_g": jnp.ones((NLAYERS, H), jnp.float32),
        "ln2_b": jnp.zeros((NLAYERS, H), jnp.float32),
    }


# ------------------------------------ main -----------------------------------
if __name__ == "__main__":
    root = jax.random.PRNGKey(0)
    kp, k1, k2, k3 = jax.random.split(root, 4)

    params = init_params(kp)

    input_ids = jax.random.randint(k1, (B, S), 0, VOCAB, dtype=jnp.int32)
    token_type_ids = jnp.concatenate(
        [jnp.zeros((B, LENGTH), jnp.int32), jnp.ones((B, S - LENGTH), jnp.int32)], axis=1)
    attention_mask = jnp.array([[1, 1, 1, 1, 1, 1, 1, 0],
                                [1, 1, 1, 0, 1, 1, 0, 0]], dtype=jnp.int32)
    matched_word_ids = jax.random.randint(k2, (B, S, NWORDS), 0, WORD_VOCAB, dtype=jnp.int32)
    matched_word_mask = jax.random.randint(k3, (B, S, NWORDS), 0, 2, dtype=jnp.int32)
    labels = jnp.array([1, 0], dtype=jnp.int32)

    fwd = jax.jit(acbert_forward)
    out = fwd(params, input_ids, attention_mask, token_type_ids,
              matched_word_ids, matched_word_mask, labels)
    jax.block_until_ready(out["pred"])
    jax.block_until_ready(out["loss"])
    assert out["pred"].shape == (B,)
    print("KERNEL_OK")
</pallas_src>

<mosaic_0001>
module attributes {stable_mosaic.version = 11 : i64} {
  func.func @acbert_fused_kernel(%arg0: i32, %arg1: memref<16x32xf32, #tpu.memory_space<vmem>>, %arg2: memref<16x32xf32, #tpu.memory_space<vmem>>, %arg3: memref<32x32xf32, #tpu.memory_space<vmem>>, %arg4: memref<1x32xf32, #tpu.memory_space<vmem>>, %arg5: memref<1x32xf32, #tpu.memory_space<vmem>>, %arg6: memref<1x32xf32, #tpu.memory_space<vmem>>, %arg7: memref<2x8xf32, #tpu.memory_space<vmem>>, %arg8: memref<64x96xf32, #tpu.memory_space<vmem>>, %arg9: memref<2x96xf32, #tpu.memory_space<vmem>>, %arg10: memref<64x32xf32, #tpu.memory_space<vmem>>, %arg11: memref<2x32xf32, #tpu.memory_space<vmem>>, %arg12: memref<2x32xf32, #tpu.memory_space<vmem>>, %arg13: memref<2x32xf32, #tpu.memory_space<vmem>>, %arg14: memref<64x64xf32, #tpu.memory_space<vmem>>, %arg15: memref<2x64xf32, #tpu.memory_space<vmem>>, %arg16: memref<128x32xf32, #tpu.memory_space<vmem>>, %arg17: memref<2x32xf32, #tpu.memory_space<vmem>>, %arg18: memref<2x32xf32, #tpu.memory_space<vmem>>, %arg19: memref<2x32xf32, #tpu.memory_space<vmem>>, %arg20: memref<64x2xf32, #tpu.memory_space<vmem>>, %arg21: memref<1x2xf32, #tpu.memory_space<vmem>>, %arg22: memref<2x128xf32, #tpu.memory_space<vmem>>) attributes {dimension_semantics = [#tpu.dimension_semantics<arbitrary>], iteration_bounds = array<i64: 1>, scalar_prefetch = 0 : i64, scratch_operands = 0 : i64, tpu.core_type = #tpu.core_type<tc>, window_params = [{pipeline_mode = #tpu.pipeline_mode<synchronous>, transform_indices = @transform_0, window_bounds = array<i64: 16, 32>}, {pipeline_mode = #tpu.pipeline_mode<synchronous>, transform_indices = @transform_1, window_bounds = array<i64: 16, 32>}, {pipeline_mode = #tpu.pipeline_mode<synchronous>, transform_indices = @transform_2, window_bounds = array<i64: 32, 32>}, {pipeline_mode = #tpu.pipeline_mode<synchronous>, transform_indices = @transform_3, window_bounds = array<i64: 1, 32>}, {pipeline_mode = #tpu.pipeline_mode<synchronous>, transform_indices = @transform_4, window_bounds = array<i64: 1, 32>}, {pipeline_mode = #tpu.pipeline_mode<synchronous>, transform_indices = @transform_5, window_bounds = array<i64: 1, 32>}, {pipeline_mode = #tpu.pipeline_mode<synchronous>, transform_indices = @transform_6, window_bounds = array<i64: 2, 8>}, {pipeline_mode = #tpu.pipeline_mode<synchronous>, transform_indices = @transform_7, window_bounds = array<i64: 64, 96>}, {pipeline_mode = #tpu.pipeline_mode<synchronous>, transform_indices = @transform_8, window_bounds = array<i64: 2, 96>}, {pipeline_mode = #tpu.pipeline_mode<synchronous>, transform_indices = @transform_9, window_bounds = array<i64: 64, 32>}, {pipeline_mode = #tpu.pipeline_mode<synchronous>, transform_indices = @transform_10, window_bounds = array<i64: 2, 32>}, {pipeline_mode = #tpu.pipeline_mode<synchronous>, transform_indices = @transform_11, window_bounds = array<i64: 2, 32>}, {pipeline_mode = #tpu.pipeline_mode<synchronous>, transform_indices = @transform_12, window_bounds = array<i64: 2, 32>}, {pipeline_mode = #tpu.pipeline_mode<synchronous>, transform_indices = @transform_13, window_bounds = array<i64: 64, 64>}, {pipeline_mode = #tpu.pipeline_mode<synchronous>, transform_indices = @transform_14, window_bounds = array<i64: 2, 64>}, {pipeline_mode = #tpu.pipeline_mode<synchronous>, transform_indices = @transform_15, window_bounds = array<i64: 128, 32>}, {pipeline_mode = #tpu.pipeline_mode<synchronous>, transform_indices = @transform_16, window_bounds = array<i64: 2, 32>}, {pipeline_mode = #tpu.pipeline_mode<synchronous>, transform_indices = @transform_17, window_bounds = array<i64: 2, 32>}, {pipeline_mode = #tpu.pipeline_mode<synchronous>, transform_indices = @transform_18, window_bounds = array<i64: 2, 32>}, {pipeline_mode = #tpu.pipeline_mode<synchronous>, transform_indices = @transform_19, window_bounds = array<i64: 64, 2>}, {pipeline_mode = #tpu.pipeline_mode<synchronous>, transform_indices = @transform_20, window_bounds = array<i64: 1, 2>}, {pipeline_mode = #tpu.pipeline_mode<synchronous>, transform_indices = @transform_21, window_bounds = array<i64: 2, 128>}]} {
    %c0 = arith.constant 0 : index
    %c0_0 = arith.constant 0 : index
    %0 = vector.load %arg1[%c0, %c0_0] : memref<16x32xf32, #tpu.memory_space<vmem>>, vector<16x32xf32>
    %c0_1 = arith.constant 0 : index
    %c0_2 = arith.constant 0 : index
    %1 = vector.load %arg2[%c0_1, %c0_2] : memref<16x32xf32, #tpu.memory_space<vmem>>, vector<16x32xf32>
    %c0_3 = arith.constant 0 : index
    %c0_4 = arith.constant 0 : index
    %2 = vector.load %arg3[%c0_3, %c0_4] : memref<32x32xf32, #tpu.memory_space<vmem>>, vector<32x32xf32>
    %cst = arith.constant dense<0.000000e+00> : vector<16x32xf32>
    %3 = tpu.matmul %1, %2, %cst {dimension_numbers = #tpu.dot_dimension_numbers<[1], [0], [0], [1], [0, 0, 1, 1], [], []>} : vector<16x32xf32>, vector<32x32xf32>, vector<16x32xf32> -> vector<16x32xf32>
    %4 = arith.addf %0, %3 : vector<16x32xf32>
    %c0_5 = arith.constant 0 : index
    %c0_6 = arith.constant 0 : index
    %5 = vector.load %arg4[%c0_5, %c0_6] : memref<1x32xf32, #tpu.memory_space<vmem>>, vector<1x32xf32>
    %6 = vector.broadcast %5 : vector<1x32xf32> to vector<16x32xf32>
    %7 = arith.addf %4, %6 : vector<16x32xf32>
    %c0_7 = arith.constant 0 : index
    %c0_8 = arith.constant 0 : index
    %8 = vector.load %arg5[%c0_7, %c0_8] : memref<1x32xf32, #tpu.memory_space<vmem>>, vector<1x32xf32>
    %c0_9 = arith.constant 0 : index
    %c0_10 = arith.constant 0 : index
    %9 = vector.load %arg6[%c0_9, %c0_10] : memref<1x32xf32, #tpu.memory_space<vmem>>, vector<1x32xf32>
    %cst_11 = arith.constant dense<0.000000e+00> : vector<16xf32>
    %10 = vector.multi_reduction <add>, %7, %cst_11 [1] : vector<16x32xf32> to vector<16xf32>
    %11 = vector.shape_cast %10 : vector<16xf32> to vector<16x1xf32>
    %cst_12 = arith.constant 3.200000e+01 : f32
    %12 = vector.broadcast %cst_12 : f32 to vector<16x1xf32>
    %13 = arith.divf %11, %12 : vector<16x1xf32>
    %14 = vector.broadcast %13 : vector<16x1xf32> to vector<16x32xf32>
    %15 = arith.subf %7, %14 : vector<16x32xf32>
    %16 = vector.broadcast %13 : vector<16x1xf32> to vector<16x32xf32>
    %17 = arith.subf %7, %16 : vector<16x32xf32>
    %18 = arith.mulf %15, %17 : vector<16x32xf32>
    %cst_13 = arith.constant dense<0.000000e+00> : vector<16xf32>
    %19 = vector.multi_reduction <add>, %18, %cst_13 [1] : vector<16x32xf32> to vector<16xf32>
    %20 = vector.shape_cast %19 : vector<16xf32> to vector<16x1xf32>
    %cst_14 = arith.constant 3.200000e+01 : f32
    %21 = vector.broadcast %cst_14 : f32 to vector<16x1xf32>
    %22 = arith.divf %20, %21 : vector<16x1xf32>
    %23 = vector.broadcast %13 : vector<16x1xf32> to vector<16x32xf32>
    %24 = arith.subf %7, %23 : vector<16x32xf32>
    %cst_15 = arith.constant 9.99999996E-13 : f32
    %25 = vector.broadcast %cst_15 : f32 to vector<16x1xf32>
    %26 = arith.addf %22, %25 : vector<16x1xf32>
    %27 = math.rsqrt %26 : vector<16x1xf32>
    %28 = vector.broadcast %27 : vector<16x1xf32> to vector<16x32xf32>
    %29 = arith.mulf %24, %28 : vector<16x32xf32>
    %30 = vector.broadcast %8 : vector<1x32xf32> to vector<16x32xf32>
    %31 = arith.mulf %29, %30 : vector<16x32xf32>
    %32 = vector.broadcast %9 : vector<1x32xf32> to vector<16x32xf32>
    %33 = arith.addf %31, %32 : vector<16x32xf32>
    %c0_16 = arith.constant 0 : index
    %c0_17 = arith.constant 0 : index
    %34 = vector.load %arg7[%c0_16, %c0_17] : memref<2x8xf32, #tpu.memory_space<vmem>>, vector<2x8xf32>
    %c0_18 = arith.constant 0 : index
    %c0_19 = arith.constant 0 : index
    %35 = vector.load %arg8[%c0_18, %c0_19] : memref<64x96xf32, #tpu.memory_space<vmem>>, vector<64x96xf32>
    %c0_20 = arith.constant 0 : index
    %c0_21 = arith.constant 0 : index
    %36 = vector.load %arg9[%c0_20, %c0_21] : memref<2x96xf32, #tpu.memory_space<vmem>>, vector<2x96xf32>
    %c0_22 = arith.constant 0 : index
    %c0_23 = arith.constant 0 : index
    %37 = vector.load %arg10[%c0_22, %c0_23] : memref<64x32xf32, #tpu.memory_space<vmem>>, vector<64x32xf32>
    %c0_24 = arith.constant 0 : index
    %c0_25 = arith.constant 0 : index
    %38 = vector.load %arg11[%c0_24, %c0_25] : memref<2x32xf32, #tpu.memory_space<vmem>>, vector<2x32xf32>
    %c0_26 = arith.constant 0 : index
    %c0_27 = arith.constant 0 : index
    %39 = vector.load %arg12[%c0_26, %c0_27] : memref<2x32xf32, #tpu.memory_space<vmem>>, vector<2x32xf32>
    %c0_28 = arith.constant 0 : index
    %c0_29 = arith.constant 0 : index
    %40 = vector.load %arg13[%c0_28, %c0_29] : memref<2x32xf32, #tpu.memory_space<vmem>>, vector<2x32xf32>
    %c0_30 = arith.constant 0 : index
    %c0_31 = arith.constant 0 : index
    %41 = vector.load %arg14[%c0_30, %c0_31] : memref<64x64xf32, #tpu.memory_space<vmem>>, vector<64x64xf32>
    %c0_32 = arith.constant 0 : index
    %c0_33 = arith.constant 0 : index
    %42 = vector.load %arg15[%c0_32, %c0_33] : memref<2x64xf32, #tpu.memory_space<vmem>>, vector<2x64xf32>
    %c0_34 = arith.constant 0 : index
    %c0_35 = arith.constant 0 : index
    %43 = vector.load %arg16[%c0_34, %c0_35] : memref<128x32xf32, #tpu.memory_space<vmem>>, vector<128x32xf32>
    %c0_36 = arith.constant 0 : index
    %c0_37 = arith.constant 0 : index
    %44 = vector.load %arg17[%c0_36, %c0_37] : memref<2x32xf32, #tpu.memory_space<vmem>>, vector<2x32xf32>
    %c0_38 = arith.constant 0 : index
    %c0_39 = arith.constant 0 : index
    %45 = vector.load %arg18[%c0_38, %c0_39] : memref<2x32xf32, #tpu.memory_space<vmem>>, vector<2x32xf32>
    %c0_40 = arith.constant 0 : index
    %c0_41 = arith.constant 0 : index
    %46 = vector.load %arg19[%c0_40, %c0_41] : memref<2x32xf32, #tpu.memory_space<vmem>>, vector<2x32xf32>
    %47 = vector.extract_strided_slice %35 {offsets = [0, 0], sizes = [32, 96], strides = [1, 1]} : vector<64x96xf32> to vector<32x96xf32>
    %48 = vector.extract_strided_slice %36 {offsets = [0, 0], sizes = [1, 96], strides = [1, 1]} : vector<2x96xf32> to vector<1x96xf32>
    %49 = vector.extract_strided_slice %37 {offsets = [0, 0], sizes = [32, 32], strides = [1, 1]} : vector<64x32xf32> to vector<32x32xf32>
    %50 = vector.extract_strided_slice %38 {offsets = [0, 0], sizes = [1, 32], strides = [1, 1]} : vector<2x32xf32> to vector<1x32xf32>
    %51 = vector.extract_strided_slice %39 {offsets = [0, 0], sizes = [1, 32], strides = [1, 1]} : vector<2x32xf32> to vector<1x32xf32>
    %52 = vector.extract_strided_slice %40 {offsets = [0, 0], sizes = [1, 32], strides = [1, 1]} : vector<2x32xf32> to vector<1x32xf32>
    %53 = vector.extract_strided_slice %41 {offsets = [0, 0], sizes = [32, 64], strides = [1, 1]} : vector<64x64xf32> to vector<32x64xf32>
    %54 = vector.extract_strided_slice %42 {offsets = [0, 0], sizes = [1, 64], strides = [1, 1]} : vector<2x64xf32> to vector<1x64xf32>
    %55 = vector.extract_strided_slice %43 {offsets = [0, 0], sizes = [64, 32], strides = [1, 1]} : vector<128x32xf32> to vector<64x32xf32>
    %56 = vector.extract_strided_slice %44 {offsets = [0, 0], sizes = [1, 32], strides = [1, 1]} : vector<2x32xf32> to vector<1x32xf32>
    %57 = vector.extract_strided_slice %45 {offsets = [0, 0], sizes = [1, 32], strides = [1, 1]} : vector<2x32xf32> to vector<1x32xf32>
    %58 = vector.extract_strided_slice %46 {offsets = [0, 0], sizes = [1, 32], strides = [1, 1]} : vector<2x32xf32> to vector<1x32xf32>
    %cst_42 = arith.constant dense<0.000000e+00> : vector<16x96xf32>
    %59 = tpu.matmul %33, %47, %cst_42 {dimension_numbers = #tpu.dot_dimension_numbers<[1], [0], [0], [1], [0, 0, 1, 1], [], []>} : vector<16x32xf32>, vector<32x96xf32>, vector<16x96xf32> -> vector<16x96xf32>
    %60 = vector.broadcast %48 : vector<1x96xf32> to vector<16x96xf32>
    %61 = arith.addf %59, %60 : vector<16x96xf32>
    %62 = vector.extract_strided_slice %61 {offsets = [0, 0], sizes = [16, 32], strides = [1, 1]} : vector<16x96xf32> to vector<16x32xf32>
    %63 = vector.extract_strided_slice %61 {offsets = [0, 32], sizes = [16, 32], strides = [1, 1]} : vector<16x96xf32> to vector<16x32xf32>
    %64 = vector.extract_strided_slice %61 {offsets = [0, 64], sizes = [16, 32], strides = [1, 1]} : vector<16x96xf32> to vector<16x32xf32>
    %65 = vector.extract_strided_slice %34 {offsets = [0, 0], sizes = [1, 8], strides = [1, 1]} : vector<2x8xf32> to vector<1x8xf32>
    %cst_43 = arith.constant 1.000000e+00 : f32
    %66 = vector.broadcast %cst_43 : f32 to vector<1x8xf32>
    %67 = arith.subf %66, %65 : vector<1x8xf32>
    %cst_44 = arith.constant -1.000000e+09 : f32
    %68 = vector.broadcast %cst_44 : f32 to vector<1x8xf32>
    %69 = arith.mulf %67, %68 : vector<1x8xf32>
    %70 = vector.extract_strided_slice %62 {offsets = [0, 0], sizes = [8, 8], strides = [1, 1]} : vector<16x32xf32> to vector<8x8xf32>
    %71 = vector.extract_strided_slice %63 {offsets = [0, 0], sizes = [8, 8], strides = [1, 1]} : vector<16x32xf32> to vector<8x8xf32>
    %72 = vector.extract_strided_slice %64 {offsets = [0, 0], sizes = [8, 8], strides = [1, 1]} : vector<16x32xf32> to vector<8x8xf32>
    %73 = tpu.transpose %71, [1, 0] : vector<8x8xf32> -> vector<8x8xf32>
    %cst_45 = arith.constant dense<0.000000e+00> : vector<8x8xf32>
    %74 = tpu.matmul %70, %73, %cst_45 {dimension_numbers = #tpu.dot_dimension_numbers<[1], [0], [0], [1], [0, 0, 1, 1], [], []>} : vector<8x8xf32>, vector<8x8xf32>, vector<8x8xf32> -> vector<8x8xf32>
    %cst_46 = arith.constant 0.353553385 : f32
    %75 = vector.broadcast %cst_46 : f32 to vector<8x8xf32>
    %76 = arith.mulf %74, %75 : vector<8x8xf32>
    %77 = vector.broadcast %69 : vector<1x8xf32> to vector<8x8xf32>
    %78 = arith.addf %76, %77 : vector<8x8xf32>
    %cst_47 = arith.constant dense<0xFF800000> : vector<8xf32>
    %79 = vector.multi_reduction <maximumf>, %78, %cst_47 [1] : vector<8x8xf32> to vector<8xf32>
    %80 = vector.shape_cast %79 : vector<8xf32> to vector<8x1xf32>
    %81 = vector.broadcast %80 : vector<8x1xf32> to vector<8x8xf32>
    %82 = arith.subf %78, %81 : vector<8x8xf32>
    %83 = math.exp %82 : vector<8x8xf32>
    %cst_48 = arith.constant dense<0.000000e+00> : vector<8xf32>
    %84 = vector.multi_reduction <add>, %83, %cst_48 [1] : vector<8x8xf32> to vector<8xf32>
    %85 = vector.shape_cast %84 : vector<8xf32> to vector<8x1xf32>
    %86 = tpu.reciprocal %85 {approx = true} : vector<8x1xf32> -> vector<8x1xf32>
    %87 = vector.broadcast %86 : vector<8x1xf32> to vector<8x8xf32>
    %88 = arith.mulf %83, %87 : vector<8x8xf32>
    %cst_49 = arith.constant dense<0.000000e+00> : vector<8x8xf32>
    %89 = tpu.matmul %88, %72, %cst_49 {dimension_numbers = #tpu.dot_dimension_numbers<[1], [0], [0], [1], [0, 0, 1, 1], [], []>} : vector<8x8xf32>, vector<8x8xf32>, vector<8x8xf32> -> vector<8x8xf32>
    %90 = vector.extract_strided_slice %62 {offsets = [0, 8], sizes = [8, 8], strides = [1, 1]} : vector<16x32xf32> to vector<8x8xf32>
    %91 = vector.extract_strided_slice %63 {offsets = [0, 8], sizes = [8, 8], strides = [1, 1]} : vector<16x32xf32> to vector<8x8xf32>
    %92 = vector.extract_strided_slice %64 {offsets = [0, 8], sizes = [8, 8], strides = [1, 1]} : vector<16x32xf32> to vector<8x8xf32>
    %93 = tpu.transpose %91, [1, 0] : vector<8x8xf32> -> vector<8x8xf32>
    %cst_50 = arith.constant dense<0.000000e+00> : vector<8x8xf32>
    %94 = tpu.matmul %90, %93, %cst_50 {dimension_numbers = #tpu.dot_dimension_numbers<[1], [0], [0], [1], [0, 0, 1, 1], [], []>} : vector<8x8xf32>, vector<8x8xf32>, vector<8x8xf32> -> vector<8x8xf32>
    %cst_51 = arith.constant 0.353553385 : f32
    %95 = vector.broadcast %cst_51 : f32 to vector<8x8xf32>
    %96 = arith.mulf %94, %95 : vector<8x8xf32>
    %97 = vector.broadcast %69 : vector<1x8xf32> to vector<8x8xf32>
    %98 = arith.addf %96, %97 : vector<8x8xf32>
    %cst_52 = arith.constant dense<0xFF800000> : vector<8xf32>
    %99 = vector.multi_reduction <maximumf>, %98, %cst_52 [1] : vector<8x8xf32> to vector<8xf32>
    %100 = vector.shape_cast %99 : vector<8xf32> to vector<8x1xf32>
    %101 = vector.broadcast %100 : vector<8x1xf32> to vector<8x8xf32>
    %102 = arith.subf %98, %101 : vector<8x8xf32>
    %103 = math.exp %102 : vector<8x8xf32>
    %cst_53 = arith.constant dense<0.000000e+00> : vector<8xf32>
    %104 = vector.multi_reduction <add>, %103, %cst_53 [1] : vector<8x8xf32> to vector<8xf32>
    %105 = vector.shape_cast %104 : vector<8xf32> to vector<8x1xf32>
    %106 = tpu.reciprocal %105 {approx = true} : vector<8x1xf32> -> vector<8x1xf32>
    %107 = vector.broadcast %106 : vector<8x1xf32> to vector<8x8xf32>
    %108 = arith.mulf %103, %107 : vector<8x8xf32>
    %cst_54 = arith.constant dense<0.000000e+00> : vector<8x8xf32>
    %109 = tpu.matmul %108, %92, %cst_54 {dimension_numbers = #tpu.dot_dimension_numbers<[1], [0], [0], [1], [0, 0, 1, 1], [], []>} : vector<8x8xf32>, vector<8x8xf32>, vector<8x8xf32> -> vector<8x8xf32>
    %110 = vector.extract_strided_slice %62 {offsets = [0, 16], sizes = [8, 8], strides = [1, 1]} : vector<16x32xf32> to vector<8x8xf32>
    %111 = vector.extract_strided_slice %63 {offsets = [0, 16], sizes = [8, 8], strides = [1, 1]} : vector<16x32xf32> to vector<8x8xf32>
    %112 = vector.extract_strided_slice %64 {offsets = [0, 16], sizes = [8, 8], strides = [1, 1]} : vector<16x32xf32> to vector<8x8xf32>
    %113 = tpu.transpose %111, [1, 0] : vector<8x8xf32> -> vector<8x8xf32>
    %cst_55 = arith.constant dense<0.000000e+00> : vector<8x8xf32>
    %114 = tpu.matmul %110, %113, %cst_55 {dimension_numbers = #tpu.dot_dimension_numbers<[1], [0], [0], [1], [0, 0, 1, 1], [], []>} : vector<8x8xf32>, vector<8x8xf32>, vector<8x8xf32> -> vector<8x8xf32>
    %cst_56 = arith.constant 0.353553385 : f32
    %115 = vector.broadcast %cst_56 : f32 to vector<8x8xf32>
    %116 = arith.mulf %114, %115 : vector<8x8xf32>
    %117 = vector.broadcast %69 : vector<1x8xf32> to vector<8x8xf32>
    %118 = arith.addf %116, %117 : vector<8x8xf32>
    %cst_57 = arith.constant dense<0xFF800000> : vector<8xf32>
    %119 = vector.multi_reduction <maximumf>, %118, %cst_57 [1] : vector<8x8xf32> to vector<8xf32>
    %120 = vector.shape_cast %119 : vector<8xf32> to vector<8x1xf32>
    %121 = vector.broadcast %120 : vector<8x1xf32> to vector<8x8xf32>
    %122 = arith.subf %118, %121 : vector<8x8xf32>
    %123 = math.exp %122 : vector<8x8xf32>
    %cst_58 = arith.constant dense<0.000000e+00> : vector<8xf32>
    %124 = vector.multi_reduction <add>, %123, %cst_58 [1] : vector<8x8xf32> to vector<8xf32>
    %125 = vector.shape_cast %124 : vector<8xf32> to vector<8x1xf32>
    %126 = tpu.reciprocal %125 {approx = true} : vector<8x1xf32> -> vector<8x1xf32>
    %127 = vector.broadcast %126 : vector<8x1xf32> to vector<8x8xf32>
    %128 = arith.mulf %123, %127 : vector<8x8xf32>
    %cst_59 = arith.constant dense<0.000000e+00> : vector<8x8xf32>
    %129 = tpu.matmul %128, %112, %cst_59 {dimension_numbers = #tpu.dot_dimension_numbers<[1], [0], [0], [1], [0, 0, 1, 1], [], []>} : vector<8x8xf32>, vector<8x8xf32>, vector<8x8xf32> -> vector<8x8xf32>
    %130 = vector.extract_strided_slice %62 {offsets = [0, 24], sizes = [8, 8], strides = [1, 1]} : vector<16x32xf32> to vector<8x8xf32>
    %131 = vector.extract_strided_slice %63 {offsets = [0, 24], sizes = [8, 8], strides = [1, 1]} : vector<16x32xf32> to vector<8x8xf32>
    %132 = vector.extract_strided_slice %64 {offsets = [0, 24], sizes = [8, 8], strides = [1, 1]} : vector<16x32xf32> to vector<8x8xf32>
    %133 = tpu.transpose %131, [1, 0] : vector<8x8xf32> -> vector<8x8xf32>
    %cst_60 = arith.constant dense<0.000000e+00> : vector<8x8xf32>
    %134 = tpu.matmul %130, %133, %cst_60 {dimension_numbers = #tpu.dot_dimension_numbers<[1], [0], [0], [1], [0, 0, 1, 1], [], []>} : vector<8x8xf32>, vector<8x8xf32>, vector<8x8xf32> -> vector<8x8xf32>
    %cst_61 = arith.constant 0.353553385 : f32
    %135 = vector.broadcast %cst_61 : f32 to vector<8x8xf32>
    %136 = arith.mulf %134, %135 : vector<8x8xf32>
    %137 = vector.broadcast %69 : vector<1x8xf32> to vector<8x8xf32>
    %138 = arith.addf %136, %137 : vector<8x8xf32>
    %cst_62 = arith.constant dense<0xFF800000> : vector<8xf32>
    %139 = vector.multi_reduction <maximumf>, %138, %cst_62 [1] : vector<8x8xf32> to vector<8xf32>
    %140 = vector.shape_cast %139 : vector<8xf32> to vector<8x1xf32>
    %141 = vector.broadcast %140 : vector<8x1xf32> to vector<8x8xf32>
    %142 = arith.subf %138, %141 : vector<8x8xf32>
    %143 = math.exp %142 : vector<8x8xf32>
    %cst_63 = arith.constant dense<0.000000e+00> : vector<8xf32>
    %144 = vector.multi_reduction <add>, %143, %cst_63 [1] : vector<8x8xf32> to vector<8xf32>
    %145 = vector.shape_cast %144 : vector<8xf32> to vector<8x1xf32>
    %146 = tpu.reciprocal %145 {approx = true} : vector<8x1xf32> -> vector<8x1xf32>
    %147 = vector.broadcast %146 : vector<8x1xf32> to vector<8x8xf32>
    %148 = arith.mulf %143, %147 : vector<8x8xf32>
    %cst_64 = arith.constant dense<0.000000e+00> : vector<8x8xf32>
    %149 = tpu.matmul %148, %132, %cst_64 {dimension_numbers = #tpu.dot_dimension_numbers<[1], [0], [0], [1], [0, 0, 1, 1], [], []>} : vector<8x8xf32>, vector<8x8xf32>, vector<8x8xf32> -> vector<8x8xf32>
    %150 = tpu.concatenate %89, %109, %129, %149 in 1 : vector<8x8xf32>, vector<8x8xf32>, vector<8x8xf32>, vector<8x8xf32> -> vector<8x32xf32>
    %151 = vector.extract_strided_slice %34 {offsets = [1, 0], sizes = [1, 8], strides = [1, 1]} : vector<2x8xf32> to vector<1x8xf32>
    %cst_65 = arith.constant 1.000000e+00 : f32
    %152 = vector.broadcast %cst_65 : f32 to vector<1x8xf32>
    %153 = arith.subf %152, %151 : vector<1x8xf32>
    %cst_66 = arith.constant -1.000000e+09 : f32
    %154 = vector.broadcast %cst_66 : f32 to vector<1x8xf32>
    %155 = arith.mulf %153, %154 : vector<1x8xf32>
    %156 = vector.extract_strided_slice %62 {offsets = [8, 0], sizes = [8, 8], strides = [1, 1]} : vector<16x32xf32> to vector<8x8xf32>
    %157 = vector.extract_strided_slice %63 {offsets = [8, 0], sizes = [8, 8], strides = [1, 1]} : vector<16x32xf32> to vector<8x8xf32>
    %158 = vector.extract_strided_slice %64 {offsets = [8, 0], sizes = [8, 8], strides = [1, 1]} : vector<16x32xf32> to vector<8x8xf32>
    %159 = tpu.transpose %157, [1, 0] : vector<8x8xf32> -> vector<8x8xf32>
    %cst_67 = arith.constant dense<0.000000e+00> : vector<8x8xf32>
    %160 = tpu.matmul %156, %159, %cst_67 {dimension_numbers = #tpu.dot_dimension_numbers<[1], [0], [0], [1], [0, 0, 1, 1], [], []>} : vector<8x8xf32>, vector<8x8xf32>, vector<8x8xf32> -> vector<8x8xf32>
    %cst_68 = arith.constant 0.353553385 : f32
    %161 = vector.broadcast %cst_68 : f32 to vector<8x8xf32>
    %162 = arith.mulf %160, %161 : vector<8x8xf32>
    %163 = vector.broadcast %155 : vector<1x8xf32> to vector<8x8xf32>
    %164 = arith.addf %162, %163 : vector<8x8xf32>
    %cst_69 = arith.constant dense<0xFF800000> : vector<8xf32>
    %165 = vector.multi_reduction <maximumf>, %164, %cst_69 [1] : vector<8x8xf32> to vector<8xf32>
    %166 = vector.shape_cast %165 : vector<8xf32> to vector<8x1xf32>
    %167 = vector.broadcast %166 : vector<8x1xf32> to vector<8x8xf32>
    %168 = arith.subf %164, %167 : vector<8x8xf32>
    %169 = math.exp %168 : vector<8x8xf32>
    %cst_70 = arith.constant dense<0.000000e+00> : vector<8xf32>
    %170 = vector.multi_reduction <add>, %169, %cst_70 [1] : vector<8x8xf32> to vector<8xf32>
    %171 = vector.shape_cast %170 : vector<8xf32> to vector<8x1xf32>
    %172 = tpu.reciprocal %171 {approx = true} : vector<8x1xf32> -> vector<8x1xf32>
    %173 = vector.broadcast %172 : vector<8x1xf32> to vector<8x8xf32>
    %174 = arith.mulf %169, %173 : vector<8x8xf32>
    %cst_71 = arith.constant dense<0.000000e+00> : vector<8x8xf32>
    %175 = tpu.matmul %174, %158, %cst_71 {dimension_numbers = #tpu.dot_dimension_numbers<[1], [0], [0], [1], [0, 0, 1, 1], [], []>} : vector<8x8xf32>, vector<8x8xf32>, vector<8x8xf32> -> vector<8x8xf32>
    %176 = vector.extract_strided_slice %62 {offsets = [8, 8], sizes = [8, 8], strides = [1, 1]} : vector<16x32xf32> to vector<8x8xf32>
    %177 = vector.extract_strided_slice %63 {offsets = [8, 8], sizes = [8, 8], strides = [1, 1]} : vector<16x32xf32> to vector<8x8xf32>
    %178 = vector.extract_strided_slice %64 {offsets = [8, 8], sizes = [8, 8], strides = [1, 1]} : vector<16x32xf32> to vector<8x8xf32>
    %179 = tpu.transpose %177, [1, 0] : vector<8x8xf32> -> vector<8x8xf32>
    %cst_72 = arith.constant dense<0.000000e+00> : vector<8x8xf32>
    %180 = tpu.matmul %176, %179, %cst_72 {dimension_numbers = #tpu.dot_dimension_numbers<[1], [0], [0], [1], [0, 0, 1, 1], [], []>} : vector<8x8xf32>, vector<8x8xf32>, vector<8x8xf32> -> vector<8x8xf32>
    %cst_73 = arith.constant 0.353553385 : f32
    %181 = vector.broadcast %cst_73 : f32 to vector<8x8xf32>
    %182 = arith.mulf %180, %181 : vector<8x8xf32>
    %183 = vector.broadcast %155 : vector<1x8xf32> to vector<8x8xf32>
    %184 = arith.addf %182, %183 : vector<8x8xf32>
    %cst_74 = arith.constant dense<0xFF800000> : vector<8xf32>
    %185 = vector.multi_reduction <maximumf>, %184, %cst_74 [1] : vector<8x8xf32> to vector<8xf32>
    %186 = vector.shape_cast %185 : vector<8xf32> to vector<8x1xf32>
    %187 = vector.broadcast %186 : vector<8x1xf32> to vector<8x8xf32>
    %188 = arith.subf %184, %187 : vector<8x8xf32>
    %189 = math.exp %188 : vector<8x8xf32>
    %cst_75 = arith.constant dense<0.000000e+00> : vector<8xf32>
    %190 = vector.multi_reduction <add>, %189, %cst_75 [1] : vector<8x8xf32> to vector<8xf32>
    %191 = vector.shape_cast %190 : vector<8xf32> to vector<8x1xf32>
    %192 = tpu.reciprocal %191 {approx = true} : vector<8x1xf32> -> vector<8x1xf32>
    %193 = vector.broadcast %192 : vector<8x1xf32> to vector<8x8xf32>
    %194 = arith.mulf %189, %193 : vector<8x8xf32>
    %cst_76 = arith.constant dense<0.000000e+00> : vector<8x8xf32>
    %195 = tpu.matmul %194, %178, %cst_76 {dimension_numbers = #tpu.dot_dimension_numbers<[1], [0], [0], [1], [0, 0, 1, 1], [], []>} : vector<8x8xf32>, vector<8x8xf32>, vector<8x8xf32> -> vector<8x8xf32>
    %196 = vector.extract_strided_slice %62 {offsets = [8, 16], sizes = [8, 8], strides = [1, 1]} : vector<16x32xf32> to vector<8x8xf32>
    %197 = vector.extract_strided_slice %63 {offsets = [8, 16], sizes = [8, 8], strides = [1, 1]} : vector<16x32xf32> to vector<8x8xf32>
    %198 = vector.extract_strided_slice %64 {offsets = [8, 16], sizes = [8, 8], strides = [1, 1]} : vector<16x32xf32> to vector<8x8xf32>
    %199 = tpu.transpose %197, [1, 0] : vector<8x8xf32> -> vector<8x8xf32>
    %cst_77 = arith.constant dense<0.000000e+00> : vector<8x8xf32>
    %200 = tpu.matmul %196, %199, %cst_77 {dimension_numbers = #tpu.dot_dimension_numbers<[1], [0], [0], [1], [0, 0, 1, 1], [], []>} : vector<8x8xf32>, vector<8x8xf32>, vector<8x8xf32> -> vector<8x8xf32>
    %cst_78 = arith.constant 0.353553385 : f32
    %201 = vector.broadcast %cst_78 : f32 to vector<8x8xf32>
    %202 = arith.mulf %200, %201 : vector<8x8xf32>
    %203 = vector.broadcast %155 : vector<1x8xf32> to vector<8x8xf32>
    %204 = arith.addf %202, %203 : vector<8x8xf32>
    %cst_79 = arith.constant dense<0xFF800000> : vector<8xf32>
    %205 = vector.multi_reduction <maximumf>, %204, %cst_79 [1] : vector<8x8xf32> to vector<8xf32>
    %206 = vector.shape_cast %205 : vector<8xf32> to vector<8x1xf32>
    %207 = vector.broadcast %206 : vector<8x1xf32> to vector<8x8xf32>
    %208 = arith.subf %204, %207 : vector<8x8xf32>
    %209 = math.exp %208 : vector<8x8xf32>
    %cst_80 = arith.constant dense<0.000000e+00> : vector<8xf32>
    %210 = vector.multi_reduction <add>, %209, %cst_80 [1] : vector<8x8xf32> to vector<8xf32>
    %211 = vector.shape_cast %210 : vector<8xf32> to vector<8x1xf32>
    %212 = tpu.reciprocal %211 {approx = true} : vector<8x1xf32> -> vector<8x1xf32>
    %213 = vector.broadcast %212 : vector<8x1xf32> to vector<8x8xf32>
    %214 = arith.mulf %209, %213 : vector<8x8xf32>
    %cst_81 = arith.constant dense<0.000000e+00> : vector<8x8xf32>
    %215 = tpu.matmul %214, %198, %cst_81 {dimension_numbers = #tpu.dot_dimension_numbers<[1], [0], [0], [1], [0, 0, 1, 1], [], []>} : vector<8x8xf32>, vector<8x8xf32>, vector<8x8xf32> -> vector<8x8xf32>
    %216 = vector.extract_strided_slice %62 {offsets = [8, 24], sizes = [8, 8], strides = [1, 1]} : vector<16x32xf32> to vector<8x8xf32>
    %217 = vector.extract_strided_slice %63 {offsets = [8, 24], sizes = [8, 8], strides = [1, 1]} : vector<16x32xf32> to vector<8x8xf32>
    %218 = vector.extract_strided_slice %64 {offsets = [8, 24], sizes = [8, 8], strides = [1, 1]} : vector<16x32xf32> to vector<8x8xf32>
    %219 = tpu.transpose %217, [1, 0] : vector<8x8xf32> -> vector<8x8xf32>
    %cst_82 = arith.constant dense<0.000000e+00> : vector<8x8xf32>
    %220 = tpu.matmul %216, %219, %cst_82 {dimension_numbers = #tpu.dot_dimension_numbers<[1], [0], [0], [1], [0, 0, 1, 1], [], []>} : vector<8x8xf32>, vector<8x8xf32>, vector<8x8xf32> -> vector<8x8xf32>
    %cst_83 = arith.constant 0.353553385 : f32
    %221 = vector.broadcast %cst_83 : f32 to vector<8x8xf32>
    %222 = arith.mulf %220, %221 : vector<8x8xf32>
    %223 = vector.broadcast %155 : vector<1x8xf32> to vector<8x8xf32>
    %224 = arith.addf %222, %223 : vector<8x8xf32>
    %cst_84 = arith.constant dense<0xFF800000> : vector<8xf32>
    %225 = vector.multi_reduction <maximumf>, %224, %cst_84 [1] : vector<8x8xf32> to vector<8xf32>
    %226 = vector.shape_cast %225 : vector<8xf32> to vector<8x1xf32>
    %227 = vector.broadcast %226 : vector<8x1xf32> to vector<8x8xf32>
    %228 = arith.subf %224, %227 : vector<8x8xf32>
    %229 = math.exp %228 : vector<8x8xf32>
    %cst_85 = arith.constant dense<0.000000e+00> : vector<8xf32>
    %230 = vector.multi_reduction <add>, %229, %cst_85 [1] : vector<8x8xf32> to vector<8xf32>
    %231 = vector.shape_cast %230 : vector<8xf32> to vector<8x1xf32>
    %232 = tpu.reciprocal %231 {approx = true} : vector<8x1xf32> -> vector<8x1xf32>
    %233 = vector.broadcast %232 : vector<8x1xf32> to vector<8x8xf32>
    %234 = arith.mulf %229, %233 : vector<8x8xf32>
    %cst_86 = arith.constant dense<0.000000e+00> : vector<8x8xf32>
    %235 = tpu.matmul %234, %218, %cst_86 {dimension_numbers = #tpu.dot_dimension_numbers<[1], [0], [0], [1], [0, 0, 1, 1], [], []>} : vector<8x8xf32>, vector<8x8xf32>, vector<8x8xf32> -> vector<8x8xf32>
    %236 = tpu.concatenate %175, %195, %215, %235 in 1 : vector<8x8xf32>, vector<8x8xf32>, vector<8x8xf32>, vector<8x8xf32> -> vector<8x32xf32>
    %237 = tpu.concatenate %150, %236 in 0 : vector<8x32xf32>, vector<8x32xf32> -> vector<16x32xf32>
    %cst_87 = arith.constant dense<0.000000e+00> : vector<16x32xf32>
    %238 = tpu.matmul %237, %49, %cst_87 {dimension_numbers = #tpu.dot_dimension_numbers<[1], [0], [0], [1], [0, 0, 1, 1], [], []>} : vector<16x32xf32>, vector<32x32xf32>, vector<16x32xf32> -> vector<16x32xf32>
    %239 = vector.broadcast %50 : vector<1x32xf32> to vector<16x32xf32>
    %240 = arith.addf %238, %239 : vector<16x32xf32>
    %241 = arith.addf %33, %240 : vector<16x32xf32>
    %cst_88 = arith.constant dense<0.000000e+00> : vector<16xf32>
    %242 = vector.multi_reduction <add>, %241, %cst_88 [1] : vector<16x32xf32> to vector<16xf32>
    %243 = vector.shape_cast %242 : vector<16xf32> to vector<16x1xf32>
    %cst_89 = arith.constant 3.200000e+01 : f32
    %244 = vector.broadcast %cst_89 : f32 to vector<16x1xf32>
    %245 = arith.divf %243, %244 : vector<16x1xf32>
    %246 = vector.broadcast %245 : vector<16x1xf32> to vector<16x32xf32>
    %247 = arith.subf %241, %246 : vector<16x32xf32>
    %248 = vector.broadcast %245 : vector<16x1xf32> to vector<16x32xf32>
    %249 = arith.subf %241, %248 : vector<16x32xf32>
    %250 = arith.mulf %247, %249 : vector<16x32xf32>
    %cst_90 = arith.constant dense<0.000000e+00> : vector<16xf32>
    %251 = vector.multi_reduction <add>, %250, %cst_90 [1] : vector<16x32xf32> to vector<16xf32>
    %252 = vector.shape_cast %251 : vector<16xf32> to vector<16x1xf32>
    %cst_91 = arith.constant 3.200000e+01 : f32
    %253 = vector.broadcast %cst_91 : f32 to vector<16x1xf32>
    %254 = arith.divf %252, %253 : vector<16x1xf32>
    %255 = vector.broadcast %245 : vector<16x1xf32> to vector<16x32xf32>
    %256 = arith.subf %241, %255 : vector<16x32xf32>
    %cst_92 = arith.constant 9.99999996E-13 : f32
    %257 = vector.broadcast %cst_92 : f32 to vector<16x1xf32>
    %258 = arith.addf %254, %257 : vector<16x1xf32>
    %259 = math.rsqrt %258 : vector<16x1xf32>
    %260 = vector.broadcast %259 : vector<16x1xf32> to vector<16x32xf32>
    %261 = arith.mulf %256, %260 : vector<16x32xf32>
    %262 = vector.broadcast %51 : vector<1x32xf32> to vector<16x32xf32>
    %263 = arith.mulf %261, %262 : vector<16x32xf32>
    %264 = vector.broadcast %52 : vector<1x32xf32> to vector<16x32xf32>
    %265 = arith.addf %263, %264 : vector<16x32xf32>
    %cst_93 = arith.constant dense<0.000000e+00> : vector<16x64xf32>
    %266 = tpu.matmul %265, %53, %cst_93 {dimension_numbers = #tpu.dot_dimension_numbers<[1], [0], [0], [1], [0, 0, 1, 1], [], []>} : vector<16x32xf32>, vector<32x64xf32>, vector<16x64xf32> -> vector<16x64xf32>
    %267 = vector.broadcast %54 : vector<1x64xf32> to vector<16x64xf32>
    %268 = arith.addf %266, %267 : vector<16x64xf32>
    %cst_94 = arith.constant 5.000000e-01 : f32
    %269 = vector.broadcast %cst_94 : f32 to vector<16x64xf32>
    %270 = arith.mulf %269, %268 : vector<16x64xf32>
    %cst_95 = arith.constant 4.471500e-02 : f32
    %271 = vector.broadcast %cst_95 : f32 to vector<16x64xf32>
    %272 = arith.mulf %271, %268 : vector<16x64xf32>
    %273 = arith.mulf %272, %268 : vector<16x64xf32>
    %274 = arith.mulf %273, %268 : vector<16x64xf32>
    %275 = arith.addf %268, %274 : vector<16x64xf32>
    %cst_96 = arith.constant 0.797884583 : f32
    %276 = vector.broadcast %cst_96 : f32 to vector<16x64xf32>
    %277 = arith.mulf %276, %275 : vector<16x64xf32>
    %278 = math.tanh %277 : vector<16x64xf32>
    %cst_97 = arith.constant 1.000000e+00 : f32
    %279 = vector.broadcast %cst_97 : f32 to vector<16x64xf32>
    %280 = arith.addf %279, %278 : vector<16x64xf32>
    %281 = arith.mulf %270, %280 : vector<16x64xf32>
    %cst_98 = arith.constant dense<0.000000e+00> : vector<16x32xf32>
    %282 = tpu.matmul %281, %55, %cst_98 {dimension_numbers = #tpu.dot_dimension_numbers<[1], [0], [0], [1], [0, 0, 1, 1], [], []>} : vector<16x64xf32>, vector<64x32xf32>, vector<16x32xf32> -> vector<16x32xf32>
    %283 = vector.broadcast %56 : vector<1x32xf32> to vector<16x32xf32>
    %284 = arith.addf %282, %283 : vector<16x32xf32>
    %285 = arith.addf %265, %284 : vector<16x32xf32>
    %cst_99 = arith.constant dense<0.000000e+00> : vector<16xf32>
    %286 = vector.multi_reduction <add>, %285, %cst_99 [1] : vector<16x32xf32> to vector<16xf32>
    %287 = vector.shape_cast %286 : vector<16xf32> to vector<16x1xf32>
    %cst_100 = arith.constant 3.200000e+01 : f32
    %288 = vector.broadcast %cst_100 : f32 to vector<16x1xf32>
    %289 = arith.divf %287, %288 : vector<16x1xf32>
    %290 = vector.broadcast %289 : vector<16x1xf32> to vector<16x32xf32>
    %291 = arith.subf %285, %290 : vector<16x32xf32>
    %292 = vector.broadcast %289 : vector<16x1xf32> to vector<16x32xf32>
    %293 = arith.subf %285, %292 : vector<16x32xf32>
    %294 = arith.mulf %291, %293 : vector<16x32xf32>
    %cst_101 = arith.constant dense<0.000000e+00> : vector<16xf32>
    %295 = vector.multi_reduction <add>, %294, %cst_101 [1] : vector<16x32xf32> to vector<16xf32>
    %296 = vector.shape_cast %295 : vector<16xf32> to vector<16x1xf32>
    %cst_102 = arith.constant 3.200000e+01 : f32
    %297 = vector.broadcast %cst_102 : f32 to vector<16x1xf32>
    %298 = arith.divf %296, %297 : vector<16x1xf32>
    %299 = vector.broadcast %289 : vector<16x1xf32> to vector<16x32xf32>
    %300 = arith.subf %285, %299 : vector<16x32xf32>
    %cst_103 = arith.constant 9.99999996E-13 : f32
    %301 = vector.broadcast %cst_103 : f32 to vector<16x1xf32>
    %302 = arith.addf %298, %301 : vector<16x1xf32>
    %303 = math.rsqrt %302 : vector<16x1xf32>
    %304 = vector.broadcast %303 : vector<16x1xf32> to vector<16x32xf32>
    %305 = arith.mulf %300, %304 : vector<16x32xf32>
    %306 = vector.broadcast %57 : vector<1x32xf32> to vector<16x32xf32>
    %307 = arith.mulf %305, %306 : vector<16x32xf32>
    %308 = vector.broadcast %58 : vector<1x32xf32> to vector<16x32xf32>
    %309 = arith.addf %307, %308 : vector<16x32xf32>
    %310 = vector.extract_strided_slice %35 {offsets = [32, 0], sizes = [32, 96], strides = [1, 1]} : vector<64x96xf32> to vector<32x96xf32>
    %311 = vector.extract_strided_slice %36 {offsets = [1, 0], sizes = [1, 96], strides = [1, 1]} : vector<2x96xf32> to vector<1x96xf32>
    %312 = vector.extract_strided_slice %37 {offsets = [32, 0], sizes = [32, 32], strides = [1, 1]} : vector<64x32xf32> to vector<32x32xf32>
    %313 = vector.extract_strided_slice %38 {offsets = [1, 0], sizes = [1, 32], strides = [1, 1]} : vector<2x32xf32> to vector<1x32xf32>
    %314 = vector.extract_strided_slice %39 {offsets = [1, 0], sizes = [1, 32], strides = [1, 1]} : vector<2x32xf32> to vector<1x32xf32>
    %315 = vector.extract_strided_slice %40 {offsets = [1, 0], sizes = [1, 32], strides = [1, 1]} : vector<2x32xf32> to vector<1x32xf32>
    %316 = vector.extract_strided_slice %41 {offsets = [32, 0], sizes = [32, 64], strides = [1, 1]} : vector<64x64xf32> to vector<32x64xf32>
    %317 = vector.extract_strided_slice %42 {offsets = [1, 0], sizes = [1, 64], strides = [1, 1]} : vector<2x64xf32> to vector<1x64xf32>
    %318 = vector.extract_strided_slice %43 {offsets = [64, 0], sizes = [64, 32], strides = [1, 1]} : vector<128x32xf32> to vector<64x32xf32>
    %319 = vector.extract_strided_slice %44 {offsets = [1, 0], sizes = [1, 32], strides = [1, 1]} : vector<2x32xf32> to vector<1x32xf32>
    %320 = vector.extract_strided_slice %45 {offsets = [1, 0], sizes = [1, 32], strides = [1, 1]} : vector<2x32xf32> to vector<1x32xf32>
    %321 = vector.extract_strided_slice %46 {offsets = [1, 0], sizes = [1, 32], strides = [1, 1]} : vector<2x32xf32> to vector<1x32xf32>
    %cst_104 = arith.constant dense<0.000000e+00> : vector<16x96xf32>
    %322 = tpu.matmul %309, %310, %cst_104 {dimension_numbers = #tpu.dot_dimension_numbers<[1], [0], [0], [1], [0, 0, 1, 1], [], []>} : vector<16x32xf32>, vector<32x96xf32>, vector<16x96xf32> -> vector<16x96xf32>
    %323 = vector.broadcast %311 : vector<1x96xf32> to vector<16x96xf32>
    %324 = arith.addf %322, %323 : vector<16x96xf32>
    %325 = vector.extract_strided_slice %324 {offsets = [0, 0], sizes = [16, 32], strides = [1, 1]} : vector<16x96xf32> to vector<16x32xf32>
    %326 = vector.extract_strided_slice %324 {offsets = [0, 32], sizes = [16, 32], strides = [1, 1]} : vector<16x96xf32> to vector<16x32xf32>
    %327 = vector.extract_strided_slice %324 {offsets = [0, 64], sizes = [16, 32], strides = [1, 1]} : vector<16x96xf32> to vector<16x32xf32>
    %328 = vector.extract_strided_slice %34 {offsets = [0, 0], sizes = [1, 8], strides = [1, 1]} : vector<2x8xf32> to vector<1x8xf32>
    %cst_105 = arith.constant 1.000000e+00 : f32
    %329 = vector.broadcast %cst_105 : f32 to vector<1x8xf32>
    %330 = arith.subf %329, %328 : vector<1x8xf32>
    %cst_106 = arith.constant -1.000000e+09 : f32
    %331 = vector.broadcast %cst_106 : f32 to vector<1x8xf32>
    %332 = arith.mulf %330, %331 : vector<1x8xf32>
    %333 = vector.extract_strided_slice %325 {offsets = [0, 0], sizes = [8, 8], strides = [1, 1]} : vector<16x32xf32> to vector<8x8xf32>
    %334 = vector.extract_strided_slice %326 {offsets = [0, 0], sizes = [8, 8], strides = [1, 1]} : vector<16x32xf32> to vector<8x8xf32>
    %335 = vector.extract_strided_slice %327 {offsets = [0, 0], sizes = [8, 8], strides = [1, 1]} : vector<16x32xf32> to vector<8x8xf32>
    %336 = tpu.transpose %334, [1, 0] : vector<8x8xf32> -> vector<8x8xf32>
    %cst_107 = arith.constant dense<0.000000e+00> : vector<8x8xf32>
    %337 = tpu.matmul %333, %336, %cst_107 {dimension_numbers = #tpu.dot_dimension_numbers<[1], [0], [0], [1], [0, 0, 1, 1], [], []>} : vector<8x8xf32>, vector<8x8xf32>, vector<8x8xf32> -> vector<8x8xf32>
    %cst_108 = arith.constant 0.353553385 : f32
    %338 = vector.broadcast %cst_108 : f32 to vector<8x8xf32>
    %339 = arith.mulf %337, %338 : vector<8x8xf32>
    %340 = vector.broadcast %332 : vector<1x8xf32> to vector<8x8xf32>
    %341 = arith.addf %339, %340 : vector<8x8xf32>
    %cst_109 = arith.constant dense<0xFF800000> : vector<8xf32>
    %342 = vector.multi_reduction <maximumf>, %341, %cst_109 [1] : vector<8x8xf32> to vector<8xf32>
    %343 = vector.shape_cast %342 : vector<8xf32> to vector<8x1xf32>
    %344 = vector.broadcast %343 : vector<8x1xf32> to vector<8x8xf32>
    %345 = arith.subf %341, %344 : vector<8x8xf32>
    %346 = math.exp %345 : vector<8x8xf32>
    %cst_110 = arith.constant dense<0.000000e+00> : vector<8xf32>
    %347 = vector.multi_reduction <add>, %346, %cst_110 [1] : vector<8x8xf32> to vector<8xf32>
    %348 = vector.shape_cast %347 : vector<8xf32> to vector<8x1xf32>
    %349 = tpu.reciprocal %348 {approx = true} : vector<8x1xf32> -> vector<8x1xf32>
    %350 = vector.broadcast %349 : vector<8x1xf32> to vector<8x8xf32>
    %351 = arith.mulf %346, %350 : vector<8x8xf32>
    %cst_111 = arith.constant dense<0.000000e+00> : vector<8x8xf32>
    %352 = tpu.matmul %351, %335, %cst_111 {dimension_numbers = #tpu.dot_dimension_numbers<[1], [0], [0], [1], [0, 0, 1, 1], [], []>} : vector<8x8xf32>, vector<8x8xf32>, vector<8x8xf32> -> vector<8x8xf32>
    %353 = vector.extract_strided_slice %325 {offsets = [0, 8], sizes = [8, 8], strides = [1, 1]} : vector<16x32xf32> to vector<8x8xf32>
    %354 = vector.extract_strided_slice %326 {offsets = [0, 8], sizes = [8, 8], strides = [1, 1]} : vector<16x32xf32> to vector<8x8xf32>
    %355 = vector.extract_strided_slice %327 {offsets = [0, 8], sizes = [8, 8], strides = [1, 1]} : vector<16x32xf32> to vector<8x8xf32>
    %356 = tpu.transpose %354, [1, 0] : vector<8x8xf32> -> vector<8x8xf32>
    %cst_112 = arith.constant dense<0.000000e+00> : vector<8x8xf32>
    %357 = tpu.matmul %353, %356, %cst_112 {dimension_numbers = #tpu.dot_dimension_numbers<[1], [0], [0], [1], [0, 0, 1, 1], [], []>} : vector<8x8xf32>, vector<8x8xf32>, vector<8x8xf32> -> vector<8x8xf32>
    %cst_113 = arith.constant 0.353553385 : f32
    %358 = vector.broadcast %cst_113 : f32 to vector<8x8xf32>
    %359 = arith.mulf %357, %358 : vector<8x8xf32>
    %360 = vector.broadcast %332 : vector<1x8xf32> to vector<8x8xf32>
    %361 = arith.addf %359, %360 : vector<8x8xf32>
    %cst_114 = arith.constant dense<0xFF800000> : vector<8xf32>
    %362 = vector.multi_reduction <maximumf>, %361, %cst_114 [1] : vector<8x8xf32> to vector<8xf32>
    %363 = vector.shape_cast %362 : vector<8xf32> to vector<8x1xf32>
    %364 = vector.broadcast %363 : vector<8x1xf32> to vector<8x8xf32>
    %365 = arith.subf %361, %364 : vector<8x8xf32>
    %366 = math.exp %365 : vector<8x8xf32>
    %cst_115 = arith.constant dense<0.000000e+00> : vector<8xf32>
    %367 = vector.multi_reduction <add>, %366, %cst_115 [1] : vector<8x8xf32> to vector<8xf32>
    %368 = vector.shape_cast %367 : vector<8xf32> to vector<8x1xf32>
    %369 = tpu.reciprocal %368 {approx = true} : vector<8x1xf32> -> vector<8x1xf32>
    %370 = vector.broadcast %369 : vector<8x1xf32> to vector<8x8xf32>
    %371 = arith.mulf %366, %370 : vector<8x8xf32>
    %cst_116 = arith.constant dense<0.000000e+00> : vector<8x8xf32>
    %372 = tpu.matmul %371, %355, %cst_116 {dimension_numbers = #tpu.dot_dimension_numbers<[1], [0], [0], [1], [0, 0, 1, 1], [], []>} : vector<8x8xf32>, vector<8x8xf32>, vector<8x8xf32> -> vector<8x8xf32>
    %373 = vector.extract_strided_slice %325 {offsets = [0, 16], sizes = [8, 8], strides = [1, 1]} : vector<16x32xf32> to vector<8x8xf32>
    %374 = vector.extract_strided_slice %326 {offsets = [0, 16], sizes = [8, 8], strides = [1, 1]} : vector<16x32xf32> to vector<8x8xf32>
    %375 = vector.extract_strided_slice %327 {offsets = [0, 16], sizes = [8, 8], strides = [1, 1]} : vector<16x32xf32> to vector<8x8xf32>
    %376 = tpu.transpose %374, [1, 0] : vector<8x8xf32> -> vector<8x8xf32>
    %cst_117 = arith.constant dense<0.000000e+00> : vector<8x8xf32>
    %377 = tpu.matmul %373, %376, %cst_117 {dimension_numbers = #tpu.dot_dimension_numbers<[1], [0], [0], [1], [0, 0, 1, 1], [], []>} : vector<8x8xf32>, vector<8x8xf32>, vector<8x8xf32> -> vector<8x8xf32>
    %cst_118 = arith.constant 0.353553385 : f32
    %378 = vector.broadcast %cst_118 : f32 to vector<8x8xf32>
    %379 = arith.mulf %377, %378 : vector<8x8xf32>
    %380 = vector.broadcast %332 : vector<1x8xf32> to vector<8x8xf32>
    %381 = arith.addf %379, %380 : vector<8x8xf32>
    %cst_119 = arith.constant dense<0xFF800000> : vector<8xf32>
    %382 = vector.multi_reduction <maximumf>, %381, %cst_119 [1] : vector<8x8xf32> to vector<8xf32>
    %383 = vector.shape_cast %382 : vector<8xf32> to vector<8x1xf32>
    %384 = vector.broadcast %383 : vector<8x1xf32> to vector<8x8xf32>
    %385 = arith.subf %381, %384 : vector<8x8xf32>
    %386 = math.exp %385 : vector<8x8xf32>
    %cst_120 = arith.constant dense<0.000000e+00> : vector<8xf32>
    %387 = vector.multi_reduction <add>, %386, %cst_120 [1] : vector<8x8xf32> to vector<8xf32>
    %388 = vector.shape_cast %387 : vector<8xf32> to vector<8x1xf32>
    %389 = tpu.reciprocal %388 {approx = true} : vector<8x1xf32> -> vector<8x1xf32>
    %390 = vector.broadcast %389 : vector<8x1xf32> to vector<8x8xf32>
    %391 = arith.mulf %386, %390 : vector<8x8xf32>
    %cst_121 = arith.constant dense<0.000000e+00> : vector<8x8xf32>
    %392 = tpu.matmul %391, %375, %cst_121 {dimension_numbers = #tpu.dot_dimension_numbers<[1], [0], [0], [1], [0, 0, 1, 1], [], []>} : vector<8x8xf32>, vector<8x8xf32>, vector<8x8xf32> -> vector<8x8xf32>
    %393 = vector.extract_strided_slice %325 {offsets = [0, 24], sizes = [8, 8], strides = [1, 1]} : vector<16x32xf32> to vector<8x8xf32>
    %394 = vector.extract_strided_slice %326 {offsets = [0, 24], sizes = [8, 8], strides = [1, 1]} : vector<16x32xf32> to vector<8x8xf32>
    %395 = vector.extract_strided_slice %327 {offsets = [0, 24], sizes = [8, 8], strides = [1, 1]} : vector<16x32xf32> to vector<8x8xf32>
    %396 = tpu.transpose %394, [1, 0] : vector<8x8xf32> -> vector<8x8xf32>
    %cst_122 = arith.constant dense<0.000000e+00> : vector<8x8xf32>
    %397 = tpu.matmul %393, %396, %cst_122 {dimension_numbers = #tpu.dot_dimension_numbers<[1], [0], [0], [1], [0, 0, 1, 1], [], []>} : vector<8x8xf32>, vector<8x8xf32>, vector<8x8xf32> -> vector<8x8xf32>
    %cst_123 = arith.constant 0.353553385 : f32
    %398 = vector.broadcast %cst_123 : f32 to vector<8x8xf32>
    %399 = arith.mulf %397, %398 : vector<8x8xf32>
    %400 = vector.broadcast %332 : vector<1x8xf32> to vector<8x8xf32>
    %401 = arith.addf %399, %400 : vector<8x8xf32>
    %cst_124 = arith.constant dense<0xFF800000> : vector<8xf32>
    %402 = vector.multi_reduction <maximumf>, %401, %cst_124 [1] : vector<8x8xf32> to vector<8xf32>
    %403 = vector.shape_cast %402 : vector<8xf32> to vector<8x1xf32>
    %404 = vector.broadcast %403 : vector<8x1xf32> to vector<8x8xf32>
    %405 = arith.subf %401, %404 : vector<8x8xf32>
    %406 = math.exp %405 : vector<8x8xf32>
    %cst_125 = arith.constant dense<0.000000e+00> : vector<8xf32>
    %407 = vector.multi_reduction <add>, %406, %cst_125 [1] : vector<8x8xf32> to vector<8xf32>
    %408 = vector.shape_cast %407 : vector<8xf32> to vector<8x1xf32>
    %409 = tpu.reciprocal %408 {approx = true} : vector<8x1xf32> -> vector<8x1xf32>
    %410 = vector.broadcast %409 : vector<8x1xf32> to vector<8x8xf32>
    %411 = arith.mulf %406, %410 : vector<8x8xf32>
    %cst_126 = arith.constant dense<0.000000e+00> : vector<8x8xf32>
    %412 = tpu.matmul %411, %395, %cst_126 {dimension_numbers = #tpu.dot_dimension_numbers<[1], [0], [0], [1], [0, 0, 1, 1], [], []>} : vector<8x8xf32>, vector<8x8xf32>, vector<8x8xf32> -> vector<8x8xf32>
    %413 = tpu.concatenate %352, %372, %392, %412 in 1 : vector<8x8xf32>, vector<8x8xf32>, vector<8x8xf32>, vector<8x8xf32> -> vector<8x32xf32>
    %414 = vector.extract_strided_slice %34 {offsets = [1, 0], sizes = [1, 8], strides = [1, 1]} : vector<2x8xf32> to vector<1x8xf32>
    %cst_127 = arith.constant 1.000000e+00 : f32
    %415 = vector.broadcast %cst_127 : f32 to vector<1x8xf32>
    %416 = arith.subf %415, %414 : vector<1x8xf32>
    %cst_128 = arith.constant -1.000000e+09 : f32
    %417 = vector.broadcast %cst_128 : f32 to vector<1x8xf32>
    %418 = arith.mulf %416, %417 : vector<1x8xf32>
    %419 = vector.extract_strided_slice %325 {offsets = [8, 0], sizes = [8, 8], strides = [1, 1]} : vector<16x32xf32> to vector<8x8xf32>
    %420 = vector.extract_strided_slice %326 {offsets = [8, 0], sizes = [8, 8], strides = [1, 1]} : vector<16x32xf32> to vector<8x8xf32>
    %421 = vector.extract_strided_slice %327 {offsets = [8, 0], sizes = [8, 8], strides = [1, 1]} : vector<16x32xf32> to vector<8x8xf32>
    %422 = tpu.transpose %420, [1, 0] : vector<8x8xf32> -> vector<8x8xf32>
    %cst_129 = arith.constant dense<0.000000e+00> : vector<8x8xf32>
    %423 = tpu.matmul %419, %422, %cst_129 {dimension_numbers = #tpu.dot_dimension_numbers<[1], [0], [0], [1], [0, 0, 1, 1], [], []>} : vector<8x8xf32>, vector<8x8xf32>, vector<8x8xf32> -> vector<8x8xf32>
    %cst_130 = arith.constant 0.353553385 : f32
    %424 = vector.broadcast %cst_130 : f32 to vector<8x8xf32>
    %425 = arith.mulf %423, %424 : vector<8x8xf32>
    %426 = vector.broadcast %418 : vector<1x8xf32> to vector<8x8xf32>
    %427 = arith.addf %425, %426 : vector<8x8xf32>
    %cst_131 = arith.constant dense<0xFF800000> : vector<8xf32>
    %428 = vector.multi_reduction <maximumf>, %427, %cst_131 [1] : vector<8x8xf32> to vector<8xf32>
    %429 = vector.shape_cast %428 : vector<8xf32> to vector<8x1xf32>
    %430 = vector.broadcast %429 : vector<8x1xf32> to vector<8x8xf32>
    %431 = arith.subf %427, %430 : vector<8x8xf32>
    %432 = math.exp %431 : vector<8x8xf32>
    %cst_132 = arith.constant dense<0.000000e+00> : vector<8xf32>
    %433 = vector.multi_reduction <add>, %432, %cst_132 [1] : vector<8x8xf32> to vector<8xf32>
    %434 = vector.shape_cast %433 : vector<8xf32> to vector<8x1xf32>
    %435 = tpu.reciprocal %434 {approx = true} : vector<8x1xf32> -> vector<8x1xf32>
    %436 = vector.broadcast %435 : vector<8x1xf32> to vector<8x8xf32>
    %437 = arith.mulf %432, %436 : vector<8x8xf32>
    %cst_133 = arith.constant dense<0.000000e+00> : vector<8x8xf32>
    %438 = tpu.matmul %437, %421, %cst_133 {dimension_numbers = #tpu.dot_dimension_numbers<[1], [0], [0], [1], [0, 0, 1, 1], [], []>} : vector<8x8xf32>, vector<8x8xf32>, vector<8x8xf32> -> vector<8x8xf32>
    %439 = vector.extract_strided_slice %325 {offsets = [8, 8], sizes = [8, 8], strides = [1, 1]} : vector<16x32xf32> to vector<8x8xf32>
    %440 = vector.extract_strided_slice %326 {offsets = [8, 8], sizes = [8, 8], strides = [1, 1]} : vector<16x32xf32> to vector<8x8xf32>
    %441 = vector.extract_strided_slice %327 {offsets = [8, 8], sizes = [8, 8], strides = [1, 1]} : vector<16x32xf32> to vector<8x8xf32>
    %442 = tpu.transpose %440, [1, 0] : vector<8x8xf32> -> vector<8x8xf32>
    %cst_134 = arith.constant dense<0.000000e+00> : vector<8x8xf32>
    %443 = tpu.matmul %439, %442, %cst_134 {dimension_numbers = #tpu.dot_dimension_numbers<[1], [0], [0], [1], [0, 0, 1, 1], [], []>} : vector<8x8xf32>, vector<8x8xf32>, vector<8x8xf32> -> vector<8x8xf32>
    %cst_135 = arith.constant 0.353553385 : f32
    %444 = vector.broadcast %cst_135 : f32 to vector<8x8xf32>
    %445 = arith.mulf %443, %444 : vector<8x8xf32>
    %446 = vector.broadcast %418 : vector<1x8xf32> to vector<8x8xf32>
    %447 = arith.addf %445, %446 : vector<8x8xf32>
    %cst_136 = arith.constant dense<0xFF800000> : vector<8xf32>
    %448 = vector.multi_reduction <maximumf>, %447, %cst_136 [1] : vector<8x8xf32> to vector<8xf32>
    %449 = vector.shape_cast %448 : vector<8xf32> to vector<8x1xf32>
    %450 = vector.broadcast %449 : vector<8x1xf32> to vector<8x8xf32>
    %451 = arith.subf %447, %450 : vector<8x8xf32>
    %452 = math.exp %451 : vector<8x8xf32>
    %cst_137 = arith.constant dense<0.000000e+00> : vector<8xf32>
    %453 = vector.multi_reduction <add>, %452, %cst_137 [1] : vector<8x8xf32> to vector<8xf32>
    %454 = vector.shape_cast %453 : vector<8xf32> to vector<8x1xf32>
    %455 = tpu.reciprocal %454 {approx = true} : vector<8x1xf32> -> vector<8x1xf32>
    %456 = vector.broadcast %455 : vector<8x1xf32> to vector<8x8xf32>
    %457 = arith.mulf %452, %456 : vector<8x8xf32>
    %cst_138 = arith.constant dense<0.000000e+00> : vector<8x8xf32>
    %458 = tpu.matmul %457, %441, %cst_138 {dimension_numbers = #tpu.dot_dimension_numbers<[1], [0], [0], [1], [0, 0, 1, 1], [], []>} : vector<8x8xf32>, vector<8x8xf32>, vector<8x8xf32> -> vector<8x8xf32>
    %459 = vector.extract_strided_slice %325 {offsets = [8, 16], sizes = [8, 8], strides = [1, 1]} : vector<16x32xf32> to vector<8x8xf32>
    %460 = vector.extract_strided_slice %326 {offsets = [8, 16], sizes = [8, 8], strides = [1, 1]} : vector<16x32xf32> to vector<8x8xf32>
    %461 = vector.extract_strided_slice %327 {offsets = [8, 16], sizes = [8, 8], strides = [1, 1]} : vector<16x32xf32> to vector<8x8xf32>
    %462 = tpu.transpose %460, [1, 0] : vector<8x8xf32> -> vector<8x8xf32>
    %cst_139 = arith.constant dense<0.000000e+00> : vector<8x8xf32>
    %463 = tpu.matmul %459, %462, %cst_139 {dimension_numbers = #tpu.dot_dimension_numbers<[1], [0], [0], [1], [0, 0, 1, 1], [], []>} : vector<8x8xf32>, vector<8x8xf32>, vector<8x8xf32> -> vector<8x8xf32>
    %cst_140 = arith.constant 0.353553385 : f32
    %464 = vector.broadcast %cst_140 : f32 to vector<8x8xf32>
    %465 = arith.mulf %463, %464 : vector<8x8xf32>
    %466 = vector.broadcast %418 : vector<1x8xf32> to vector<8x8xf32>
    %467 = arith.addf %465, %466 : vector<8x8xf32>
    %cst_141 = arith.constant dense<0xFF800000> : vector<8xf32>
    %468 = vector.multi_reduction <maximumf>, %467, %cst_141 [1] : vector<8x8xf32> to vector<8xf32>
    %469 = vector.shape_cast %468 : vector<8xf32> to vector<8x1xf32>
    %470 = vector.broadcast %469 : vector<8x1xf32> to vector<8x8xf32>
    %471 = arith.subf %467, %470 : vector<8x8xf32>
    %472 = math.exp %471 : vector<8x8xf32>
    %cst_142 = arith.constant dense<0.000000e+00> : vector<8xf32>
    %473 = vector.multi_reduction <add>, %472, %cst_142 [1] : vector<8x8xf32> to vector<8xf32>
    %474 = vector.shape_cast %473 : vector<8xf32> to vector<8x1xf32>
    %475 = tpu.reciprocal %474 {approx = true} : vector<8x1xf32> -> vector<8x1xf32>
    %476 = vector.broadcast %475 : vector<8x1xf32> to vector<8x8xf32>
    %477 = arith.mulf %472, %476 : vector<8x8xf32>
    %cst_143 = arith.constant dense<0.000000e+00> : vector<8x8xf32>
    %478 = tpu.matmul %477, %461, %cst_143 {dimension_numbers = #tpu.dot_dimension_numbers<[1], [0], [0], [1], [0, 0, 1, 1], [], []>} : vector<8x8xf32>, vector<8x8xf32>, vector<8x8xf32> -> vector<8x8xf32>
    %479 = vector.extract_strided_slice %325 {offsets = [8, 24], sizes = [8, 8], strides = [1, 1]} : vector<16x32xf32> to vector<8x8xf32>
    %480 = vector.extract_strided_slice %326 {offsets = [8, 24], sizes = [8, 8], strides = [1, 1]} : vector<16x32xf32> to vector<8x8xf32>
    %481 = vector.extract_strided_slice %327 {offsets = [8, 24], sizes = [8, 8], strides = [1, 1]} : vector<16x32xf32> to vector<8x8xf32>
    %482 = tpu.transpose %480, [1, 0] : vector<8x8xf32> -> vector<8x8xf32>
    %cst_144 = arith.constant dense<0.000000e+00> : vector<8x8xf32>
    %483 = tpu.matmul %479, %482, %cst_144 {dimension_numbers = #tpu.dot_dimension_numbers<[1], [0], [0], [1], [0, 0, 1, 1], [], []>} : vector<8x8xf32>, vector<8x8xf32>, vector<8x8xf32> -> vector<8x8xf32>
    %cst_145 = arith.constant 0.353553385 : f32
    %484 = vector.broadcast %cst_145 : f32 to vector<8x8xf32>
    %485 = arith.mulf %483, %484 : vector<8x8xf32>
    %486 = vector.broadcast %418 : vector<1x8xf32> to vector<8x8xf32>
    %487 = arith.addf %485, %486 : vector<8x8xf32>
    %cst_146 = arith.constant dense<0xFF800000> : vector<8xf32>
    %488 = vector.multi_reduction <maximumf>, %487, %cst_146 [1] : vector<8x8xf32> to vector<8xf32>
    %489 = vector.shape_cast %488 : vector<8xf32> to vector<8x1xf32>
    %490 = vector.broadcast %489 : vector<8x1xf32> to vector<8x8xf32>
    %491 = arith.subf %487, %490 : vector<8x8xf32>
    %492 = math.exp %491 : vector<8x8xf32>
    %cst_147 = arith.constant dense<0.000000e+00> : vector<8xf32>
    %493 = vector.multi_reduction <add>, %492, %cst_147 [1] : vector<8x8xf32> to vector<8xf32>
    %494 = vector.shape_cast %493 : vector<8xf32> to vector<8x1xf32>
    %495 = tpu.reciprocal %494 {approx = true} : vector<8x1xf32> -> vector<8x1xf32>
    %496 = vector.broadcast %495 : vector<8x1xf32> to vector<8x8xf32>
    %497 = arith.mulf %492, %496 : vector<8x8xf32>
    %cst_148 = arith.constant dense<0.000000e+00> : vector<8x8xf32>
    %498 = tpu.matmul %497, %481, %cst_148 {dimension_numbers = #tpu.dot_dimension_numbers<[1], [0], [0], [1], [0, 0, 1, 1], [], []>} : vector<8x8xf32>, vector<8x8xf32>, vector<8x8xf32> -> vector<8x8xf32>
    %499 = tpu.concatenate %438, %458, %478, %498 in 1 : vector<8x8xf32>, vector<8x8xf32>, vector<8x8xf32>, vector<8x8xf32> -> vector<8x32xf32>
    %500 = tpu.concatenate %413, %499 in 0 : vector<8x32xf32>, vector<8x32xf32> -> vector<16x32xf32>
    %cst_149 = arith.constant dense<0.000000e+00> : vector<16x32xf32>
    %501 = tpu.matmul %500, %312, %cst_149 {dimension_numbers = #tpu.dot_dimension_numbers<[1], [0], [0], [1], [0, 0, 1, 1], [], []>} : vector<16x32xf32>, vector<32x32xf32>, vector<16x32xf32> -> vector<16x32xf32>
    %502 = vector.broadcast %313 : vector<1x32xf32> to vector<16x32xf32>
    %503 = arith.addf %501, %502 : vector<16x32xf32>
    %504 = arith.addf %309, %503 : vector<16x32xf32>
    %cst_150 = arith.constant dense<0.000000e+00> : vector<16xf32>
    %505 = vector.multi_reduction <add>, %504, %cst_150 [1] : vector<16x32xf32> to vector<16xf32>
    %506 = vector.shape_cast %505 : vector<16xf32> to vector<16x1xf32>
    %cst_151 = arith.constant 3.200000e+01 : f32
    %507 = vector.broadcast %cst_151 : f32 to vector<16x1xf32>
    %508 = arith.divf %506, %507 : vector<16x1xf32>
    %509 = vector.broadcast %508 : vector<16x1xf32> to vector<16x32xf32>
    %510 = arith.subf %504, %509 : vector<16x32xf32>
    %511 = vector.broadcast %508 : vector<16x1xf32> to vector<16x32xf32>
    %512 = arith.subf %504, %511 : vector<16x32xf32>
    %513 = arith.mulf %510, %512 : vector<16x32xf32>
    %cst_152 = arith.constant dense<0.000000e+00> : vector<16xf32>
    %514 = vector.multi_reduction <add>, %513, %cst_152 [1] : vector<16x32xf32> to vector<16xf32>
    %515 = vector.shape_cast %514 : vector<16xf32> to vector<16x1xf32>
    %cst_153 = arith.constant 3.200000e+01 : f32
    %516 = vector.broadcast %cst_153 : f32 to vector<16x1xf32>
    %517 = arith.divf %515, %516 : vector<16x1xf32>
    %518 = vector.broadcast %508 : vector<16x1xf32> to vector<16x32xf32>
    %519 = arith.subf %504, %518 : vector<16x32xf32>
    %cst_154 = arith.constant 9.99999996E-13 : f32
    %520 = vector.broadcast %cst_154 : f32 to vector<16x1xf32>
    %521 = arith.addf %517, %520 : vector<16x1xf32>
    %522 = math.rsqrt %521 : vector<16x1xf32>
    %523 = vector.broadcast %522 : vector<16x1xf32> to vector<16x32xf32>
    %524 = arith.mulf %519, %523 : vector<16x32xf32>
    %525 = vector.broadcast %314 : vector<1x32xf32> to vector<16x32xf32>
    %526 = arith.mulf %524, %525 : vector<16x32xf32>
    %527 = vector.broadcast %315 : vector<1x32xf32> to vector<16x32xf32>
    %528 = arith.addf %526, %527 : vector<16x32xf32>
    %cst_155 = arith.constant dense<0.000000e+00> : vector<16x64xf32>
    %529 = tpu.matmul %528, %316, %cst_155 {dimension_numbers = #tpu.dot_dimension_numbers<[1], [0], [0], [1], [0, 0, 1, 1], [], []>} : vector<16x32xf32>, vector<32x64xf32>, vector<16x64xf32> -> vector<16x64xf32>
    %530 = vector.broadcast %317 : vector<1x64xf32> to vector<16x64xf32>
    %531 = arith.addf %529, %530 : vector<16x64xf32>
    %cst_156 = arith.constant 5.000000e-01 : f32
    %532 = vector.broadcast %cst_156 : f32 to vector<16x64xf32>
    %533 = arith.mulf %532, %531 : vector<16x64xf32>
    %cst_157 = arith.constant 4.471500e-02 : f32
    %534 = vector.broadcast %cst_157 : f32 to vector<16x64xf32>
    %535 = arith.mulf %534, %531 : vector<16x64xf32>
    %536 = arith.mulf %535, %531 : vector<16x64xf32>
    %537 = arith.mulf %536, %531 : vector<16x64xf32>
    %538 = arith.addf %531, %537 : vector<16x64xf32>
    %cst_158 = arith.constant 0.797884583 : f32
    %539 = vector.broadcast %cst_158 : f32 to vector<16x64xf32>
    %540 = arith.mulf %539, %538 : vector<16x64xf32>
    %541 = math.tanh %540 : vector<16x64xf32>
    %cst_159 = arith.constant 1.000000e+00 : f32
    %542 = vector.broadcast %cst_159 : f32 to vector<16x64xf32>
    %543 = arith.addf %542, %541 : vector<16x64xf32>
    %544 = arith.mulf %533, %543 : vector<16x64xf32>
    %cst_160 = arith.constant dense<0.000000e+00> : vector<16x32xf32>
    %545 = tpu.matmul %544, %318, %cst_160 {dimension_numbers = #tpu.dot_dimension_numbers<[1], [0], [0], [1], [0, 0, 1, 1], [], []>} : vector<16x64xf32>, vector<64x32xf32>, vector<16x32xf32> -> vector<16x32xf32>
    %546 = vector.broadcast %319 : vector<1x32xf32> to vector<16x32xf32>
    %547 = arith.addf %545, %546 : vector<16x32xf32>
    %548 = arith.addf %528, %547 : vector<16x32xf32>
    %cst_161 = arith.constant dense<0.000000e+00> : vector<16xf32>
    %549 = vector.multi_reduction <add>, %548, %cst_161 [1] : vector<16x32xf32> to vector<16xf32>
    %550 = vector.shape_cast %549 : vector<16xf32> to vector<16x1xf32>
    %cst_162 = arith.constant 3.200000e+01 : f32
    %551 = vector.broadcast %cst_162 : f32 to vector<16x1xf32>
    %552 = arith.divf %550, %551 : vector<16x1xf32>
    %553 = vector.broadcast %552 : vector<16x1xf32> to vector<16x32xf32>
    %554 = arith.subf %548, %553 : vector<16x32xf32>
    %555 = vector.broadcast %552 : vector<16x1xf32> to vector<16x32xf32>
    %556 = arith.subf %548, %555 : vector<16x32xf32>
    %557 = arith.mulf %554, %556 : vector<16x32xf32>
    %cst_163 = arith.constant dense<0.000000e+00> : vector<16xf32>
    %558 = vector.multi_reduction <add>, %557, %cst_163 [1] : vector<16x32xf32> to vector<16xf32>
    %559 = vector.shape_cast %558 : vector<16xf32> to vector<16x1xf32>
    %cst_164 = arith.constant 3.200000e+01 : f32
    %560 = vector.broadcast %cst_164 : f32 to vector<16x1xf32>
    %561 = arith.divf %559, %560 : vector<16x1xf32>
    %562 = vector.broadcast %552 : vector<16x1xf32> to vector<16x32xf32>
    %563 = arith.subf %548, %562 : vector<16x32xf32>
    %cst_165 = arith.constant 9.99999996E-13 : f32
    %564 = vector.broadcast %cst_165 : f32 to vector<16x1xf32>
    %565 = arith.addf %561, %564 : vector<16x1xf32>
    %566 = math.rsqrt %565 : vector<16x1xf32>
    %567 = vector.broadcast %566 : vector<16x1xf32> to vector<16x32xf32>
    %568 = arith.mulf %563, %567 : vector<16x32xf32>
    %569 = vector.broadcast %320 : vector<1x32xf32> to vector<16x32xf32>
    %570 = arith.mulf %568, %569 : vector<16x32xf32>
    %571 = vector.broadcast %321 : vector<1x32xf32> to vector<16x32xf32>
    %572 = arith.addf %570, %571 : vector<16x32xf32>
    %c0_166 = arith.constant 0 : index
    %c0_167 = arith.constant 0 : index
    %573 = vector.load %arg20[%c0_166, %c0_167] : memref<64x2xf32, #tpu.memory_space<vmem>>, vector<64x2xf32>
    %c0_168 = arith.constant 0 : index
    %c0_169 = arith.constant 0 : index
    %574 = vector.load %arg21[%c0_168, %c0_169] : memref<1x2xf32, #tpu.memory_space<vmem>>, vector<1x2xf32>
    %575 = vector.extract_strided_slice %572 {offsets = [0, 0], sizes = [1, 32], strides = [1, 1]} : vector<16x32xf32> to vector<1x32xf32>
    %576 = vector.extract_strided_slice %572 {offsets = [8, 0], sizes = [1, 32], strides = [1, 1]} : vector<16x32xf32> to vector<1x32xf32>
    %577 = tpu.concatenate %575, %576 in 0 : vector<1x32xf32>, vector<1x32xf32> -> vector<2x32xf32>
    %578 = vector.extract_strided_slice %572 {offsets = [4, 0], sizes = [1, 32], strides = [1, 1]} : vector<16x32xf32> to vector<1x32xf32>
    %579 = vector.extract_strided_slice %572 {offsets = [12, 0], sizes = [1, 32], strides = [1, 1]} : vector<16x32xf32> to vector<1x32xf32>
    %580 = tpu.concatenate %578, %579 in 0 : vector<1x32xf32>, vector<1x32xf32> -> vector<2x32xf32>
    %581 = vector.extract_strided_slice %573 {offsets = [0, 0], sizes = [32, 2], strides = [1, 1]} : vector<64x2xf32> to vector<32x2xf32>
    %cst_170 = arith.constant dense<0.000000e+00> : vector<2x2xf32>
    %582 = tpu.matmul %577, %581, %cst_170 {dimension_numbers = #tpu.dot_dimension_numbers<[1], [0], [0], [1], [0, 0, 1, 1], [], []>} : vector<2x32xf32>, vector<32x2xf32>, vector<2x2xf32> -> vector<2x2xf32>
    %583 = vector.extract_strided_slice %573 {offsets = [32, 0], sizes = [32, 2], strides = [1, 1]} : vector<64x2xf32> to vector<32x2xf32>
    %cst_171 = arith.constant dense<0.000000e+00> : vector<2x2xf32>
    %584 = tpu.matmul %580, %583, %cst_171 {dimension_numbers = #tpu.dot_dimension_numbers<[1], [0], [0], [1], [0, 0, 1, 1], [], []>} : vector<2x32xf32>, vector<32x2xf32>, vector<2x2xf32> -> vector<2x2xf32>
    %585 = arith.addf %582, %584 : vector<2x2xf32>
    %586 = vector.broadcast %574 : vector<1x2xf32> to vector<2x2xf32>
    %587 = arith.addf %585, %586 : vector<2x2xf32>
    %cst_172 = arith.constant dense<0xFF800000> : vector<2xf32>
    %588 = vector.multi_reduction <maximumf>, %587, %cst_172 [1] : vector<2x2xf32> to vector<2xf32>
    %589 = vector.shape_cast %588 : vector<2xf32> to vector<2x1xf32>
    %590 = vector.broadcast %589 : vector<2x1xf32> to vector<2x2xf32>
    %591 = arith.subf %587, %590 : vector<2x2xf32>
    %592 = math.exp %591 : vector<2x2xf32>
    %cst_173 = arith.constant dense<0.000000e+00> : vector<2xf32>
    %593 = vector.multi_reduction <add>, %592, %cst_173 [1] : vector<2x2xf32> to vector<2xf32>
    %594 = vector.shape_cast %593 : vector<2xf32> to vector<2x1xf32>
    %595 = vector.broadcast %594 : vector<2x1xf32> to vector<2x2xf32>
    %596 = arith.divf %592, %595 : vector<2x2xf32>
    %597 = vector.extract_strided_slice %596 {offsets = [0, 1], sizes = [2, 1], strides = [1, 1]} : vector<2x2xf32> to vector<2x1xf32>
    %598 = vector.extract_strided_slice %309 {offsets = [0, 0], sizes = [8, 32], strides = [1, 1]} : vector<16x32xf32> to vector<8x32xf32>
    %599 = vector.extract_strided_slice %34 {offsets = [0, 0], sizes = [1, 8], strides = [1, 1]} : vector<2x8xf32> to vector<1x8xf32>
    %600 = vector.extract_strided_slice %599 {offsets = [0, 0], sizes = [1, 4], strides = [1, 1]} : vector<1x8xf32> to vector<1x4xf32>
    %601 = vector.extract_strided_slice %599 {offsets = [0, 4], sizes = [1, 4], strides = [1, 1]} : vector<1x8xf32> to vector<1x4xf32>
    %602 = vector.extract_strided_slice %598 {offsets = [0, 0], sizes = [4, 32], strides = [1, 1]} : vector<8x32xf32> to vector<4x32xf32>
    %cst_174 = arith.constant dense<0.000000e+00> : vector<1x32xf32>
    %603 = tpu.matmul %600, %602, %cst_174 {dimension_numbers = #tpu.dot_dimension_numbers<[1], [0], [0], [1], [0, 0, 1, 1], [], []>} : vector<1x4xf32>, vector<4x32xf32>, vector<1x32xf32> -> vector<1x32xf32>
    %cst_175 = arith.constant dense<0.000000e+00> : vector<1xf32>
    %604 = vector.multi_reduction <add>, %600, %cst_175 [1] : vector<1x4xf32> to vector<1xf32>
    %605 = vector.shape_cast %604 : vector<1xf32> to vector<1x1xf32>
    %cst_176 = arith.constant 9.99999971E-10 : f32
    %606 = vector.broadcast %cst_176 : f32 to vector<1x1xf32>
    %607 = arith.maximumf %605, %606 : vector<1x1xf32>
    %608 = vector.broadcast %607 : vector<1x1xf32> to vector<1x32xf32>
    %609 = arith.divf %603, %608 : vector<1x32xf32>
    %610 = vector.extract_strided_slice %598 {offsets = [4, 0], sizes = [4, 32], strides = [1, 1]} : vector<8x32xf32> to vector<4x32xf32>
    %cst_177 = arith.constant dense<0.000000e+00> : vector<1x32xf32>
    %611 = tpu.matmul %601, %610, %cst_177 {dimension_numbers = #tpu.dot_dimension_numbers<[1], [0], [0], [1], [0, 0, 1, 1], [], []>} : vector<1x4xf32>, vector<4x32xf32>, vector<1x32xf32> -> vector<1x32xf32>
    %cst_178 = arith.constant dense<0.000000e+00> : vector<1xf32>
    %612 = vector.multi_reduction <add>, %601, %cst_178 [1] : vector<1x4xf32> to vector<1xf32>
    %613 = vector.shape_cast %612 : vector<1xf32> to vector<1x1xf32>
    %cst_179 = arith.constant 9.99999971E-10 : f32
    %614 = vector.broadcast %cst_179 : f32 to vector<1x1xf32>
    %615 = arith.maximumf %613, %614 : vector<1x1xf32>
    %616 = vector.broadcast %615 : vector<1x1xf32> to vector<1x32xf32>
    %617 = arith.divf %611, %616 : vector<1x32xf32>
    %618 = vector.extract_strided_slice %309 {offsets = [8, 0], sizes = [8, 32], strides = [1, 1]} : vector<16x32xf32> to vector<8x32xf32>
    %619 = vector.extract_strided_slice %34 {offsets = [1, 0], sizes = [1, 8], strides = [1, 1]} : vector<2x8xf32> to vector<1x8xf32>
    %620 = vector.extract_strided_slice %619 {offsets = [0, 0], sizes = [1, 4], strides = [1, 1]} : vector<1x8xf32> to vector<1x4xf32>
    %621 = vector.extract_strided_slice %619 {offsets = [0, 4], sizes = [1, 4], strides = [1, 1]} : vector<1x8xf32> to vector<1x4xf32>
    %622 = vector.extract_strided_slice %618 {offsets = [0, 0], sizes = [4, 32], strides = [1, 1]} : vector<8x32xf32> to vector<4x32xf32>
    %cst_180 = arith.constant dense<0.000000e+00> : vector<1x32xf32>
    %623 = tpu.matmul %620, %622, %cst_180 {dimension_numbers = #tpu.dot_dimension_numbers<[1], [0], [0], [1], [0, 0, 1, 1], [], []>} : vector<1x4xf32>, vector<4x32xf32>, vector<1x32xf32> -> vector<1x32xf32>
    %cst_181 = arith.constant dense<0.000000e+00> : vector<1xf32>
    %624 = vector.multi_reduction <add>, %620, %cst_181 [1] : vector<1x4xf32> to vector<1xf32>
    %625 = vector.shape_cast %624 : vector<1xf32> to vector<1x1xf32>
    %cst_182 = arith.constant 9.99999971E-10 : f32
    %626 = vector.broadcast %cst_182 : f32 to vector<1x1xf32>
    %627 = arith.maximumf %625, %626 : vector<1x1xf32>
    %628 = vector.broadcast %627 : vector<1x1xf32> to vector<1x32xf32>
    %629 = arith.divf %623, %628 : vector<1x32xf32>
    %630 = vector.extract_strided_slice %618 {offsets = [4, 0], sizes = [4, 32], strides = [1, 1]} : vector<8x32xf32> to vector<4x32xf32>
    %cst_183 = arith.constant dense<0.000000e+00> : vector<1x32xf32>
    %631 = tpu.matmul %621, %630, %cst_183 {dimension_numbers = #tpu.dot_dimension_numbers<[1], [0], [0], [1], [0, 0, 1, 1], [], []>} : vector<1x4xf32>, vector<4x32xf32>, vector<1x32xf32> -> vector<1x32xf32>
    %cst_184 = arith.constant dense<0.000000e+00> : vector<1xf32>
    %632 = vector.multi_reduction <add>, %621, %cst_184 [1] : vector<1x4xf32> to vector<1xf32>
    %633 = vector.shape_cast %632 : vector<1xf32> to vector<1x1xf32>
    %cst_185 = arith.constant 9.99999971E-10 : f32
    %634 = vector.broadcast %cst_185 : f32 to vector<1x1xf32>
    %635 = arith.maximumf %633, %634 : vector<1x1xf32>
    %636 = vector.broadcast %635 : vector<1x1xf32> to vector<1x32xf32>
    %637 = arith.divf %631, %636 : vector<1x32xf32>
    %638 = tpu.concatenate %609, %629 in 0 : vector<1x32xf32>, vector<1x32xf32> -> vector<2x32xf32>
    %639 = tpu.concatenate %617, %637 in 0 : vector<1x32xf32>, vector<1x32xf32> -> vector<2x32xf32>
    %640 = arith.mulf %638, %638 : vector<2x32xf32>
    %cst_186 = arith.constant dense<0.000000e+00> : vector<2xf32>
    %641 = vector.multi_reduction <add>, %640, %cst_186 [1] : vector<2x32xf32> to vector<2xf32>
    %642 = vector.shape_cast %641 : vector<2xf32> to vector<2x1xf32>
    %643 = math.sqrt %642 : vector<2x1xf32>
    %644 = arith.mulf %639, %639 : vector<2x32xf32>
    %cst_187 = arith.constant dense<0.000000e+00> : vector<2xf32>
    %645 = vector.multi_reduction <add>, %644, %cst_187 [1] : vector<2x32xf32> to vector<2xf32>
    %646 = vector.shape_cast %645 : vector<2xf32> to vector<2x1xf32>
    %647 = math.sqrt %646 : vector<2x1xf32>
    %648 = arith.mulf %638, %639 : vector<2x32xf32>
    %cst_188 = arith.constant dense<0.000000e+00> : vector<2xf32>
    %649 = vector.multi_reduction <add>, %648, %cst_188 [1] : vector<2x32xf32> to vector<2xf32>
    %650 = vector.shape_cast %649 : vector<2xf32> to vector<2x1xf32>
    %cst_189 = arith.constant 9.99999993E-9 : f32
    %651 = vector.broadcast %cst_189 : f32 to vector<2x1xf32>
    %652 = arith.maximumf %643, %651 : vector<2x1xf32>
    %cst_190 = arith.constant 9.99999993E-9 : f32
    %653 = vector.broadcast %cst_190 : f32 to vector<2x1xf32>
    %654 = arith.maximumf %647, %653 : vector<2x1xf32>
    %655 = arith.mulf %652, %654 : vector<2x1xf32>
    %656 = arith.divf %650, %655 : vector<2x1xf32>
    %cst_191 = arith.constant 0.000000e+00 : f32
    %657 = vector.broadcast %cst_191 : f32 to vector<2x126xf32>
    %658 = tpu.concatenate %597, %656, %657 in 1 : vector<2x1xf32>, vector<2x1xf32>, vector<2x126xf32> -> vector<2x128xf32>
    %c0_192 = arith.constant 0 : index
    %c0_193 = arith.constant 0 : index
    %659 = vector.load %arg22[%c0_192, %c0_193] : memref<2x128xf32, #tpu.memory_space<vmem>>, vector<2x128xf32>
    tpu.vector_store %arg22[%c0_192, %c0_193], %658 {strides = array<i32>} : memref<2x128xf32, #tpu.memory_space<vmem>>, vector<2x128xf32>,
    return
  }
  func.func @transform_0(%arg0: i32) -> (i32, i32) {
    %c0_i32 = arith.constant 0 : i32
    %c0_i32_0 = arith.constant 0 : i32
    %c0_i32_1 = arith.constant 0 : i32
    return %c0_i32, %c0_i32_0 : i32, i32
  }
  func.func @transform_1(%arg0: i32) -> (i32, i32) {
    %c0_i32 = arith.constant 0 : i32
    %c0_i32_0 = arith.constant 0 : i32
    %c0_i32_1 = arith.constant 0 : i32
    return %c0_i32, %c0_i32_0 : i32, i32
  }
  func.func @transform_2(%arg0: i32) -> (i32, i32) {
    %c0_i32 = arith.constant 0 : i32
    %c0_i32_0 = arith.constant 0 : i32
    %c0_i32_1 = arith.constant 0 : i32
    return %c0_i32, %c0_i32_0 : i32, i32
  }
  func.func @transform_3(%arg0: i32) -> (i32, i32) {
    %c0_i32 = arith.constant 0 : i32
    %c0_i32_0 = arith.constant 0 : i32
    %c0_i32_1 = arith.constant 0 : i32
    return %c0_i32, %c0_i32_0 : i32, i32
  }
  func.func @transform_4(%arg0: i32) -> (i32, i32) {
    %c0_i32 = arith.constant 0 : i32
    %c0_i32_0 = arith.constant 0 : i32
    %c0_i32_1 = arith.constant 0 : i32
    return %c0_i32, %c0_i32_0 : i32, i32
  }
  func.func @transform_5(%arg0: i32) -> (i32, i32) {
    %c0_i32 = arith.constant 0 : i32
    %c0_i32_0 = arith.constant 0 : i32
    %c0_i32_1 = arith.constant 0 : i32
    return %c0_i32, %c0_i32_0 : i32, i32
  }
  func.func @transform_6(%arg0: i32) -> (i32, i32) {
    %c0_i32 = arith.constant 0 : i32
    %c0_i32_0 = arith.constant 0 : i32
    %c0_i32_1 = arith.constant 0 : i32
    return %c0_i32, %c0_i32_0 : i32, i32
  }
  func.func @transform_7(%arg0: i32) -> (i32, i32) {
    %c0_i32 = arith.constant 0 : i32
    %c0_i32_0 = arith.constant 0 : i32
    %c0_i32_1 = arith.constant 0 : i32
    return %c0_i32, %c0_i32_0 : i32, i32
  }
  func.func @transform_8(%arg0: i32) -> (i32, i32) {
    %c0_i32 = arith.constant 0 : i32
    %c0_i32_0 = arith.constant 0 : i32
    %c0_i32_1 = arith.constant 0 : i32
    return %c0_i32, %c0_i32_0 : i32, i32
  }
  func.func @transform_9(%arg0: i32) -> (i32, i32) {
    %c0_i32 = arith.constant 0 : i32
    %c0_i32_0 = arith.constant 0 : i32
    %c0_i32_1 = arith.constant 0 : i32
    return %c0_i32, %c0_i32_0 : i32, i32
  }
  func.func @transform_10(%arg0: i32) -> (i32, i32) {
    %c0_i32 = arith.constant 0 : i32
    %c0_i32_0 = arith.constant 0 : i32
    %c0_i32_1 = arith.constant 0 : i32
    return %c0_i32, %c0_i32_0 : i32, i32
  }
  func.func @transform_11(%arg0: i32) -> (i32, i32) {
    %c0_i32 = arith.constant 0 : i32
    %c0_i32_0 = arith.constant 0 : i32
    %c0_i32_1 = arith.constant 0 : i32
    return %c0_i32, %c0_i32_0 : i32, i32
  }
  func.func @transform_12(%arg0: i32) -> (i32, i32) {
    %c0_i32 = arith.constant 0 : i32
    %c0_i32_0 = arith.constant 0 : i32
    %c0_i32_1 = arith.constant 0 : i32
    return %c0_i32, %c0_i32_0 : i32, i32
  }
  func.func @transform_13(%arg0: i32) -> (i32, i32) {
    %c0_i32 = arith.constant 0 : i32
    %c0_i32_0 = arith.constant 0 : i32
    %c0_i32_1 = arith.constant 0 : i32
    return %c0_i32, %c0_i32_0 : i32, i32
  }
  func.func @transform_14(%arg0: i32) -> (i32, i32) {
    %c0_i32 = arith.constant 0 : i32
    %c0_i32_0 = arith.constant 0 : i32
    %c0_i32_1 = arith.constant 0 : i32
    return %c0_i32, %c0_i32_0 : i32, i32
  }
  func.func @transform_15(%arg0: i32) -> (i32, i32) {
    %c0_i32 = arith.constant 0 : i32
    %c0_i32_0 = arith.constant 0 : i32
    %c0_i32_1 = arith.constant 0 : i32
    return %c0_i32, %c0_i32_0 : i32, i32
  }
  func.func @transform_16(%arg0: i32) -> (i32, i32) {
    %c0_i32 = arith.constant 0 : i32
    %c0_i32_0 = arith.constant 0 : i32
    %c0_i32_1 = arith.constant 0 : i32
    return %c0_i32, %c0_i32_0 : i32, i32
  }
  func.func @transform_17(%arg0: i32) -> (i32, i32) {
    %c0_i32 = arith.constant 0 : i32
    %c0_i32_0 = arith.constant 0 : i32
    %c0_i32_1 = arith.constant 0 : i32
    return %c0_i32, %c0_i32_0 : i32, i32
  }
  func.func @transform_18(%arg0: i32) -> (i32, i32) {
    %c0_i32 = arith.constant 0 : i32
    %c0_i32_0 = arith.constant 0 : i32
    %c0_i32_1 = arith.constant 0 : i32
    return %c0_i32, %c0_i32_0 : i32, i32
  }
  func.func @transform_19(%arg0: i32) -> (i32, i32) {
    %c0_i32 = arith.constant 0 : i32
    %c0_i32_0 = arith.constant 0 : i32
    %c0_i32_1 = arith.constant 0 : i32
    return %c0_i32, %c0_i32_0 : i32, i32
  }
  func.func @transform_20(%arg0: i32) -> (i32, i32) {
    %c0_i32 = arith.constant 0 : i32
    %c0_i32_0 = arith.constant 0 : i32
    %c0_i32_1 = arith.constant 0 : i32
    return %c0_i32, %c0_i32_0 : i32, i32
  }
  func.func @transform_21(%arg0: i32) -> (i32, i32) {
    %c0_i32 = arith.constant 0 : i32
    %c0_i32_0 = arith.constant 0 : i32
    %c0_i32_1 = arith.constant 0 : i32
    return %c0_i32, %c0_i32_0 : i32, i32
  }
}

</mosaic_0001>

<bundles_post_ra>
// kernel: acbert_forward.1
= control target key start
LH: loop header
LB: loop body
LE: loop exit
PB: predicated region body
PF: predicated region fallthrough
CT: control target
= control target key end

     0   :  { %vm76_vm0 = vcmask 261120   ;;  %v5128_v47 = vmov 0.0   ;;  %v263_v48 = vlaneseq  ;;  %vm5129_vm1 = vmmov 0   ;;  %s5134_s22 = smov 80   ;;  %s5135_s23 = smov 104   ;;  %s6021_s2 = inlined_call_operand.vmem [shape: f32[32,32], index: 2, kind: input, shape index: {}]   ;;  %s6022_s1 = inlined_call_operand.vmem [shape: f32[16,32], index: 1, kind: input, shape index: {}]   ;;  %s6023_s0 = inlined_call_operand.vmem [shape: f32[16,32], index: 0, kind: input, shape index: {}]   ;;  %s6024_s3 = inlined_call_operand.vmem [shape: f32[1,32], index: 3, kind: input, shape index: {}]   ;;  %s6025_s7 = inlined_call_operand.vmem [shape: f32[64,96], index: 7, kind: input, shape index: {}]   ;;  %s6026_s4 = inlined_call_operand.vmem [shape: f32[1,32], index: 4, kind: input, shape index: {}]   ;;  %s6027_s5 = inlined_call_operand.vmem [shape: f32[1,32], index: 5, kind: input, shape index: {}]   ;;  %s6028_s8 = inlined_call_operand.vmem [shape: f32[2,96], index: 8, kind: input, shape index: {}]   ;;  %s6029_s6 = inlined_call_operand.vmem [shape: f32[2,8], index: 6, kind: input, shape index: {}]   ;;  %s6030_s9 = inlined_call_operand.vmem [shape: f32[64,32], index: 9, kind: input, shape index: {}]   ;;  %s6031_s10 = inlined_call_operand.vmem [shape: f32[2,32], index: 10, kind: input, shape index: {}]   ;;  %s6032_s13 = inlined_call_operand.vmem [shape: f32[64,64], index: 13, kind: input, shape index: {}]   ;;  %s6033_s11 = inlined_call_operand.vmem [shape: f32[2,32], index: 11, kind: input, shape index: {}]   ;;  %s6034_s12 = inlined_call_operand.vmem [shape: f32[2,32], index: 12, kind: input, shape index: {}]   ;;  %s6035_s15 = inlined_call_operand.vmem [shape: f32[128,32], index: 15, kind: input, shape index: {}]   ;;  %s6036_s14 = inlined_call_operand.vmem [shape: f32[2,64], index: 14, kind: input, shape index: {}]   ;;  %s6037_s16 = inlined_call_operand.vmem [shape: f32[2,32], index: 16, kind: input, shape index: {}]   ;;  %s6038_s17 = inlined_call_operand.vmem [shape: f32[2,32], index: 17, kind: input, shape index: {}]   ;;  %s6039_s18 = inlined_call_operand.vmem [shape: f32[2,32], index: 18, kind: input, shape index: {}]   ;;  %s6040_s19 = inlined_call_operand.vmem [shape: f32[64,2], index: 19, kind: input, shape index: {}]   ;;  %s6041_s20 = inlined_call_operand.vmem [shape: f32[1,2], index: 20, kind: input, shape index: {}]   ;;  %s6042_s21 = inlined_call_operand.vmem [shape: f32[2,128], index: 21, kind: output, shape index: {}]  }
   0x1   :  { %6057 = sst [smem:[#allocation2_spill]] %s6021_s2  ;;  %v4462_v40 = vld [vmem:[%s6027_s5] ss:$0 sm:$0xff]  ;;  %vm353_vm2 = vcmask 64512   ;;  %s6051_s27 = smov 48   ;;  %vm1035_vm3 = vcmask 130048  }
   0x2   :  { %6058 = sst [smem:[#allocation3_spill]] %s6022_s1  ;;  %v5317_v49 = vshrl.u32 %v263_v48, 7  ;;  %v5329_v51 = vld [vmem:[%s6028_s8] sm:$0x3]  ;;  %s5133_s8 = smov 112   ;;  %vm1037_vm4 = vcmask 195584  }
   0x3   :  { %6059 = sst [smem:[#allocation4_spill]] %s6023_s0  ;;  %s6055_s1 = smov 72   ;;  %vm1957_vm5 = vcmask 523264   ;;  %vm4070_vm6 = vcmask 1043456   ;;  %vm4066_vm7 = vcmask 31744   ;;  %vm3893_vm8 = vcmask 1040384  }
   0x4   :  { %6060 = sst [smem:[#allocation5_spill]] %s6024_s3  ;;  %v5324_v50 = vsub.s32 0, %v5317_v49  ;;  %s5141_s28 = smov 8   ;;  %vm4054_vm9 = vcmask 9216   ;;  %vm4143_vm10 = vcmask 24576   ;;  %vm4309_vm11 = vcmask 25601  }
   0x5   :  { %6061 = sst [smem:[#allocation6_spill]] %s6025_s7  ;;  %s5131_s7 = smov 96   ;;  %vm4414_vm12 = vcmask 254976  }
   0x6   :  { %6062 = sst [smem:[#allocation7_spill]] %s6026_s4  ;;  %v266_v53 = vrot.slane %v5329_v51, %v5324_v50  ;;  %s5132_s4 = smov 120  }
   0x7   :  { %s6063_s26 = sld [smem:[#allocation2_spill]]  ;;  %s5142_s5 = smov 16  }
   0x8   :  { %s6064_s2 = sld [smem:[#allocation3_spill]] }
   0x9   :  { %s6065_s25 = sld [smem:[#allocation4_spill]] }
   0xa   :  { %s6066_s29 = sld [smem:[#allocation5_spill]] }
   0xb   :  { %s6067_s30 = sld [smem:[#allocation6_spill]] }
   0xc   :  { %s6068_s3 = sld [smem:[#allocation7_spill]] }
   0xd   :  { %v75_v0 = vld [vmem:[%s6063_s26 + $0x18] sm:$0xff]  ;;  %v74_v1 = vld [vmem:[%s6063_s26 + $0x10] sm:$0xff]  ;;  %v73_v3 = vld [vmem:[%s6063_s26 + $0x8] sm:$0xff] }
   0xe   :  { %4682 = vmatprep.subr.mxu0 %v75_v0  ;;  %v70_v2 = vld [vmem:[%s6064_s2] sm:$0xff]  ;;  %v71_v5 = vld [vmem:[%s6064_s2 + $0x8] sm:$0xff]  ;;  %s5130_s2 = smov 88  }
   0xf   :  { %4683 = vmatpush3.msra.mxu0 %v75_v0  ;;  %4690 = vmatprep.mubr.msk.f32.mxu0 %vm76_vm0, %v70_v2  ;;  %v72_v4 = vld [vmem:[%s6063_s26] sm:$0xff]  ;;  %v69_v6 = vld [vmem:[%s6065_s25 + $0x8] sm:$0xff]  ;;  %s6047_s26 = smov 56  }
  0x10   :  { %4684 = vmatprep.subr.mxu0 %v74_v1  ;;  %v68_v8 = vld [vmem:[%s6065_s25] sm:$0xff]  ;;  %s6053_s25 = smov 64  }
  0x11   :  { %4685 = vmatpush3.msra.mxu0 %v74_v1  ;;  %v4460_v12 = vld [vmem:[%s6066_s29] ss:$0 sm:$0xff]  ;;  %v218_v27 = vld [vmem:[%s6067_s30 + $0x18] sm:$0xff]  ;;  %v217_v28 = vld [vmem:[%s6067_s30 + $0x10] sm:$0xff] }
  0x12   :  { %4686 = vmatprep.subr.mxu0 %v73_v3  ;;  %4693 = vmatprep.subr.mxu1 %v218_v27  ;;  %v216_v29 = vld [vmem:[%s6067_s30 + $0x8] sm:$0xff]  ;;  %v215_v30 = vld [vmem:[%s6067_s30] sm:$0xff] }
  0x13   :  { %4687 = vmatpush3.msra.mxu0 %v73_v3  ;;  %4694 = vmatpush3.msra.mxu1 %v218_v27  ;;  %v4461_v38 = vld [vmem:[%s6068_s3] ss:$0 sm:$0xff]  ;;  %s6049_s3 = smov 40  }
  0x14   :  { %4688 = vmatprep.subr.mxu0 %v72_v4  ;;  %4695 = vmatprep.subr.mxu1 %v217_v28 }
  0x15   :  { %4689 = vmatpush3.msra.mxu0 %v72_v4  ;;  %4696 = vmatpush3.msra.mxu1 %v217_v28 }
  0x16   :  { %4691 = vmatmul.mubr.msk.f32.vlgmr.msra.gmra.mxu0 %vm76_vm0, %v71_v5  ;;  %4697 = vmatprep.subr.mxu1 %v216_v29 }
  0x17   :  { %4698 = vmatpush3.msra.mxu1 %v216_v29  ;;  %4704 = vmatprep.subr.mxu0 %v5128_v47 }
  0x18   :  { %4699 = vmatprep.subr.mxu1 %v215_v30  ;;  %4706 = vmatprep.mubr.msk.f32.mxu0 %vm5129_vm1, %v5128_v47 }
  0x19   :  { %4700 = vmatpush3.msra.mxu1 %v215_v30 }
  0x1a   :  { %4709 = vmatprep.subr.mxu1 %v5128_v47 }
  0xd6   :  { %v4692_v7 = vpop.f32.mrf.mxu0 }
  0xd7   :  { %v159_v10 = vadd.f32 %v4692_v7, %v69_v6  ;;  %v214_v7 = vld [vmem:[%s6029_s6] sm:$0x3] }
  0xd8   :  { %v149_v9 = vpop.f32.mrf.mxu0 }
  0xd9   :  { %v158_v11 = vadd.f32 %v149_v9, %v68_v8  ;;  %v168_v15 = vadd.f32 %v4460_v12, %v159_v10  ;;  %v348_v8 = vsub.f32 1.0, %v214_v7 }
  0xdb   :  { %v167_v13 = vadd.f32 %v4460_v12, %v158_v11  ;;  %v174_v16 = vsel %vm76_vm0, %v168_v15, 0.0  ;;  %v349_v9 = vmul.f32 -1e+09, %v348_v8 }
  0xdd   :  { %v171_v14 = vsel %vm76_vm0, %v167_v13, 0.0  ;;  %v5408_v10 = vrot.slane %v349_v9, %v5324_v50 }
  0xde   :  { %172 = vadd.xlane.f32.xlu0 %v171_v14 }
  0xe2   :  { %175 = vadd.xlane.f32.xlu0 %v174_v16 }
 0x167   :  { %v173_v17 = vpop.xlane.xlu0 %172 }
 0x168   :  { %v178_v18 = vmul.f32 0.03125, %v173_v17 }
 0x16a   :  { %v180_v19 = vsub.f32 %v167_v13, %v178_v18 }
 0x16b   :  { %v176_v20 = vpop.xlane.xlu0 %175 }
 0x16c   :  { %v179_v21 = vmul.f32 0.03125, %v176_v20  ;;  %v182_v22 = vmul.f32 %v180_v19, %v180_v19 }
 0x16e   :  { %v181_v23 = vsub.f32 %v168_v15, %v179_v21  ;;  %v184_v24 = vsel %vm76_vm0, %v182_v22, 0.0 }
 0x16f   :  { %185 = vadd.xlane.f32.xlu1 %v184_v24  ;;  %v5415_v24 = vsub.s32 1, %v5317_v49 }
 0x170   :  { %v183_v25 = vmul.f32 %v181_v23, %v181_v23 }
 0x172   :  { %v187_v26 = vsel %vm76_vm0, %v183_v25, 0.0 }
 0x173   :  { %188 = vadd.xlane.f32.xlu1 %v187_v26 }
 0x1f8   :  { %v186_v31 = vpop.xlane.xlu1 %185 }
 0x1f9   :  { %v190_v32 = vmul.f32 0.03125, %v186_v31  ;;  %v5424_v31 = vrot.slane %v349_v9, %v5415_v24 }
 0x1fb   :  { %v192_v33 = vadd.f32 1e-12, %v190_v32 }
 0x1fc   :  { %v189_v34 = vpop.xlane.xlu1 %188 }
 0x1fd   :  { %5017 = vrsqrt.f32 %v192_v33  ;;  %v191_v35 = vmul.f32 0.03125, %v189_v34 }
 0x1ff   :  { %v193_v36 = vadd.f32 1e-12, %v191_v35 }
 0x201   :  { %5019 = vrsqrt.f32 %v193_v36 }
 0x20a   :  { %v5018_v37 = vpop.eup %5017 }
 0x20b   :  { %v196_v39 = vmul.f32 %v5018_v37, %v180_v19 }
 0x20d   :  { %v204_v41 = vmul.f32 %v4461_v38, %v196_v39 }
 0x20e   :  { %v5020_v42 = vpop.eup %5019 }
 0x20f   :  { %v197_v43 = vmul.f32 %v5020_v42, %v181_v23  ;;  %v5307_v44 = vadd.f32 %v4462_v40, %v204_v41 }
 0x211   :  { %v205_v45 = vmul.f32 %v4461_v38, %v197_v43  ;;  %4701 = vmatprep.mubr.msk.f32.mxu1 %vm76_vm0, %v5307_v44 }
 0x213   :  { %v5311_v46 = vadd.f32 %v4462_v40, %v205_v45 }
 0x215   :  { %4702 = vmatmul.mubr.msk.f32.vlgmr.msra.gmra.mxu1 %vm76_vm0, %v5311_v46 }
 0x216   :  { %4711 = vmatprep.mubr.msk.f32.mxu1 %vm5129_vm1, %v5128_v47 }
 0x2d5   :  { %v4703_v52 = vpop.f32.mrf.mxu1 }
 0x2d6   :  { %v5347_v56 = vadd.f32 %v4703_v52, %v266_v53 }
 0x2d7   :  { %v339_v54 = vpop.f32.mrf.mxu1 }
 0x2d8   :  { %v5333_v55 = vadd.f32 %v339_v54, %v266_v53 }
 0x2da   :  { %523 = vrot.lane.b32.xlu1 %v5333_v55, %s5130_s2  ;;  %351 = vrot.lane.b32.xlu0 %v5333_v55, %s5131_s7 }
 0x2de   :  { %521 = vrot.lane.b32.xlu1 %v5333_v55, %s5132_s4  ;;  %688 = vrot.lane.b32.xlu0 %v5333_v55, %s5133_s8 }
 0x2e2   :  { %690 = vrot.lane.b32.xlu1 %v5333_v55, %s5134_s22  ;;  %855 = vrot.lane.b32.xlu0 %v5333_v55, %s5135_s23 }
 0x2e6   :  { %857 = vrot.lane.b32.xlu1 %v5333_v55, %s6055_s1  ;;  %1211 = vrot.lane.b32.xlu0 %v5347_v56, %s5130_s2 }
 0x2ea   :  { %1040 = vrot.lane.b32.xlu1 %v5347_v56, %s5131_s7  ;;  %1378 = vrot.lane.b32.xlu0 %v5347_v56, %s5134_s22 }
 0x2ee   :  { %1209 = vrot.lane.b32.xlu1 %v5347_v56, %s5132_s4  ;;  %1545 = vrot.lane.b32.xlu0 %v5347_v56, %s6055_s1 }
 0x2f2   :  { %1376 = vrot.lane.b32.xlu1 %v5347_v56, %s5133_s8 }
 0x2f6   :  { %1543 = vrot.lane.b32.xlu1 %v5347_v56, %s5135_s23 }
 0x34c   :  { %v524_v57 = vpop.permute.xlu1 %523  ;;  %v352_v58 = vpop.permute.xlu0 %351 }
 0x34d   :  { %4705 = vmatpush3.xpose.msk.msra.mxu0 %vm353_vm2, %v352_v58 }
 0x34e   :  { %4714 = vmatprep.subr.mxu0 %v5128_v47 }
 0x350   :  { %v522_v59 = vpop.permute.xlu1 %521  ;;  %4707 = vmatmul.mubr.msk.f32.vlgmr.msra.gmra.mxu0 %vm353_vm2, %v5333_v55  ;;  %v689_v60 = vpop.permute.xlu0 %688 }
 0x351   :  { %4715 = vmatpush3.xpose.msk.msra.mxu0 %vm353_vm2, %v524_v57  ;;  %4716 = vmatprep.mubr.msk.f32.mxu0 %vm5129_vm1, %v5128_v47 }
 0x352   :  { %4724 = vmatprep.subr.mxu0 %v5128_v47 }
 0x354   :  { %v691_v61 = vpop.permute.xlu1 %690  ;;  %4717 = vmatmul.mubr.msk.f32.vlgmr.msra.gmra.mxu0 %vm353_vm2, %v522_v59  ;;  %v856_v62 = vpop.permute.xlu0 %855 }
 0x355   :  { %4725 = vmatpush3.xpose.msk.msra.mxu0 %vm353_vm2, %v691_v61  ;;  %4726 = vmatprep.mubr.msk.f32.mxu0 %vm5129_vm1, %v5128_v47 }
 0x356   :  { %4734 = vmatprep.subr.mxu0 %v5128_v47 }
 0x358   :  { %v858_v63 = vpop.permute.xlu1 %857  ;;  %4727 = vmatmul.mubr.msk.f32.vlgmr.msra.gmra.mxu0 %vm353_vm2, %v689_v60  ;;  %v1212_v0 = vpop.permute.xlu0 %1211 }
 0x359   :  { %4735 = vmatpush3.xpose.msk.msra.mxu0 %vm353_vm2, %v858_v63  ;;  %4736 = vmatprep.mubr.msk.f32.mxu0 %vm5129_vm1, %v5128_v47 }
 0x35a   :  { %4744 = vmatprep.subr.mxu0 %v5128_v47 }
 0x35c   :  { %v1041_v1 = vpop.permute.xlu1 %1040  ;;  %4737 = vmatmul.mubr.msk.f32.vlgmr.msra.gmra.mxu0 %vm353_vm2, %v856_v62  ;;  %v1379_v3 = vpop.permute.xlu0 %1378 }
 0x35d   :  { %4745 = vmatpush3.xpose.msk.msra.mxu0 %vm353_vm2, %v1041_v1  ;;  %4746 = vmatprep.mubr.msk.f32.mxu0 %vm5129_vm1, %v5128_v47 }
 0x35e   :  { %4754 = vmatprep.subr.mxu0 %v5128_v47 }
 0x360   :  { %v1210_v2 = vpop.permute.xlu1 %1209  ;;  %4747 = vmatmul.mubr.msk.f32.vlgmr.msra.gmra.mxu0 %vm353_vm2, %v5347_v56  ;;  %v1546_v5 = vpop.permute.xlu0 %1545 }
 0x361   :  { %4755 = vmatpush3.xpose.msk.msra.mxu0 %vm353_vm2, %v1212_v0  ;;  %4756 = vmatprep.mubr.msk.f32.mxu0 %vm5129_vm1, %v5128_v47 }
 0x362   :  { %4764 = vmatprep.subr.mxu0 %v5128_v47 }
 0x364   :  { %4757 = vmatmul.mubr.msk.f32.vlgmr.msra.gmra.mxu0 %vm353_vm2, %v1210_v2  ;;  %v1377_v4 = vpop.permute.xlu1 %1376 }
 0x365   :  { %4765 = vmatpush3.xpose.msk.msra.mxu0 %vm353_vm2, %v1379_v3  ;;  %4766 = vmatprep.mubr.msk.f32.mxu0 %vm5129_vm1, %v5128_v47 }
 0x366   :  { %4774 = vmatprep.subr.mxu0 %v5128_v47 }
 0x368   :  { %4767 = vmatmul.mubr.msk.f32.vlgmr.msra.gmra.mxu0 %vm353_vm2, %v1377_v4  ;;  %v1544_v6 = vpop.permute.xlu1 %1543 }
 0x369   :  { %4775 = vmatpush3.xpose.msk.msra.mxu0 %vm353_vm2, %v1546_v5  ;;  %4776 = vmatprep.mubr.msk.f32.mxu0 %vm5129_vm1, %v5128_v47 }
 0x36c   :  { %4777 = vmatmul.mubr.msk.f32.vlgmr.msra.gmra.mxu0 %vm353_vm2, %v1544_v6 }
 0x410   :  { %v424_v11 = vpop.f32.mrf.mxu0 }
 0x411   :  { %v428_v12 = vmul.f32 0.35355338, %v424_v11 }
 0x412   :  { %v4708_v13 = vpop.f32.mrf.mxu0 }
 0x413   :  { %v433_v14 = vadd.f32 %v5408_v10, %v428_v12 }
 0x414   :  { %v595_v15 = vpop.f32.mrf.mxu0 }
 0x415   :  { %v599_v16 = vmul.f32 0.35355338, %v595_v15  ;;  %v434_v17 = vsel %vm353_vm2, %v433_v14, -inf }
 0x416   :  { %435 = vmax.xlane.f32.xlu0 %v434_v17  ;;  %v4718_v18 = vpop.f32.mrf.mxu0 }
 0x417   :  { %v600_v19 = vadd.f32 %v599_v16, %v5408_v10 }
 0x418   :  { %v762_v20 = vpop.f32.mrf.mxu0 }
 0x419   :  { %v766_v21 = vmul.f32 0.35355338, %v762_v20  ;;  %v601_v22 = vsel %vm353_vm2, %v600_v19, -inf }
 0x41a   :  { %602 = vmax.xlane.f32.xlu1 %v601_v22  ;;  %v4728_v23 = vpop.f32.mrf.mxu0 }
 0x41b   :  { %v5418_v25 = vadd.f32 %v766_v21, %v5408_v10 }
 0x41c   :  { %v929_v26 = vpop.f32.mrf.mxu0 }
 0x41d   :  { %v933_v27 = vmul.f32 0.35355338, %v929_v26  ;;  %v768_v28 = vsel %vm353_vm2, %v5418_v25, -inf }
 0x41e   :  { %769 = vmax.xlane.f32.xlu0 %v768_v28  ;;  %v4738_v29 = vpop.f32.mrf.mxu0 }
 0x41f   :  { %v934_v30 = vadd.f32 %v933_v27, %v5408_v10 }
 0x420   :  { %v1112_v32 = vpop.f32.mrf.mxu0 }
 0x421   :  { %v1116_v33 = vmul.f32 0.35355338, %v1112_v32  ;;  %v935_v34 = vsel %vm353_vm2, %v934_v30, -inf }
 0x422   :  { %936 = vmax.xlane.f32.xlu0 %v935_v34  ;;  %v4748_v35 = vpop.f32.mrf.mxu0 }
 0x423   :  { %v5428_v36 = vadd.f32 %v5424_v31, %v1116_v33 }
 0x424   :  { %v1283_v37 = vpop.f32.mrf.mxu0 }
 0x425   :  { %v1287_v38 = vmul.f32 0.35355338, %v1283_v37  ;;  %v1122_v39 = vsel %vm353_vm2, %v5428_v36, -inf }
 0x426   :  { %1123 = vmax.xlane.f32.xlu0 %v1122_v39  ;;  %v4758_v40 = vpop.f32.mrf.mxu0 }
 0x427   :  { %v1288_v41 = vadd.f32 %v1287_v38, %v5424_v31 }
 0x428   :  { %v1450_v42 = vpop.f32.mrf.mxu0 }
 0x429   :  { %v1454_v43 = vmul.f32 0.35355338, %v1450_v42  ;;  %v1289_v45 = vsel %vm353_vm2, %v1288_v41, -inf }
 0x42a   :  { %1290 = vmax.xlane.f32.xlu1 %v1289_v45  ;;  %v4768_v48 = vpop.f32.mrf.mxu0 }
 0x42b   :  { %v1455_v49 = vadd.f32 %v1454_v43, %v5424_v31 }
 0x42c   :  { %v1617_v52 = vpop.f32.mrf.mxu0 }
 0x42d   :  { %v1456_v53 = vsel %vm353_vm2, %v1455_v49, -inf  ;;  %v1621_v57 = vmul.f32 0.35355338, %v1617_v52 }
 0x42e   :  { %1457 = vmax.xlane.f32.xlu0 %v1456_v53  ;;  %v4778_v54 = vpop.f32.mrf.mxu0 }
 0x42f   :  { %v1622_v58 = vadd.f32 %v1621_v57, %v5424_v31 }
 0x431   :  { %v1623_v59 = vsel %vm353_vm2, %v1622_v58, -inf }
 0x43b   :  { %445 = vrot.lane.b32.xlu1 %v5333_v55, %s6053_s25 }
 0x45f   :  { %1624 = vmax.xlane.f32.xlu1 %v1623_v59 }
 0x470   :  { %779 = vrot.lane.b32.xlu1 %v5333_v55, %s6051_s27 }
 0x474   :  { %946 = vrot.lane.b32.xlu1 %v5333_v55, %s6049_s3 }
 0x478   :  { %1133 = vrot.lane.b32.xlu1 %v5347_v56, %s6053_s25  ;;  %s5143_s25 = smov 24  }
 0x49f   :  { %v436_v60 = vpop.xlane.xlu0 %435 }
 0x4a0   :  { %v437_v61 = vsub.f32 %v433_v14, %v436_v60 }
 0x4a2   :  { %v438_v62 = vmul.f32 1.442695, %v437_v61 }
 0x4a3   :  { %v603_v63 = vpop.xlane.xlu1 %602 }
 0x4a4   :  { %5021 = vpow2.f32 %v438_v62  ;;  %v604_v0 = vsub.f32 %v600_v19, %v603_v63 }
 0x4a6   :  { %v605_v1 = vmul.f32 1.442695, %v604_v0 }
 0x4a7   :  { %v770_v2 = vpop.xlane.xlu0 %769 }
 0x4a8   :  { %5023 = vpow2.f32 %v605_v1  ;;  %v771_v15 = vsub.f32 %v5418_v25, %v770_v2 }
 0x4aa   :  { %v772_v17 = vmul.f32 1.442695, %v771_v15 }
 0x4ab   :  { %v937_v3 = vpop.xlane.xlu0 %936 }
 0x4ac   :  { %v938_v4 = vsub.f32 %v934_v30, %v937_v3 }
 0x4ae   :  { %v939_v5 = vmul.f32 1.442695, %v938_v4 }
 0x4af   :  { %v1124_v16 = vpop.xlane.xlu0 %1123 }
 0x4b0   :  { %5025 = vpow2.f32 %v939_v5  ;;  %v1125_v18 = vsub.f32 %v5428_v36, %v1124_v16 }
 0x4b1   :  { %v5022_v6 = vpop.eup %5021  ;;  %5027 = vpow2.f32 %v772_v17 }
 0x4b2   :  { %v440_v7 = vsel %vm353_vm2, %v5022_v6, 0.0  ;;  %v1126_v20 = vmul.f32 1.442695, %v1125_v18  ;;  %v227_v18 = vld [vmem:[%s6030_s9 + $0x18] sm:$0xff] }
 0x4b3   :  { %v1291_v8 = vpop.xlane.xlu1 %1290  ;;  %441 = vadd.xlane.f32.xlu0 %v440_v7  ;;  %4784 = vmatprep.subr.mxu0 %v227_v18 }
 0x4b4   :  { %5029 = vpow2.f32 %v1126_v20  ;;  %v1292_v22 = vsub.f32 %v1288_v41, %v1291_v8  ;;  %4785 = vmatpush3.msra.mxu0 %v227_v18  ;;  %v5568_v18 = vld [vmem:[%s6034_s12] sm:$0x3] }
 0x4b5   :  { %v5024_v9 = vpop.eup %5023 }
 0x4b6   :  { %v607_v11 = vsel %vm353_vm2, %v5024_v9, 0.0  ;;  %v1293_v26 = vmul.f32 1.442695, %v1292_v22  ;;  %v225_v22 = vld [vmem:[%s6030_s9 + $0x8] sm:$0xff] }
 0x4b7   :  { %v446_v12 = vpop.permute.xlu1 %445  ;;  %608 = vadd.xlane.f32.xlu1 %v607_v11  ;;  %v1458_v19 = vpop.xlane.xlu0 %1457 }
 0x4b8   :  { %4710 = vmatpush3.msra.mxu1 %v446_v12  ;;  %v1459_v21 = vsub.f32 %v1455_v49, %v1458_v19  ;;  %v226_v19 = vld [vmem:[%s6030_s9 + $0x10] sm:$0xff] }
 0x4b9   :  { %4719 = vmatprep.subr.mxu1 %v5128_v47  ;;  %4786 = vmatprep.subr.mxu0 %v226_v19 }
 0x4ba   :  { %v1460_v23 = vmul.f32 1.442695, %v1459_v21  ;;  %4787 = vmatpush3.msra.mxu0 %v226_v19 }
 0x4bb   :  { %4788 = vmatprep.subr.mxu0 %v225_v22 }
 0x4bc   :  { %5031 = vpow2.f32 %v1460_v23  ;;  %v224_v23 = vld [vmem:[%s6030_s9] sm:$0xff]  ;;  %4789 = vmatpush3.msra.mxu0 %v225_v22  ;;  %v1847_v22 = vrot.slane %v5568_v18, %v5324_v50 }
 0x4bd   :  { %v5449_v13 = vpop.eup %5025  ;;  %5033 = vpow2.f32 %v1293_v26  ;;  %4790 = vmatprep.subr.mxu0 %v224_v23 }
 0x4be   :  { %v941_v14 = vsel %vm353_vm2, %v5449_v13, 0.0  ;;  %4791 = vmatpush3.msra.mxu0 %v224_v23 }
 0x4bf   :  { %942 = vadd.xlane.f32.xlu1 %v941_v14 }
 0x4c9   :  { %612 = vrot.lane.b32.xlu0 %v5333_v55, %s6047_s26  ;;  %v5028_v55 = vpop.eup %5027 }
 0x4ca   :  { %v774_v25 = vsel %vm353_vm2, %v5028_v55, 0.0  ;;  %v5460_v27 = vpop.eup %5029 }
 0x4cb   :  { %v1128_v32 = vsel %vm353_vm2, %v5460_v27, 0.0  ;;  %v5464_v33 = vpop.eup %5031 }
 0x4cc   :  { %v1462_v34 = vsel %vm353_vm2, %v5464_v33, 0.0  ;;  %v5034_v35 = vpop.eup %5033 }
 0x4cd   :  { %v1295_v36 = vsel %vm353_vm2, %v5034_v35, 0.0 }
 0x4d0   :  { %1300 = vrot.lane.b32.xlu1 %v5347_v56, %s6047_s26 }
 0x4e8   :  { %v1625_v28 = vpop.xlane.xlu1 %1624  ;;  %775 = vadd.xlane.f32.xlu0 %v774_v25 }
 0x4e9   :  { %v1626_v29 = vsub.f32 %v1622_v58, %v1625_v28 }
 0x4eb   :  { %v1627_v30 = vmul.f32 1.442695, %v1626_v29 }
 0x4ec   :  { %1129 = vadd.xlane.f32.xlu0 %v1128_v32  ;;  %v780_v39 = vpop.permute.xlu1 %779 }
 0x4ed   :  { %5035 = vpow2.f32 %v1627_v30 }
 0x4f0   :  { %1463 = vadd.xlane.f32.xlu0 %v1462_v34  ;;  %v947_v40 = vpop.permute.xlu1 %946 }
 0x4f4   :  { %1296 = vadd.xlane.f32.xlu1 %v1295_v36  ;;  %v1134_v41 = vpop.permute.xlu1 %1133 }
 0x4fa   :  { %v5469_v37 = vpop.eup %5035 }
 0x4fb   :  { %v1629_v38 = vsel %vm353_vm2, %v5469_v37, 0.0 }
 0x4fc   :  { %1630 = vadd.xlane.f32.xlu0 %v1629_v38 }
 0x505   :  { %1634 = vrot.lane.b32.xlu1 %v5347_v56, %s6049_s3 }
 0x512   :  { %1467 = vrot.lane.b32.xlu0 %v5347_v56, %s6051_s27 }
 0x53c   :  { %v442_v42 = vpop.xlane.xlu0 %441 }
 0x53d   :  { %5037 = vrcp.f32 %v442_v42 }
 0x540   :  { %v609_v43 = vpop.xlane.xlu1 %608  ;;  %v613_v49 = vpop.permute.xlu0 %612 }
 0x541   :  { %5039 = vrcp.f32 %v609_v43 }
 0x548   :  { %v943_v53 = vpop.xlane.xlu1 %942 }
 0x54a   :  { %v5038_v45 = vpop.eup %5037 }
 0x54b   :  { %v444_v48 = vmul.f32 %v5038_v45, %v5022_v6 }
 0x54c   :  { %v1301_v58 = vpop.permute.xlu1 %1300 }
 0x54d   :  { %4712 = vmatmul.mubr.msk.f32.vlgmr.msra.gmra.mxu1 %vm353_vm2, %v444_v48 }
 0x54e   :  { %v5040_v52 = vpop.eup %5039  ;;  %4720 = vmatpush3.msra.mxu1 %v613_v49  ;;  %4721 = vmatprep.mubr.msk.f32.mxu1 %vm5129_vm1, %v5128_v47  ;;  %v5538_v49 = vld [vmem:[%s6031_s10] sm:$0x3] }
 0x54f   :  { %4729 = vmatprep.subr.mxu1 %v5128_v47  ;;  %v611_v56 = vmul.f32 %v5040_v52, %v5024_v9  ;;  %v1728_v52 = vrot.slane %v5538_v49, %v5324_v50 }
 0x551   :  { %4722 = vmatmul.mubr.msk.f32.vlgmr.msra.gmra.mxu1 %vm353_vm2, %v611_v56 }
 0x552   :  { %4730 = vmatpush3.msra.mxu1 %v780_v39  ;;  %4731 = vmatprep.mubr.msk.f32.mxu1 %vm5129_vm1, %v5128_v47 }
 0x553   :  { %4739 = vmatprep.subr.mxu1 %v5128_v47 }
 0x571   :  { %v776_v54 = vpop.xlane.xlu0 %775 }
 0x572   :  { %5041 = vrcp.f32 %v776_v54 }
 0x573   :  { %5043 = vrcp.f32 %v943_v53 }
 0x575   :  { %v1130_v57 = vpop.xlane.xlu0 %1129 }
 0x576   :  { %5045 = vrcp.f32 %v1130_v57 }
 0x579   :  { %v1464_v59 = vpop.xlane.xlu0 %1463 }
 0x57d   :  { %v1297_v60 = vpop.xlane.xlu1 %1296 }
 0x57e   :  { %5047 = vrcp.f32 %v1297_v60 }
 0x57f   :  { %v5042_v61 = vpop.eup %5041  ;;  %5049 = vrcp.f32 %v1464_v59 }
 0x580   :  { %v778_v62 = vmul.f32 %v5042_v61, %v5028_v55  ;;  %v5044_v63 = vpop.eup %5043 }
 0x581   :  { %v945_v0 = vmul.f32 %v5044_v63, %v5449_v13  ;;  %v1635_v9 = vpop.permute.xlu1 %1634 }
 0x582   :  { %4732 = vmatmul.mubr.msk.f32.vlgmr.msra.gmra.mxu1 %vm353_vm2, %v778_v62 }
 0x583   :  { %4740 = vmatpush3.msra.mxu1 %v947_v40  ;;  %4741 = vmatprep.mubr.msk.f32.mxu1 %vm5129_vm1, %v5128_v47  ;;  %v5046_v1 = vpop.eup %5045 }
 0x584   :  { %4749 = vmatprep.subr.mxu1 %v5128_v47  ;;  %v1132_v3 = vmul.f32 %v5046_v1, %v5460_v27 }
 0x585   :  { %v1631_v2 = vpop.xlane.xlu0 %1630 }
 0x586   :  { %5051 = vrcp.f32 %v1631_v2  ;;  %4742 = vmatmul.mubr.msk.f32.vlgmr.msra.gmra.mxu1 %vm353_vm2, %v945_v0 }
 0x587   :  { %4750 = vmatpush3.msra.mxu1 %v1134_v41  ;;  %4751 = vmatprep.mubr.msk.f32.mxu1 %vm5129_vm1, %v5128_v47 }
 0x588   :  { %4759 = vmatprep.subr.mxu1 %v5128_v47 }
 0x589   :  { %v1468_v7 = vpop.permute.xlu0 %1467 }
 0x58a   :  { %4752 = vmatmul.mubr.msk.f32.vlgmr.msra.gmra.mxu1 %vm353_vm2, %v1132_v3 }
 0x58b   :  { %v5048_v4 = vpop.eup %5047  ;;  %4760 = vmatpush3.msra.mxu1 %v1301_v58  ;;  %4761 = vmatprep.mubr.msk.f32.mxu1 %vm5129_vm1, %v5128_v47 }
 0x58c   :  { %4769 = vmatprep.subr.mxu1 %v5128_v47  ;;  %v1299_v5 = vmul.f32 %v5048_v4, %v5034_v35  ;;  %v5050_v6 = vpop.eup %5049 }
 0x58d   :  { %v1466_v8 = vmul.f32 %v5050_v6, %v5464_v33 }
 0x58e   :  { %4762 = vmatmul.mubr.msk.f32.vlgmr.msra.gmra.mxu1 %vm353_vm2, %v1299_v5 }
 0x58f   :  { %4770 = vmatpush3.msra.mxu1 %v1468_v7  ;;  %4771 = vmatprep.mubr.msk.f32.mxu1 %vm5129_vm1, %v5128_v47  ;;  %v237_v7 = vld [vmem:[%s6032_s13 + $0x10] sm:$0xff] }
 0x590   :  { %4779 = vmatprep.subr.mxu1 %v5128_v47 }
 0x592   :  { %4772 = vmatmul.mubr.msk.f32.vlgmr.msra.gmra.mxu1 %vm353_vm2, %v1466_v8  ;;  %v236_v8 = vld [vmem:[%s6032_s13 + $0x8] sm:$0xff] }
 0x593   :  { %v5052_v11 = vpop.eup %5051  ;;  %4780 = vmatpush3.msra.mxu1 %v1635_v9  ;;  %4781 = vmatprep.mubr.msk.f32.mxu1 %vm5129_vm1, %v5128_v47  ;;  %v235_v9 = vld [vmem:[%s6032_s13] sm:$0xff] }
 0x594   :  { %v1633_v12 = vmul.f32 %v5052_v11, %v5469_v37 }
 0x596   :  { %4782 = vmatmul.mubr.msk.f32.vlgmr.msra.gmra.mxu1 %vm353_vm2, %v1633_v12 }
 0x60d   :  { %v517_v13 = vpop.f32.mrf.mxu1 }
 0x60f   :  { %v4713_v14 = vpop.f32.mrf.mxu1 }
 0x611   :  { %v684_v15 = vpop.f32.mrf.mxu1 }
 0x612   :  { %1023 = vrot.lane.b32.xlu0 %v684_v15, %s5141_s28 }
 0x613   :  { %v4723_v16 = vpop.f32.mrf.mxu1 }
 0x642   :  { %v851_v17 = vpop.f32.mrf.mxu1 }
 0x643   :  { %1027 = vrot.lane.b32.xlu1 %v851_v17, %s5142_s5  ;;  %v5563_v17 = vld [vmem:[%s6033_s11] sm:$0x3] }
 0x644   :  { %v4733_v20 = vpop.f32.mrf.mxu1  ;;  %v1841_v19 = vrot.slane %v5563_v17, %v5324_v50 }
 0x646   :  { %v1018_v21 = vpop.f32.mrf.mxu1 }
 0x647   :  { %1031 = vrot.lane.b32.xlu1 %v1018_v21, %s5143_s25 }
 0x648   :  { %v4743_v26 = vpop.f32.mrf.mxu1 }
 0x64a   :  { %v1205_v55 = vpop.f32.mrf.mxu1 }
 0x64c   :  { %v4753_v25 = vpop.f32.mrf.mxu1 }
 0x64e   :  { %v1372_v27 = vpop.f32.mrf.mxu1 }
 0x64f   :  { %1711 = vrot.lane.b32.xlu0 %v1372_v27, %s5141_s28 }
 0x650   :  { %v4763_v28 = vpop.f32.mrf.mxu1 }
 0x652   :  { %v1539_v29 = vpop.f32.mrf.mxu1 }
 0x653   :  { %1715 = vrot.lane.b32.xlu0 %v1539_v29, %s5142_s5  ;;  %v251_v29 = vld [vmem:[%s6035_s15 + $0x38] sm:$0xff] }
 0x654   :  { %v4773_v30 = vpop.f32.mrf.mxu1  ;;  %4806 = vmatprep.subr.mxu0 %v251_v29 }
 0x655   :  { %v250_v30 = vld [vmem:[%s6035_s15 + $0x30] sm:$0xff] }
 0x656   :  { %v1706_v32 = vpop.f32.mrf.mxu1 }
 0x657   :  { %1719 = vrot.lane.b32.xlu1 %v1706_v32, %s5143_s25  ;;  %v249_v32 = vld [vmem:[%s6035_s15 + $0x28] sm:$0xff] }
 0x658   :  { %v4783_v33 = vpop.f32.mrf.mxu1 }
 0x659   :  { %v248_v33 = vld [vmem:[%s6035_s15 + $0x20] sm:$0xff] }
 0x684   :  { %v1024_v34 = vpop.permute.xlu0 %1023 }
 0x685   :  { %v1034_v36 = vsel %vm353_vm2, %v517_v13, %v1024_v34  ;;  %v247_v34 = vld [vmem:[%s6035_s15 + $0x18] sm:$0xff] }
 0x6b5   :  { %v1028_v35 = vpop.permute.xlu1 %1027 }
 0x6b6   :  { %v1036_v37 = vsel %vm1035_vm3, %v1034_v36, %v1028_v35  ;;  %v246_v35 = vld [vmem:[%s6035_s15 + $0x10] sm:$0xff]  ;;  %v245_v36 = vld [vmem:[%s6035_s15 + $0x8] sm:$0xff] }
 0x6b9   :  { %v1032_v38 = vpop.permute.xlu1 %1031 }
 0x6ba   :  { %v1038_v39 = vsel %vm1037_vm4, %v1036_v37, %v1032_v38  ;;  %v244_v37 = vld [vmem:[%s6035_s15] sm:$0xff] }
 0x6bb   :  { %4792 = vmatprep.mubr.msk.f32.mxu0 %vm76_vm0, %v1038_v39  ;;  %v5610_v38 = vld [vmem:[%s6036_s14] sm:$0x3] }
 0x6bc   :  { %v1853_v39 = vrot.slane %v5610_v38, %v5324_v50 }
 0x6c1   :  { %v1712_v40 = vpop.permute.xlu0 %1711 }
 0x6c2   :  { %v1722_v42 = vsel %vm353_vm2, %v1205_v55, %v1712_v40 }
 0x6c5   :  { %v1716_v41 = vpop.permute.xlu0 %1715 }
 0x6c6   :  { %v1723_v43 = vsel %vm1035_vm3, %v1722_v42, %v1716_v41 }
 0x6c9   :  { %v1720_v45 = vpop.permute.xlu1 %1719 }
 0x6ca   :  { %v1724_v48 = vsel %vm1037_vm4, %v1723_v43, %v1720_v45 }
 0x6cb   :  { %4793 = vmatmul.mubr.msk.f32.vlgmr.msra.gmra.mxu0 %vm76_vm0, %v1724_v48 }
 0x6cc   :  { %4807 = vmatpush3.msra.mxu0 %v251_v29  ;;  %v219_v29 = vld [vmem:[%s6067_s30 + $0x20] sm:$0xff] }
 0x6cd   :  { %4808 = vmatprep.subr.mxu0 %v250_v30 }
 0x6ce   :  { %4809 = vmatpush3.msra.mxu0 %v250_v30 }
 0x6cf   :  { %4810 = vmatprep.subr.mxu0 %v249_v32 }
 0x6d0   :  { %4811 = vmatpush3.msra.mxu0 %v249_v32 }
 0x6d1   :  { %4812 = vmatprep.subr.mxu0 %v248_v33 }
 0x6d2   :  { %4813 = vmatpush3.msra.mxu0 %v248_v33 }
 0x6d3   :  { %4814 = vmatprep.subr.mxu0 %v247_v34 }
 0x6d4   :  { %4815 = vmatpush3.msra.mxu0 %v247_v34 }
 0x6d5   :  { %4816 = vmatprep.subr.mxu0 %v246_v35 }
 0x6d6   :  { %4817 = vmatpush3.msra.mxu0 %v246_v35 }
 0x6d7   :  { %4818 = vmatprep.subr.mxu0 %v245_v36 }
 0x6d8   :  { %4819 = vmatpush3.msra.mxu0 %v245_v36 }
 0x6d9   :  { %4820 = vmatprep.subr.mxu0 %v244_v37 }
 0x6da   :  { %4821 = vmatpush3.msra.mxu0 %v244_v37  ;;  %v5647_v37 = vld [vmem:[%s6038_s17] sm:$0x3]  ;;  %s6069_s17 = smov 72  }
 0x6db   :  { %4846 = vmatprep.subr.mxu0 %v5128_v47 }
 0x78b   :  { %v4794_v56 = vpop.f32.mrf.mxu0 }
 0x78c   :  { %v1807_v53 = vadd.f32 %v4794_v56, %v1728_v52 }
 0x78d   :  { %v1801_v54 = vpop.f32.mrf.mxu0 }
 0x78e   :  { %v1802_v57 = vadd.f32 %v1801_v54, %v1728_v52  ;;  %v1811_v58 = vadd.f32 %v1807_v53, %v5311_v46 }
 0x790   :  { %v1815_v59 = vsel %vm76_vm0, %v1811_v58, 0.0  ;;  %v1810_v60 = vadd.f32 %v1802_v57, %v5307_v44  ;;  %v238_v44 = vld [vmem:[%s6032_s13 + $0x18] sm:$0xff] }
 0x791   :  { %1816 = vadd.xlane.f32.xlu1 %v1815_v59  ;;  %4795 = vmatprep.subr.mxu1 %v238_v44 }
 0x792   :  { %v1812_v61 = vsel %vm76_vm0, %v1810_v60, 0.0  ;;  %4796 = vmatpush3.msra.mxu1 %v238_v44 }
 0x793   :  { %1813 = vadd.xlane.f32.xlu0 %v1812_v61  ;;  %4797 = vmatprep.subr.mxu1 %v237_v7 }
 0x794   :  { %4798 = vmatpush3.msra.mxu1 %v237_v7 }
 0x795   :  { %4799 = vmatprep.subr.mxu1 %v236_v8 }
 0x796   :  { %4800 = vmatpush3.msra.mxu1 %v236_v8 }
 0x797   :  { %4801 = vmatprep.subr.mxu1 %v235_v9 }
 0x798   :  { %4802 = vmatpush3.msra.mxu1 %v235_v9 }
 0x81a   :  { %v1817_v62 = vpop.xlane.xlu1 %1816 }
 0x81b   :  { %v1819_v63 = vmul.f32 0.03125, %v1817_v62 }
 0x81c   :  { %v1814_v0 = vpop.xlane.xlu0 %1813 }
 0x81d   :  { %v1818_v1 = vmul.f32 0.03125, %v1814_v0  ;;  %v1821_v2 = vsub.f32 %v1811_v58, %v1819_v63 }
 0x81f   :  { %v1820_v3 = vsub.f32 %v1810_v60, %v1818_v1  ;;  %v1823_v6 = vmul.f32 %v1821_v2, %v1821_v2 }
 0x821   :  { %v1822_v4 = vmul.f32 %v1820_v3, %v1820_v3  ;;  %v1827_v46 = vsel %vm76_vm0, %v1823_v6, 0.0 }
 0x823   :  { %v1824_v5 = vsel %vm76_vm0, %v1822_v4, 0.0 }
 0x824   :  { %1825 = vadd.xlane.f32.xlu0 %v1824_v5  ;;  %v5621_v5 = vld [vmem:[%s6037_s16] sm:$0x3] }
 0x825   :  { %v1956_v6 = vrot.slane %v5621_v5, %v5324_v50 }
 0x828   :  { %1828 = vadd.xlane.f32.xlu0 %v1827_v46 }
 0x8ad   :  { %v1826_v11 = vpop.xlane.xlu0 %1825 }
 0x8ae   :  { %v1830_v12 = vmul.f32 0.03125, %v1826_v11 }
 0x8b0   :  { %v1832_v13 = vadd.f32 1e-12, %v1830_v12 }
 0x8b1   :  { %v1829_v14 = vpop.xlane.xlu0 %1828 }
 0x8b2   :  { %5053 = vrsqrt.f32 %v1832_v13  ;;  %v1831_v15 = vmul.f32 0.03125, %v1829_v14 }
 0x8b4   :  { %v1833_v16 = vadd.f32 1e-12, %v1831_v15 }
 0x8b6   :  { %5055 = vrsqrt.f32 %v1833_v16 }
 0x8bf   :  { %v5054_v20 = vpop.eup %5053 }
 0x8c0   :  { %v1836_v21 = vmul.f32 %v5054_v20, %v1820_v3 }
 0x8c2   :  { %v1842_v23 = vmul.f32 %v1841_v19, %v1836_v21 }
 0x8c3   :  { %v5056_v26 = vpop.eup %5055 }
 0x8c4   :  { %v1837_v55 = vmul.f32 %v5056_v26, %v1821_v2  ;;  %v5574_v25 = vadd.f32 %v1847_v22, %v1842_v23 }
 0x8c6   :  { %v1843_v27 = vmul.f32 %v1841_v19, %v1837_v55  ;;  %4803 = vmatprep.mubr.msk.f32.mxu1 %vm76_vm0, %v5574_v25 }
 0x8c8   :  { %v5578_v28 = vadd.f32 %v1847_v22, %v1843_v27  ;;  %v221_v27 = vld [vmem:[%s6067_s30 + $0x30] sm:$0xff] }
 0x8ca   :  { %4804 = vmatmul.mubr.msk.f32.vlgmr.msra.gmra.mxu1 %vm76_vm0, %v5578_v28 }
 0x98a   :  { %v4805_v40 = vpop.f32.mrf.mxu1 }
 0x98b   :  { %v1932_v41 = vadd.f32 %v4805_v40, %v1853_v39  ;;  %v2070_v40 = vrot.slane %v5647_v37, %v5324_v50 }
 0x98c   :  { %v1926_v42 = vpop.f32.mrf.mxu1 }
 0x98d   :  { %v1938_v43 = vmul.f32 0.044715, %v1932_v41  ;;  %v1927_v45 = vadd.f32 %v1926_v42, %v1853_v39  ;;  %v1936_v2 = vmul.f32 0.5, %v1932_v41 }
 0x98f   :  { %v1940_v48 = vmul.f32 %v1938_v43, %v1932_v41  ;;  %v1937_v52 = vmul.f32 0.044715, %v1927_v45  ;;  %v1935_v0 = vmul.f32 0.5, %v1927_v45 }
 0x991   :  { %v1942_v56 = vmul.f32 %v1940_v48, %v1932_v41  ;;  %v1939_v53 = vmul.f32 %v1937_v52, %v1927_v45 }
 0x993   :  { %v1944_v54 = vadd.f32 %v1942_v56, %v1932_v41  ;;  %v1941_v57 = vmul.f32 %v1939_v53, %v1927_v45  ;;  %v5654_v41 = vld [vmem:[%s6039_s18] sm:$0x3]  ;;  %s6070_s18 = smov 64  }
 0x994   :  { %v2076_v52 = vrot.slane %v5654_v41, %v5324_v50 }
 0x995   :  { %v1946_v58 = vmul.f32 0.7978846, %v1944_v54  ;;  %v1943_v59 = vadd.f32 %v1941_v57, %v1927_v45 }
 0x997   :  { %5057 = vtanh.f32 %v1946_v58  ;;  %v1945_v60 = vmul.f32 0.7978846, %v1943_v59  ;;  %v2082_v58 = vrot.slane %v5329_v51, %v5415_v24 }
 0x999   :  { %5059 = vtanh.f32 %v1945_v60 }
 0x9a4   :  { %v5058_v61 = vpop.eup %5057 }
 0x9a5   :  { %v1950_v63 = vadd.f32 1.0, %v5058_v61 }
 0x9a6   :  { %v5060_v62 = vpop.eup %5059 }
 0x9a7   :  { %v1949_v1 = vadd.f32 1.0, %v5060_v62  ;;  %v1952_v4 = vmul.f32 %v1950_v63, %v1936_v2 }
 0x9a9   :  { %v1951_v3 = vmul.f32 %v1949_v1, %v1935_v0 }
 0x9ab   :  { %4822 = vmatprep.mubr.msk.f32.mxu0 %vm1957_vm5, %v1951_v3 }
 0x9ac   :  { %4823 = vmatmul.mubr.msk.f32.vlgmr.msra.gmra.mxu0 %vm1957_vm5, %v1952_v4 }
 0x9ad   :  { %4848 = vmatprep.mubr.msk.f32.mxu0 %vm5129_vm1, %v5128_v47 }
 0xa6c   :  { %v4824_v46 = vpop.f32.mrf.mxu0 }
 0xa6d   :  { %v2036_v44 = vadd.f32 %v4824_v46, %v1956_v6 }
 0xa6e   :  { %v2030_v7 = vpop.f32.mrf.mxu0 }
 0xa6f   :  { %v2031_v8 = vadd.f32 %v2030_v7, %v1956_v6  ;;  %v2040_v9 = vadd.f32 %v2036_v44, %v5578_v28  ;;  %v220_v28 = vld [vmem:[%s6067_s30 + $0x28] sm:$0xff] }
 0xa71   :  { %v2044_v11 = vsel %vm76_vm0, %v2040_v9, 0.0  ;;  %v2039_v12 = vadd.f32 %v2031_v8, %v5574_v25  ;;  %v222_v25 = vld [vmem:[%s6067_s30 + $0x38] sm:$0xff] }
 0xa72   :  { %2045 = vadd.xlane.f32.xlu1 %v2044_v11  ;;  %4825 = vmatprep.subr.mxu1 %v222_v25 }
 0xa73   :  { %v2041_v13 = vsel %vm76_vm0, %v2039_v12, 0.0  ;;  %4826 = vmatpush3.msra.mxu1 %v222_v25 }
 0xa74   :  { %2042 = vadd.xlane.f32.xlu0 %v2041_v13  ;;  %4827 = vmatprep.subr.mxu1 %v221_v27 }
 0xa75   :  { %4828 = vmatpush3.msra.mxu1 %v221_v27 }
 0xa76   :  { %4829 = vmatprep.subr.mxu1 %v220_v28 }
 0xa77   :  { %4830 = vmatpush3.msra.mxu1 %v220_v28 }
 0xa78   :  { %4831 = vmatprep.subr.mxu1 %v219_v29 }
 0xa79   :  { %4832 = vmatpush3.msra.mxu1 %v219_v29 }
 0xa7a   :  { %4836 = vmatprep.subr.mxu1 %v5128_v47 }
 0xafb   :  { %v2046_v14 = vpop.xlane.xlu1 %2045 }
 0xafc   :  { %v2048_v15 = vmul.f32 0.03125, %v2046_v14 }
 0xafd   :  { %v2043_v16 = vpop.xlane.xlu0 %2042 }
 0xafe   :  { %v2050_v19 = vsub.f32 %v2040_v9, %v2048_v15  ;;  %v2047_v20 = vmul.f32 0.03125, %v2043_v16 }
 0xb00   :  { %v2049_v21 = vsub.f32 %v2039_v12, %v2047_v20  ;;  %v2052_v22 = vmul.f32 %v2050_v19, %v2050_v19 }
 0xb02   :  { %v2056_v23 = vsel %vm76_vm0, %v2052_v22, 0.0  ;;  %v2051_v26 = vmul.f32 %v2049_v21, %v2049_v21 }
 0xb03   :  { %2057 = vadd.xlane.f32.xlu1 %v2056_v23 }
 0xb04   :  { %v2053_v55 = vsel %vm76_vm0, %v2051_v26, 0.0 }
 0xb05   :  { %2054 = vadd.xlane.f32.xlu0 %v2053_v55 }
 0xb8c   :  { %v2058_v30 = vpop.xlane.xlu1 %2057 }
 0xb8d   :  { %v2060_v32 = vmul.f32 0.03125, %v2058_v30 }
 0xb8e   :  { %v2055_v33 = vpop.xlane.xlu0 %2054 }
 0xb8f   :  { %v2062_v34 = vadd.f32 1e-12, %v2060_v32  ;;  %v2059_v35 = vmul.f32 0.03125, %v2055_v33 }
 0xb91   :  { %5061 = vrsqrt.f32 %v2062_v34  ;;  %v2061_v36 = vadd.f32 1e-12, %v2059_v35 }
 0xb93   :  { %5063 = vrsqrt.f32 %v2061_v36 }
 0xb9e   :  { %v5062_v39 = vpop.eup %5061 }
 0xb9f   :  { %v2066_v42 = vmul.f32 %v5062_v39, %v2050_v19 }
 0xba0   :  { %v5064_v43 = vpop.eup %5063 }
 0xba1   :  { %v2065_v45 = vmul.f32 %v5064_v43, %v2049_v21  ;;  %v2072_v48 = vmul.f32 %v2070_v40, %v2066_v42 }
 0xba3   :  { %v2071_v56 = vmul.f32 %v2070_v40, %v2065_v45  ;;  %v5660_v54 = vadd.f32 %v2076_v52, %v2072_v48 }
 0xba5   :  { %v5658_v53 = vadd.f32 %v2076_v52, %v2071_v56 }
 0xba7   :  { %4833 = vmatprep.mubr.msk.f32.mxu1 %vm76_vm0, %v5658_v53 }
 0xba8   :  { %4834 = vmatmul.mubr.msk.f32.vlgmr.msra.gmra.mxu1 %vm76_vm0, %v5660_v54 }
 0xba9   :  { %4838 = vmatprep.mubr.msk.f32.mxu1 %vm5129_vm1, %v5128_v47 }
 0xc68   :  { %v4835_v57 = vpop.f32.mrf.mxu1 }
 0xc69   :  { %v5684_v51 = vadd.f32 %v4835_v57, %v2082_v58 }
 0xc6a   :  { %v2155_v59 = vpop.f32.mrf.mxu1 }
 0xc6b   :  { %v5670_v50 = vadd.f32 %v2155_v59, %v2082_v58 }
 0xc6d   :  { %2332 = vrot.lane.b32.xlu1 %v5670_v50, %s5130_s2  ;;  %2165 = vrot.lane.b32.xlu0 %v5670_v50, %s5131_s7 }
 0xc71   :  { %2330 = vrot.lane.b32.xlu1 %v5670_v50, %s5132_s4  ;;  %2497 = vrot.lane.b32.xlu0 %v5670_v50, %s5133_s8 }
 0xc75   :  { %2499 = vrot.lane.b32.xlu1 %v5670_v50, %s5134_s22  ;;  %2664 = vrot.lane.b32.xlu0 %v5670_v50, %s5135_s23 }
 0xc79   :  { %2666 = vrot.lane.b32.xlu1 %v5670_v50, %s6069_s17  ;;  %3014 = vrot.lane.b32.xlu0 %v5684_v51, %s5130_s2  ;;  %s6071_s2 = smov 48  }
 0xc7d   :  { %2847 = vrot.lane.b32.xlu1 %v5684_v51, %s5131_s7  ;;  %3181 = vrot.lane.b32.xlu0 %v5684_v51, %s5134_s22  ;;  %s6072_s7 = smov 40  }
 0xc81   :  { %3012 = vrot.lane.b32.xlu1 %v5684_v51, %s5132_s4  ;;  %3348 = vrot.lane.b32.xlu0 %v5684_v51, %s6069_s17  ;;  %s6073_s4 = smov 56  }
 0xc85   :  { %3179 = vrot.lane.b32.xlu1 %v5684_v51, %s5133_s8 }
 0xc89   :  { %3346 = vrot.lane.b32.xlu1 %v5684_v51, %s5135_s23 }
 0xcdf   :  { %v2333_v60 = vpop.permute.xlu1 %2332  ;;  %v2166_v61 = vpop.permute.xlu0 %2165 }
 0xce0   :  { %4837 = vmatpush3.xpose.msk.msra.mxu1 %vm353_vm2, %v2166_v61  ;;  %4847 = vmatpush3.xpose.msk.msra.mxu0 %vm353_vm2, %v2333_v60 }
 0xce1   :  { %4856 = vmatprep.subr.mxu0 %v5128_v47  ;;  %4841 = vmatprep.subr.mxu1 %v5128_v47 }
 0xce3   :  { %v2331_v62 = vpop.permute.xlu1 %2330  ;;  %4839 = vmatmul.mubr.msk.f32.vlgmr.msra.gmra.mxu1 %vm353_vm2, %v5670_v50  ;;  %v2498_v63 = vpop.permute.xlu0 %2497 }
 0xce4   :  { %4849 = vmatmul.mubr.msk.f32.vlgmr.msra.gmra.mxu0 %vm353_vm2, %v2331_v62  ;;  %4843 = vmatprep.mubr.msk.f32.mxu1 %vm5129_vm1, %v5128_v47 }
 0xce5   :  { %4858 = vmatprep.mubr.msk.f32.mxu0 %vm5129_vm1, %v5128_v47 }
 0xce7   :  { %v2500_v0 = vpop.permute.xlu1 %2499  ;;  %v2665_v1 = vpop.permute.xlu0 %2664 }
 0xce8   :  { %4857 = vmatpush3.xpose.msk.msra.mxu0 %vm353_vm2, %v2500_v0 }
 0xce9   :  { %4866 = vmatprep.subr.mxu0 %v5128_v47 }
 0xceb   :  { %v2667_v2 = vpop.permute.xlu1 %2666  ;;  %4859 = vmatmul.mubr.msk.f32.vlgmr.msra.gmra.mxu0 %vm353_vm2, %v2498_v63  ;;  %v3015_v3 = vpop.permute.xlu0 %3014 }
 0xcec   :  { %4867 = vmatpush3.xpose.msk.msra.mxu0 %vm353_vm2, %v2667_v2  ;;  %4868 = vmatprep.mubr.msk.f32.mxu0 %vm5129_vm1, %v5128_v47 }
 0xced   :  { %4876 = vmatprep.subr.mxu0 %v5128_v47 }
 0xcef   :  { %v2848_v4 = vpop.permute.xlu1 %2847  ;;  %4869 = vmatmul.mubr.msk.f32.vlgmr.msra.gmra.mxu0 %vm353_vm2, %v2665_v1  ;;  %v3182_v46 = vpop.permute.xlu0 %3181 }
 0xcf0   :  { %4877 = vmatpush3.xpose.msk.msra.mxu0 %vm353_vm2, %v2848_v4  ;;  %4878 = vmatprep.mubr.msk.f32.mxu0 %vm5129_vm1, %v5128_v47 }
 0xcf1   :  { %4886 = vmatprep.subr.mxu0 %v5128_v47 }
 0xcf3   :  { %v3013_v6 = vpop.permute.xlu1 %3012  ;;  %4879 = vmatmul.mubr.msk.f32.vlgmr.msra.gmra.mxu0 %vm353_vm2, %v5684_v51  ;;  %v3349_v7 = vpop.permute.xlu0 %3348 }
 0xcf4   :  { %4887 = vmatpush3.xpose.msk.msra.mxu0 %vm353_vm2, %v3015_v3  ;;  %4888 = vmatprep.mubr.msk.f32.mxu0 %vm5129_vm1, %v5128_v47 }
 0xcf5   :  { %4896 = vmatprep.subr.mxu0 %v5128_v47 }
 0xcf7   :  { %4889 = vmatmul.mubr.msk.f32.vlgmr.msra.gmra.mxu0 %vm353_vm2, %v3013_v6  ;;  %v3180_v44 = vpop.permute.xlu1 %3179 }
 0xcf8   :  { %4897 = vmatpush3.xpose.msk.msra.mxu0 %vm353_vm2, %v3182_v46  ;;  %4898 = vmatprep.mubr.msk.f32.mxu0 %vm5129_vm1, %v5128_v47 }
 0xcf9   :  { %4906 = vmatprep.subr.mxu0 %v5128_v47 }
 0xcfb   :  { %4899 = vmatmul.mubr.msk.f32.vlgmr.msra.gmra.mxu0 %vm353_vm2, %v3180_v44  ;;  %v3347_v8 = vpop.permute.xlu1 %3346 }
 0xcfc   :  { %4907 = vmatpush3.xpose.msk.msra.mxu0 %vm353_vm2, %v3349_v7  ;;  %4908 = vmatprep.mubr.msk.f32.mxu0 %vm5129_vm1, %v5128_v47 }
 0xcff   :  { %4909 = vmatmul.mubr.msk.f32.vlgmr.msra.gmra.mxu0 %vm353_vm2, %v3347_v8 }
 0xda3   :  { %v2237_v9 = vpop.f32.mrf.mxu1 }
 0xda4   :  { %v2241_v11 = vmul.f32 0.35355338, %v2237_v9  ;;  %v2404_v12 = vpop.f32.mrf.mxu0 }
 0xda5   :  { %v2408_v13 = vmul.f32 0.35355338, %v2404_v12  ;;  %v4840_v14 = vpop.f32.mrf.mxu1 }
 0xda6   :  { %v4850_v15 = vpop.f32.mrf.mxu0  ;;  %v2242_v16 = vadd.f32 %v2241_v11, %v5408_v10 }
 0xda7   :  { %v2409_v19 = vadd.f32 %v2408_v13, %v5408_v10 }
 0xda8   :  { %v2243_v20 = vsel %vm353_vm2, %v2242_v16, -inf }
 0xda9   :  { %2244 = vmax.xlane.f32.xlu0 %v2243_v20  ;;  %v2410_v21 = vsel %vm353_vm2, %v2409_v19, -inf }
 0xdaa   :  { %2411 = vmax.xlane.f32.xlu1 %v2410_v21 }
 0xdab   :  { %v2571_v22 = vpop.f32.mrf.mxu0 }
 0xdac   :  { %v2575_v23 = vmul.f32 0.35355338, %v2571_v22 }
 0xdad   :  { %v4860_v26 = vpop.f32.mrf.mxu0 }
 0xdae   :  { %v5746_v55 = vadd.f32 %v2575_v23, %v5408_v10 }
 0xdaf   :  { %v2738_v25 = vpop.f32.mrf.mxu0 }
 0xdb0   :  { %v2742_v27 = vmul.f32 0.35355338, %v2738_v25  ;;  %v2577_v28 = vsel %vm353_vm2, %v5746_v55, -inf }
 0xdb1   :  { %2578 = vmax.xlane.f32.xlu0 %v2577_v28  ;;  %v4870_v29 = vpop.f32.mrf.mxu0 }
 0xdb2   :  { %v2743_v30 = vadd.f32 %v2742_v27, %v5408_v10 }
 0xdb3   :  { %v2919_v32 = vpop.f32.mrf.mxu0 }
 0xdb4   :  { %v2923_v33 = vmul.f32 0.35355338, %v2919_v32  ;;  %v2744_v34 = vsel %vm353_vm2, %v2743_v30, -inf }
 0xdb5   :  { %2745 = vmax.xlane.f32.xlu0 %v2744_v34  ;;  %v4880_v35 = vpop.f32.mrf.mxu0 }
 0xdb6   :  { %v2924_v36 = vadd.f32 %v2923_v33, %v5424_v31 }
 0xdb7   :  { %v3086_v39 = vpop.f32.mrf.mxu0 }
 0xdb8   :  { %v3090_v40 = vmul.f32 0.35355338, %v3086_v39  ;;  %v2925_v42 = vsel %vm353_vm2, %v2924_v36, -inf }
 0xdb9   :  { %2926 = vmax.xlane.f32.xlu0 %v2925_v42  ;;  %v4890_v43 = vpop.f32.mrf.mxu0 }
 0xdba   :  { %v3091_v45 = vadd.f32 %v3090_v40, %v5424_v31 }
 0xdbb   :  { %v3253_v48 = vpop.f32.mrf.mxu0 }
 0xdbc   :  { %v3257_v52 = vmul.f32 0.35355338, %v3253_v48  ;;  %v3092_v10 = vsel %vm353_vm2, %v3091_v45, -inf }
 0xdbd   :  { %3093 = vmax.xlane.f32.xlu1 %v3092_v10  ;;  %v4900_v56 = vpop.f32.mrf.mxu0 }
 0xdbe   :  { %v3258_v57 = vadd.f32 %v3257_v52, %v5424_v31 }
 0xdbf   :  { %v3420_v58 = vpop.f32.mrf.mxu0 }
 0xdc0   :  { %v3259_v59 = vsel %vm353_vm2, %v3258_v57, -inf  ;;  %v3424_v61 = vmul.f32 0.35355338, %v3420_v58 }
 0xdc1   :  { %3260 = vmax.xlane.f32.xlu0 %v3259_v59  ;;  %v4910_v60 = vpop.f32.mrf.mxu0 }
 0xdc2   :  { %v3425_v62 = vadd.f32 %v3424_v61, %v5424_v31 }
 0xdc4   :  { %v3426_v63 = vsel %vm353_vm2, %v3425_v62, -inf }
 0xdce   :  { %2254 = vrot.lane.b32.xlu1 %v5670_v50, %s6070_s18 }
 0xdf2   :  { %3427 = vmax.xlane.f32.xlu1 %v3426_v63 }
 0xe03   :  { %2588 = vrot.lane.b32.xlu1 %v5670_v50, %s6071_s2 }
 0xe07   :  { %2755 = vrot.lane.b32.xlu1 %v5670_v50, %s6072_s7 }
 0xe0b   :  { %2936 = vrot.lane.b32.xlu1 %v5684_v51, %s6070_s18 }
 0xe32   :  { %v2245_v0 = vpop.xlane.xlu0 %2244 }
 0xe33   :  { %v2246_v1 = vsub.f32 %v2242_v16, %v2245_v0  ;;  %v2412_v2 = vpop.xlane.xlu1 %2411 }
 0xe34   :  { %v2413_v3 = vsub.f32 %v2409_v19, %v2412_v2 }
 0xe35   :  { %v2247_v4 = vmul.f32 1.442695, %v2246_v1 }
 0xe36   :  { %v2414_v6 = vmul.f32 1.442695, %v2413_v3 }
 0xe37   :  { %5065 = vpow2.f32 %v2247_v4 }
 0xe38   :  { %5067 = vpow2.f32 %v2414_v6 }
 0xe3a   :  { %v2579_v31 = vpop.xlane.xlu0 %2578 }
 0xe3b   :  { %v2580_v19 = vsub.f32 %v5746_v55, %v2579_v31 }
 0xe3d   :  { %v2581_v21 = vmul.f32 1.442695, %v2580_v19 }
 0xe3e   :  { %v2746_v46 = vpop.xlane.xlu0 %2745 }
 0xe3f   :  { %v2747_v44 = vsub.f32 %v2743_v30, %v2746_v46 }
 0xe41   :  { %v2748_v7 = vmul.f32 1.442695, %v2747_v44 }
 0xe42   :  { %v2927_v20 = vpop.xlane.xlu0 %2926 }
 0xe43   :  { %5069 = vpow2.f32 %v2748_v7  ;;  %v2928_v22 = vsub.f32 %v2924_v36, %v2927_v20 }
 0xe44   :  { %v5066_v8 = vpop.eup %5065  ;;  %5071 = vpow2.f32 %v2581_v21 }
 0xe45   :  { %v5768_v9 = vpop.eup %5067  ;;  %v2249_v11 = vsel %vm353_vm2, %v5066_v8, 0.0  ;;  %v2929_v26 = vmul.f32 1.442695, %v2928_v22 }
 0xe46   :  { %v3094_v12 = vpop.xlane.xlu1 %3093  ;;  %2250 = vadd.xlane.f32.xlu0 %v2249_v11  ;;  %v2416_v13 = vsel %vm353_vm2, %v5768_v9, 0.0 }
 0xe47   :  { %2417 = vadd.xlane.f32.xlu1 %v2416_v13  ;;  %5073 = vpow2.f32 %v2929_v26  ;;  %v3095_v27 = vsub.f32 %v3091_v45, %v3094_v12 }
 0xe49   :  { %v3096_v29 = vmul.f32 1.442695, %v3095_v27  ;;  %v230_v27 = vld [vmem:[%s6030_s9 + $0x30] sm:$0xff] }
 0xe4a   :  { %v2255_v14 = vpop.permute.xlu1 %2254  ;;  %v3261_v23 = vpop.xlane.xlu0 %3260 }
 0xe4b   :  { %4842 = vmatpush3.msra.mxu1 %v2255_v14  ;;  %v3262_v25 = vsub.f32 %v3258_v57, %v3261_v23 }
 0xe4c   :  { %4851 = vmatprep.subr.mxu1 %v5128_v47 }
 0xe4d   :  { %v3263_v28 = vmul.f32 1.442695, %v3262_v25  ;;  %v231_v25 = vld [vmem:[%s6030_s9 + $0x38] sm:$0xff] }
 0xe4e   :  { %4916 = vmatprep.subr.mxu0 %v231_v25 }
 0xe4f   :  { %5075 = vpow2.f32 %v3263_v28  ;;  %4917 = vmatpush3.msra.mxu0 %v231_v25 }
 0xe50   :  { %v5774_v15 = vpop.eup %5069  ;;  %5077 = vpow2.f32 %v3096_v29  ;;  %4918 = vmatprep.subr.mxu0 %v230_v27 }
 0xe51   :  { %v2750_v16 = vsel %vm353_vm2, %v5774_v15, 0.0  ;;  %v5072_v30 = vpop.eup %5071  ;;  %4919 = vmatpush3.msra.mxu0 %v230_v27 }
 0xe52   :  { %2751 = vadd.xlane.f32.xlu1 %v2750_v16 }
 0xe54   :  { %v5784_v55 = vpop.eup %5073 }
 0xe55   :  { %v2931_v35 = vsel %vm353_vm2, %v5784_v55, 0.0 }
 0xe5c   :  { %2421 = vrot.lane.b32.xlu0 %v5670_v50, %s6073_s4  ;;  %v2583_v50 = vsel %vm353_vm2, %v5072_v30, 0.0  ;;  %v5788_v36 = vpop.eup %5075 }
 0xe5d   :  { %v3265_v39 = vsel %vm353_vm2, %v5788_v36, 0.0  ;;  %v5078_v40 = vpop.eup %5077 }
 0xe5e   :  { %v3098_v42 = vsel %vm353_vm2, %v5078_v40, 0.0 }
 0xe63   :  { %3103 = vrot.lane.b32.xlu1 %v5684_v51, %s6073_s4 }
 0xe7b   :  { %v3428_v32 = vpop.xlane.xlu1 %3427  ;;  %2584 = vadd.xlane.f32.xlu0 %v2583_v50  ;;  %v228_v50 = vld [vmem:[%s6030_s9 + $0x20] sm:$0xff] }
 0xe7c   :  { %v3429_v33 = vsub.f32 %v3425_v62, %v3428_v32 }
 0xe7e   :  { %v3430_v34 = vmul.f32 1.442695, %v3429_v33 }
 0xe7f   :  { %2932 = vadd.xlane.f32.xlu0 %v2931_v35  ;;  %v2589_v48 = vpop.permute.xlu1 %2588 }
 0xe80   :  { %5079 = vpow2.f32 %v3430_v34 }
 0xe83   :  { %3266 = vadd.xlane.f32.xlu0 %v3265_v39  ;;  %v2756_v52 = vpop.permute.xlu1 %2755 }
 0xe87   :  { %3099 = vadd.xlane.f32.xlu1 %v3098_v42  ;;  %v2937_v10 = vpop.permute.xlu1 %2936 }
 0xe8d   :  { %v5793_v43 = vpop.eup %5079 }
 0xe8e   :  { %v3432_v45 = vsel %vm353_vm2, %v5793_v43, 0.0 }
 0xe8f   :  { %3433 = vadd.xlane.f32.xlu0 %v3432_v45 }
 0xe98   :  { %3437 = vrot.lane.b32.xlu1 %v5684_v51, %s6072_s7 }
 0xea5   :  { %3270 = vrot.lane.b32.xlu0 %v5684_v51, %s6071_s2 }
 0xecf   :  { %v2251_v56 = vpop.xlane.xlu0 %2250 }
 0xed0   :  { %5081 = vrcp.f32 %v2251_v56  ;;  %v2418_v57 = vpop.xlane.xlu1 %2417 }
 0xed1   :  { %5083 = vrcp.f32 %v2418_v57 }
 0xed3   :  { %v2422_v61 = vpop.permute.xlu0 %2421 }
 0xedb   :  { %v2752_v62 = vpop.xlane.xlu1 %2751 }
 0xedd   :  { %v5082_v58 = vpop.eup %5081 }
 0xede   :  { %v2253_v59 = vmul.f32 %v5082_v58, %v5066_v8  ;;  %v5084_v60 = vpop.eup %5083 }
 0xedf   :  { %v2420_v51 = vmul.f32 %v5084_v60, %v5768_v9  ;;  %v3104_v1 = vpop.permute.xlu1 %3103 }
 0xee0   :  { %4844 = vmatmul.mubr.msk.f32.vlgmr.msra.gmra.mxu1 %vm353_vm2, %v2253_v59 }
 0xee1   :  { %4852 = vmatpush3.msra.mxu1 %v2422_v61  ;;  %4853 = vmatprep.mubr.msk.f32.mxu1 %vm5129_vm1, %v5128_v47 }
 0xee2   :  { %4861 = vmatprep.subr.mxu1 %v5128_v47 }
 0xee4   :  { %4854 = vmatmul.mubr.msk.f32.vlgmr.msra.gmra.mxu1 %vm353_vm2, %v2420_v51 }
 0xee5   :  { %4862 = vmatpush3.msra.mxu1 %v2589_v48  ;;  %4863 = vmatprep.mubr.msk.f32.mxu1 %vm5129_vm1, %v5128_v47 }
 0xee6   :  { %4871 = vmatprep.subr.mxu1 %v5128_v47 }
 0xf04   :  { %v2585_v63 = vpop.xlane.xlu0 %2584 }
 0xf05   :  { %5085 = vrcp.f32 %v2585_v63 }
 0xf06   :  { %5087 = vrcp.f32 %v2752_v62  ;;  %v3531_v62 = vrot.slane %v5538_v49, %v5415_v24 }
 0xf08   :  { %v2933_v0 = vpop.xlane.xlu0 %2932 }
 0xf09   :  { %5089 = vrcp.f32 %v2933_v0 }
 0xf0c   :  { %v3267_v2 = vpop.xlane.xlu0 %3266 }
 0xf10   :  { %v3100_v3 = vpop.xlane.xlu1 %3099 }
 0xf11   :  { %5091 = vrcp.f32 %v3100_v3 }
 0xf12   :  { %v5086_v4 = vpop.eup %5085  ;;  %5093 = vrcp.f32 %v3267_v2 }
 0xf13   :  { %v2587_v6 = vmul.f32 %v5086_v4, %v5072_v30  ;;  %v5088_v31 = vpop.eup %5087  ;;  %v229_v30 = vld [vmem:[%s6030_s9 + $0x28] sm:$0xff] }
 0xf14   :  { %v2754_v46 = vmul.f32 %v5088_v31, %v5774_v15  ;;  %v3438_v15 = vpop.permute.xlu1 %3437  ;;  %4920 = vmatprep.subr.mxu0 %v229_v30 }
 0xf15   :  { %4864 = vmatmul.mubr.msk.f32.vlgmr.msra.gmra.mxu1 %vm353_vm2, %v2587_v6  ;;  %4921 = vmatpush3.msra.mxu0 %v229_v30 }
 0xf16   :  { %4872 = vmatpush3.msra.mxu1 %v2756_v52  ;;  %4873 = vmatprep.mubr.msk.f32.mxu1 %vm5129_vm1, %v5128_v47  ;;  %v5090_v44 = vpop.eup %5089 }
 0xf17   :  { %4881 = vmatprep.subr.mxu1 %v5128_v47  ;;  %v2935_v8 = vmul.f32 %v5090_v44, %v5784_v55  ;;  %4922 = vmatprep.subr.mxu0 %v228_v50 }
 0xf18   :  { %v3434_v7 = vpop.xlane.xlu0 %3433  ;;  %4923 = vmatpush3.msra.mxu0 %v228_v50  ;;  %v3650_v50 = vrot.slane %v5568_v18, %v5415_v24  ;;  %v258_v18 = vld [vmem:[%s6035_s15 + $0x70] sm:$0xff] }
 0xf19   :  { %5095 = vrcp.f32 %v3434_v7  ;;  %4874 = vmatmul.mubr.msk.f32.vlgmr.msra.gmra.mxu1 %vm353_vm2, %v2754_v46 }
 0xf1a   :  { %4882 = vmatpush3.msra.mxu1 %v2937_v10  ;;  %4883 = vmatprep.mubr.msk.f32.mxu1 %vm5129_vm1, %v5128_v47 }
 0xf1b   :  { %4891 = vmatprep.subr.mxu1 %v5128_v47 }
 0xf1c   :  { %v3271_v13 = vpop.permute.xlu0 %3270 }
 0xf1d   :  { %4884 = vmatmul.mubr.msk.f32.vlgmr.msra.gmra.mxu1 %vm353_vm2, %v2935_v8 }
 0xf1e   :  { %v5092_v9 = vpop.eup %5091  ;;  %4892 = vmatpush3.msra.mxu1 %v3104_v1  ;;  %4893 = vmatprep.mubr.msk.f32.mxu1 %vm5129_vm1, %v5128_v47 }
 0xf1f   :  { %4901 = vmatprep.subr.mxu1 %v5128_v47  ;;  %v3102_v11 = vmul.f32 %v5092_v9, %v5078_v40  ;;  %v5094_v12 = vpop.eup %5093 }
 0xf20   :  { %v3269_v14 = vmul.f32 %v5094_v12, %v5788_v36 }
 0xf21   :  { %4894 = vmatmul.mubr.msk.f32.vlgmr.msra.gmra.mxu1 %vm353_vm2, %v3102_v11 }
 0xf22   :  { %4902 = vmatpush3.msra.mxu1 %v3271_v13  ;;  %4903 = vmatprep.mubr.msk.f32.mxu1 %vm5129_vm1, %v5128_v47 }
 0xf23   :  { %4911 = vmatprep.subr.mxu1 %v5128_v47 }
 0xf25   :  { %4904 = vmatmul.mubr.msk.f32.vlgmr.msra.gmra.mxu1 %vm353_vm2, %v3269_v14 }
 0xf26   :  { %v5096_v16 = vpop.eup %5095  ;;  %4912 = vmatpush3.msra.mxu1 %v3438_v15  ;;  %4913 = vmatprep.mubr.msk.f32.mxu1 %vm5129_vm1, %v5128_v47  ;;  %v242_v15 = vld [vmem:[%s6032_s13 + $0x38] sm:$0xff] }
 0xf27   :  { %v3436_v19 = vmul.f32 %v5096_v16, %v5793_v43  ;;  %v241_v16 = vld [vmem:[%s6032_s13 + $0x30] sm:$0xff]  ;;  %4927 = vmatprep.subr.mxu1 %v242_v15 }
 0xf29   :  { %4914 = vmatmul.mubr.msk.f32.vlgmr.msra.gmra.mxu1 %vm353_vm2, %v3436_v19  ;;  %v240_v19 = vld [vmem:[%s6032_s13 + $0x28] sm:$0xff] }
 0xf2a   :  { %4928 = vmatpush3.msra.mxu1 %v242_v15 }
 0xf2b   :  { %4929 = vmatprep.subr.mxu1 %v241_v16 }
 0xf2c   :  { %4930 = vmatpush3.msra.mxu1 %v241_v16 }
 0xf2d   :  { %4931 = vmatprep.subr.mxu1 %v240_v19 }
 0xf2e   :  { %4932 = vmatpush3.msra.mxu1 %v240_v19 }
 0xfa0   :  { %v2326_v20 = vpop.f32.mrf.mxu1 }
 0xfa2   :  { %v4845_v21 = vpop.f32.mrf.mxu1 }
 0xfa4   :  { %v2493_v22 = vpop.f32.mrf.mxu1 }
 0xfa5   :  { %2832 = vrot.lane.b32.xlu0 %v2493_v22, %s5141_s28 }
 0xfa6   :  { %v4855_v23 = vpop.f32.mrf.mxu1 }
 0xfd5   :  { %v2660_v26 = vpop.f32.mrf.mxu1 }
 0xfd6   :  { %2836 = vrot.lane.b32.xlu1 %v2660_v26, %s5142_s5 }
 0xfd7   :  { %v4865_v28 = vpop.f32.mrf.mxu1 }
 0xfd8   :  { %v3644_v28 = vrot.slane %v5563_v17, %v5415_v24  ;;  %v259_v17 = vld [vmem:[%s6035_s15 + $0x78] sm:$0xff] }
 0xfd9   :  { %v2827_v29 = vpop.f32.mrf.mxu1  ;;  %4938 = vmatprep.subr.mxu0 %v259_v17 }
 0xfda   :  { %2840 = vrot.lane.b32.xlu1 %v2827_v29, %s5143_s25 }
 0xfdb   :  { %v4875_v55 = vpop.f32.mrf.mxu1 }
 0xfdd   :  { %v3008_v32 = vpop.f32.mrf.mxu1 }
 0xfdf   :  { %v4885_v33 = vpop.f32.mrf.mxu1 }
 0xfe1   :  { %v3175_v34 = vpop.f32.mrf.mxu1 }
 0xfe2   :  { %3514 = vrot.lane.b32.xlu0 %v3175_v34, %s5141_s28 }
 0xfe3   :  { %v4895_v35 = vpop.f32.mrf.mxu1 }
 0xfe5   :  { %v3342_v36 = vpop.f32.mrf.mxu1 }
 0xfe6   :  { %3518 = vrot.lane.b32.xlu0 %v3342_v36, %s5142_s5 }
 0xfe7   :  { %v4905_v39 = vpop.f32.mrf.mxu1 }
 0xfe8   :  { %v257_v39 = vld [vmem:[%s6035_s15 + $0x68] sm:$0xff] }
 0xfe9   :  { %v3509_v40 = vpop.f32.mrf.mxu1 }
 0xfea   :  { %3522 = vrot.lane.b32.xlu1 %v3509_v40, %s5143_s25  ;;  %v256_v40 = vld [vmem:[%s6035_s15 + $0x60] sm:$0xff] }
 0xfeb   :  { %v4915_v42 = vpop.f32.mrf.mxu1 }
 0xfec   :  { %v255_v42 = vld [vmem:[%s6035_s15 + $0x58] sm:$0xff] }
0x1017   :  { %v2833_v43 = vpop.permute.xlu0 %2832 }
0x1018   :  { %v2843_v48 = vsel %vm353_vm2, %v2326_v20, %v2833_v43  ;;  %v239_v20 = vld [vmem:[%s6032_s13 + $0x20] sm:$0xff]  ;;  %v254_v43 = vld [vmem:[%s6035_s15 + $0x50] sm:$0xff] }
0x1019   :  { %4933 = vmatprep.subr.mxu1 %v239_v20 }
0x101a   :  { %4934 = vmatpush3.msra.mxu1 %v239_v20 }
0x101b   :  { %4957 = vmatprep.subr.mxu1 %v5128_v47 }
0x1048   :  { %v2837_v45 = vpop.permute.xlu1 %2836 }
0x1049   :  { %v2844_v52 = vsel %vm1035_vm3, %v2843_v48, %v2837_v45  ;;  %v253_v45 = vld [vmem:[%s6035_s15 + $0x48] sm:$0xff]  ;;  %v252_v48 = vld [vmem:[%s6035_s15 + $0x40] sm:$0xff] }
0x104c   :  { %v2841_v10 = vpop.permute.xlu1 %2840 }
0x104d   :  { %v2845_v56 = vsel %vm1037_vm4, %v2844_v52, %v2841_v10  ;;  %v3656_v52 = vrot.slane %v5610_v38, %v5415_v24 }
0x104e   :  { %4924 = vmatprep.mubr.msk.f32.mxu0 %vm76_vm0, %v2845_v56 }
0x1054   :  { %v3515_v57 = vpop.permute.xlu0 %3514 }
0x1055   :  { %v3525_v59 = vsel %vm353_vm2, %v3008_v32, %v3515_v57  ;;  %vm4451_vm2 = vcmask 15360  }
0x1058   :  { %v3519_v58 = vpop.permute.xlu0 %3518 }
0x1059   :  { %v3526_v60 = vsel %vm1035_vm3, %v3525_v59, %v3519_v58 }
0x105c   :  { %v3523_v61 = vpop.permute.xlu1 %3522 }
0x105d   :  { %v3527_v51 = vsel %vm1037_vm4, %v3526_v60, %v3523_v61 }
0x105e   :  { %4925 = vmatmul.mubr.msk.f32.vlgmr.msra.gmra.mxu0 %vm76_vm0, %v3527_v51 }
0x105f   :  { %4939 = vmatpush3.msra.mxu0 %v259_v17 }
0x1060   :  { %4940 = vmatprep.subr.mxu0 %v258_v18 }
0x1061   :  { %4941 = vmatpush3.msra.mxu0 %v258_v18 }
0x1062   :  { %4942 = vmatprep.subr.mxu0 %v257_v39 }
0x1063   :  { %4943 = vmatpush3.msra.mxu0 %v257_v39 }
0x1064   :  { %4944 = vmatprep.subr.mxu0 %v256_v40 }
0x1065   :  { %4945 = vmatpush3.msra.mxu0 %v256_v40 }
0x1066   :  { %4946 = vmatprep.subr.mxu0 %v255_v42 }
0x1067   :  { %4947 = vmatpush3.msra.mxu0 %v255_v42  ;;  %v3872_v42 = vrot.slane %v5647_v37, %v5415_v24  ;;  %v3884_v37 = vld [vmem:[%s6040_s19 + $0x18] sm:$0xff] }
0x1068   :  { %4948 = vmatprep.subr.mxu0 %v254_v43 }
0x1069   :  { %4949 = vmatpush3.msra.mxu0 %v254_v43 }
0x106a   :  { %4950 = vmatprep.subr.mxu0 %v253_v45 }
0x106b   :  { %4951 = vmatpush3.msra.mxu0 %v253_v45  ;;  %v3878_v45 = vrot.slane %v5654_v41, %v5415_v24  ;;  %v3882_v41 = vld [vmem:[%s6040_s19 + $0x8] sm:$0xff] }
0x106c   :  { %4952 = vmatprep.subr.mxu0 %v252_v48 }
0x106d   :  { %4953 = vmatpush3.msra.mxu0 %v252_v48 }
0x106e   :  { %4979 = vmatprep.subr.mxu0 %v5128_v47 }
0x111e   :  { %v4926_v63 = vpop.f32.mrf.mxu0 }
0x111f   :  { %v3610_v0 = vadd.f32 %v4926_v63, %v3531_v62 }
0x1120   :  { %v3604_v1 = vpop.f32.mrf.mxu0 }
0x1121   :  { %v3614_v2 = vadd.f32 %v3610_v0, %v5660_v54  ;;  %v3605_v3 = vadd.f32 %v3604_v1, %v3531_v62 }
0x1123   :  { %v3613_v4 = vadd.f32 %v3605_v3, %v5658_v53  ;;  %v3618_v6 = vsel %vm76_vm0, %v3614_v2, 0.0 }
0x1124   :  { %3619 = vadd.xlane.f32.xlu1 %v3618_v6 }
0x1125   :  { %v3615_v31 = vsel %vm76_vm0, %v3613_v4, 0.0 }
0x1126   :  { %3616 = vadd.xlane.f32.xlu0 %v3615_v31 }
0x11ad   :  { %v3620_v46 = vpop.xlane.xlu1 %3619 }
0x11ae   :  { %v3622_v44 = vmul.f32 0.03125, %v3620_v46 }
0x11af   :  { %v3617_v7 = vpop.xlane.xlu0 %3616 }
0x11b0   :  { %v3621_v8 = vmul.f32 0.03125, %v3617_v7  ;;  %v3624_v9 = vsub.f32 %v3614_v2, %v3622_v44 }
0x11b2   :  { %v3623_v49 = vsub.f32 %v3613_v4, %v3621_v8  ;;  %v3626_v13 = vmul.f32 %v3624_v9, %v3624_v9 }
0x11b4   :  { %v3625_v11 = vmul.f32 %v3623_v49, %v3623_v49  ;;  %v3630_v14 = vsel %vm76_vm0, %v3626_v13, 0.0 }
0x11b6   :  { %v3627_v12 = vsel %vm76_vm0, %v3625_v11, 0.0 }
0x11b7   :  { %3628 = vadd.xlane.f32.xlu0 %v3627_v12 }
0x11bb   :  { %3631 = vadd.xlane.f32.xlu0 %v3630_v14 }
0x1240   :  { %v3629_v21 = vpop.xlane.xlu0 %3628 }
0x1241   :  { %v3633_v22 = vmul.f32 0.03125, %v3629_v21 }
0x1243   :  { %v3635_v23 = vadd.f32 1e-12, %v3633_v22 }
0x1244   :  { %v3632_v26 = vpop.xlane.xlu0 %3631 }
0x1245   :  { %5097 = vrsqrt.f32 %v3635_v23  ;;  %v3634_v25 = vmul.f32 0.03125, %v3632_v26 }
0x1247   :  { %v3636_v27 = vadd.f32 1e-12, %v3634_v25 }
0x1249   :  { %5099 = vrsqrt.f32 %v3636_v27 }
0x1252   :  { %v5098_v29 = vpop.eup %5097 }
0x1253   :  { %v3639_v30 = vmul.f32 %v5098_v29, %v3623_v49  ;;  %v3759_v49 = vrot.slane %v5621_v5, %v5415_v24  ;;  %v3883_v24 = vld [vmem:[%s6040_s19 + $0x10] sm:$0xff] }
0x1255   :  { %v3645_v55 = vmul.f32 %v3644_v28, %v3639_v30 }
0x1256   :  { %v5100_v32 = vpop.eup %5099 }
0x1257   :  { %v3640_v33 = vmul.f32 %v5100_v32, %v3624_v9  ;;  %v5885_v34 = vadd.f32 %v3650_v50, %v3645_v55  ;;  %v5932_v9 = vld [vmem:[%s6029_s6] sm:$0x3]  ;;  %s5144_s6 = smov 124   ;;  %v3887_v55 = vld [vmem:[%s6040_s19 + $0x30] sm:$0xff]  ;;  %v3886_v32 = vld [vmem:[%s6040_s19 + $0x28] sm:$0xff] }
0x1259   :  { %v3646_v35 = vmul.f32 %v3644_v28, %v3640_v33  ;;  %4935 = vmatprep.mubr.msk.f32.mxu1 %vm76_vm0, %v5885_v34  ;;  %v3885_v33 = vld [vmem:[%s6040_s19 + $0x20] sm:$0xff] }
0x125b   :  { %v5889_v36 = vadd.f32 %v3650_v50, %v3646_v35  ;;  %v3888_v50 = vld [vmem:[%s6040_s19 + $0x38] sm:$0xff] }
0x125d   :  { %4936 = vmatmul.mubr.msk.f32.vlgmr.msra.gmra.mxu1 %vm76_vm0, %v5889_v36 }
0x125e   :  { %4965 = vmatprep.mubr.msk.f32.mxu1 %vm5129_vm1, %v5128_v47  ;;  %4958 = vmatpush3.msra.mxu1 %v3888_v50 }
0x125f   :  { %4959 = vmatprep.subr.mxu1 %v5128_v47 }
0x1260   :  { %4960 = vmatpush3.msra.mxu1 %v3887_v55 }
0x1261   :  { %4961 = vmatprep.subr.mxu1 %v5128_v47 }
0x1262   :  { %4962 = vmatpush3.msra.mxu1 %v3886_v32 }
0x1263   :  { %4963 = vmatprep.subr.mxu1 %v5128_v47 }
0x1264   :  { %4964 = vmatpush3.msra.mxu1 %v3885_v33 }
0x1265   :  { %4968 = vmatprep.subr.mxu1 %v5128_v47 }
0x131d   :  { %v4937_v10 = vpop.f32.mrf.mxu1 }
0x131e   :  { %v3735_v56 = vadd.f32 %v4937_v10, %v3656_v52 }
0x131f   :  { %v3729_v57 = vpop.f32.mrf.mxu1 }
0x1320   :  { %v3741_v58 = vmul.f32 0.044715, %v3735_v56  ;;  %v3730_v59 = vadd.f32 %v3729_v57, %v3656_v52  ;;  %v3739_v44 = vmul.f32 0.5, %v3735_v56 }
0x1322   :  { %v3743_v60 = vmul.f32 %v3741_v58, %v3735_v56  ;;  %v3740_v61 = vmul.f32 0.044715, %v3730_v59  ;;  %v3738_v38 = vmul.f32 0.5, %v3730_v59 }
0x1324   :  { %v3745_v51 = vmul.f32 %v3743_v60, %v3735_v56  ;;  %v3742_v62 = vmul.f32 %v3740_v61, %v3730_v59 }
0x1326   :  { %v3747_v63 = vadd.f32 %v3745_v51, %v3735_v56  ;;  %v3744_v0 = vmul.f32 %v3742_v62, %v3730_v59 }
0x1328   :  { %v3749_v1 = vmul.f32 0.7978846, %v3747_v63  ;;  %v3746_v2 = vadd.f32 %v3744_v0, %v3730_v59  ;;  %v3881_v0 = vld [vmem:[%s6040_s19] sm:$0xff] }
0x132a   :  { %5101 = vtanh.f32 %v3749_v1  ;;  %v3748_v3 = vmul.f32 0.7978846, %v3746_v2  ;;  %v4152_v1 = vrot.slane %v5658_v53, 4 }
0x132c   :  { %5103 = vtanh.f32 %v3748_v3  ;;  %v4321_v3 = vrot.slane %v5660_v54, 4 }
0x1337   :  { %v5102_v4 = vpop.eup %5101 }
0x1338   :  { %v3753_v31 = vadd.f32 1.0, %v5102_v4 }
0x1339   :  { %v5104_v6 = vpop.eup %5103 }
0x133a   :  { %v3752_v46 = vadd.f32 1.0, %v5104_v6  ;;  %v3755_v8 = vmul.f32 %v3753_v31, %v3739_v44  ;;  %v4529_v31 = vld [vmem:[%s6041_s20] ss:$0 sm:$0xff]  ;;  %s5145_s20 = smov 127  }
0x133c   :  { %v3754_v7 = vmul.f32 %v3752_v46, %v3738_v38 }
0x133e   :  { %4954 = vmatprep.mubr.msk.f32.mxu0 %vm1957_vm5, %v3754_v7 }
0x133f   :  { %4955 = vmatmul.mubr.msk.f32.vlgmr.msra.gmra.mxu0 %vm1957_vm5, %v3755_v8 }
0x1340   :  { %4980 = vmatpush3.msk.msra.mxu0 %vm4070_vm6, %v5658_v53  ;;  %4981 = vmatprep.mubr.msk.f32.mxu0 %vm5129_vm1, %v5128_v47 }
0x1341   :  { %4989 = vmatprep.subr.mxu0 %v5128_v47 }
0x1343   :  { %4982 = vmatmul.mubr.msk.f32.vlgmr.msra.gmra.mxu0 %vm4066_vm7, %v5932_v9 }
0x1344   :  { %4990 = vmatpush3.msk.msra.mxu0 %vm4070_vm6, %v5660_v54  ;;  %4991 = vmatprep.mubr.msk.f32.mxu0 %vm5129_vm1, %v5128_v47 }
0x13ff   :  { %v4956_v11 = vpop.f32.mrf.mxu0 }
0x1400   :  { %v3838_v12 = vadd.f32 %v4956_v11, %v3759_v49 }
0x1401   :  { %v3832_v13 = vpop.f32.mrf.mxu0 }
0x1402   :  { %v3842_v14 = vadd.f32 %v3838_v12, %v5889_v36  ;;  %v3833_v15 = vadd.f32 %v3832_v13, %v3759_v49  ;;  %v4144_v49 = vsel %vm4143_vm10, %v5932_v9, 0.0 }
0x1404   :  { %v3841_v16 = vadd.f32 %v3833_v15, %v5885_v34  ;;  %v3846_v19 = vsel %vm76_vm0, %v3842_v14, 0.0  ;;  %v4234_v34 = vrot.slane %v5932_v9, 1 }
0x1405   :  { %3847 = vadd.xlane.f32.xlu1 %v3846_v19 }
0x1406   :  { %v3843_v20 = vsel %vm76_vm0, %v3841_v16, 0.0  ;;  %4992 = vmatmul.mubr.msk.f32.vlgmr.msra.gmra.mxu0 %vm4066_vm7, %v4234_v34 }
0x1407   :  { %3844 = vadd.xlane.f32.xlu0 %v3843_v20 }
0x148e   :  { %v3848_v21 = vpop.xlane.xlu1 %3847 }
0x148f   :  { %v3850_v22 = vmul.f32 0.03125, %v3848_v21 }
0x1490   :  { %v3845_v23 = vpop.xlane.xlu0 %3844 }
0x1491   :  { %v3852_v26 = vsub.f32 %v3842_v14, %v3850_v22  ;;  %v3849_v25 = vmul.f32 0.03125, %v3845_v23 }
0x1493   :  { %v3851_v5 = vsub.f32 %v3841_v16, %v3849_v25  ;;  %v3854_v27 = vmul.f32 %v3852_v26, %v3852_v26 }
0x1495   :  { %v3858_v28 = vsel %vm76_vm0, %v3854_v27, 0.0  ;;  %v3853_v29 = vmul.f32 %v3851_v5, %v3851_v5  ;;  %v4310_v27 = vsel %vm4309_vm11, %v5932_v9, 0.0 }
0x1496   :  { %3859 = vadd.xlane.f32.xlu1 %v3858_v28 }
0x1497   :  { %v3855_v30 = vsel %vm76_vm0, %v3853_v29, 0.0 }
0x1498   :  { %3856 = vadd.xlane.f32.xlu0 %v3855_v30 }
0x14a7   :  { %4319 = vrot.lane.b32.xlu1 %v4234_v34, %s5144_s6 }
0x14ae   :  { %4150 = vrot.lane.b32.xlu0 %v5932_v9, %s5144_s6 }
0x14cd   :  { %4145 = vadd.xlane.f32.xlu0 %v4144_v49 }
0x151f   :  { %v3860_v35 = vpop.xlane.xlu1 %3859 }
0x1520   :  { %v3862_v36 = vmul.f32 0.03125, %v3860_v35  ;;  %v4139_v35 = vpop.f32.mrf.mxu0 }
0x1521   :  { %v3857_v17 = vpop.xlane.xlu0 %3856 }
0x1522   :  { %v3864_v18 = vadd.f32 1e-12, %v3862_v36  ;;  %v3861_v39 = vmul.f32 0.03125, %v3857_v17  ;;  %v4983_v36 = vpop.f32.mrf.mxu0 }
0x1523   :  { %v4320_v53 = vpop.permute.xlu1 %4319 }
0x1524   :  { %5105 = vrsqrt.f32 %v3864_v18  ;;  %v3863_v40 = vadd.f32 1e-12, %v3861_v39  ;;  %v4305_v17 = vpop.f32.mrf.mxu0 }
0x1525   :  { %v4151_v2 = vpop.permute.xlu0 %4150 }
0x1526   :  { %5107 = vrsqrt.f32 %v3863_v40  ;;  %v4228_v8 = vsel %vm4143_vm10, %v4151_v2, 0.0  ;;  %v4993_v18 = vpop.f32.mrf.mxu0 }
0x1531   :  { %v5106_v43 = vpop.eup %5105 }
0x1532   :  { %v3868_v48 = vmul.f32 %v5106_v43, %v3852_v26 }
0x1533   :  { %v5108_v52 = vpop.eup %5107 }
0x1534   :  { %v3867_v10 = vmul.f32 %v5108_v52, %v3851_v5  ;;  %v3874_v56 = vmul.f32 %v3872_v42, %v3868_v48 }
0x1536   :  { %v3873_v57 = vmul.f32 %v3872_v42, %v3867_v10  ;;  %v3880_v58 = vadd.f32 %v3878_v45, %v3874_v56 }
0x1538   :  { %v3879_v59 = vadd.f32 %v3878_v45, %v3873_v57  ;;  %v3891_v60 = vrot.slane %v3880_v58, 7  ;;  %v3898_v51 = vrot.slane %v3880_v58, 3 }
0x153a   :  { %v3896_v61 = vrot.slane %v3879_v59, 4  ;;  %v3894_v62 = vsel %vm3893_vm8, %v3879_v59, %v3891_v60 }
0x153c   :  { %v3900_v63 = vsel %vm3893_vm8, %v3896_v61, %v3898_v51 }
0x153d   :  { %4966 = vmatmul.mubr.msk.f32.vlgmr.msra.gmra.mxu1 %vm76_vm0, %v3900_v63 }
0x153e   :  { %4969 = vmatpush3.msra.mxu1 %v3884_v37  ;;  %4976 = vmatprep.mubr.msk.f32.mxu1 %vm5129_vm1, %v5128_v47 }
0x153f   :  { %4970 = vmatprep.subr.mxu1 %v5128_v47 }
0x1540   :  { %4971 = vmatpush3.msra.mxu1 %v3883_v24 }
0x1541   :  { %4972 = vmatprep.subr.mxu1 %v5128_v47 }
0x1542   :  { %4973 = vmatpush3.msra.mxu1 %v3882_v41 }
0x1543   :  { %4974 = vmatprep.subr.mxu1 %v5128_v47 }
0x1544   :  { %4975 = vmatpush3.msra.mxu1 %v3881_v0 }
0x1545   :  { %4977 = vmatmul.mubr.msk.f32.vlgmr.msra.gmra.mxu1 %vm76_vm0, %v3894_v62  ;;  %4984 = vmatprep.subr.mxu1 %v5128_v47 }
0x1546   :  { %4985 = vmatpush3.msk.msra.mxu1 %vm4070_vm6, %v4152_v1  ;;  %4986 = vmatprep.mubr.msk.f32.mxu1 %vm5129_vm1, %v5128_v47 }
0x1547   :  { %4994 = vmatprep.subr.mxu1 %v5128_v47 }
0x1549   :  { %4987 = vmatmul.mubr.msk.f32.vlgmr.msra.gmra.mxu1 %vm4066_vm7, %v4151_v2 }
0x154a   :  { %4995 = vmatpush3.msk.msra.mxu1 %vm4070_vm6, %v4321_v3  ;;  %4996 = vmatprep.mubr.msk.f32.mxu1 %vm5129_vm1, %v5128_v47  ;;  %v4396_v47 = vsel %vm4309_vm11, %v4151_v2, 0.0  ;;  %vm4449_vm1 = vcmask 7168  }
0x154d   :  { %4997 = vmatmul.mubr.msk.f32.vlgmr.msra.gmra.mxu1 %vm4066_vm7, %v4320_v53 }
0x1556   :  { %v4146_v39 = vpop.xlane.xlu0 %4145 }
0x1557   :  { %v4147_v9 = vmax.f32 %v4146_v39, 1e-09 }
0x15fd   :  { %v3970_v4 = vpop.f32.mrf.mxu1 }
0x15ff   :  { %v4967_v6 = vpop.f32.mrf.mxu1 }
0x1605   :  { %v4043_v38 = vpop.f32.mrf.mxu1 }
0x1606   :  { %v4044_v46 = vadd.f32 %v4043_v38, %v3970_v4 }
0x1607   :  { %v4978_v44 = vpop.f32.mrf.mxu1 }
0x1608   :  { %v4053_v54 = vadd.f32 %v4529_v31, %v4044_v46 }
0x1609   :  { %v4223_v11 = vpop.f32.mrf.mxu1 }
0x160a   :  { %v4055_v7 = vsel %vm4054_vm9, %v4053_v54, -inf }
0x160b   :  { %4056 = vmax.xlane.f32.xlu1 %v4055_v7  ;;  %v4988_v12 = vpop.f32.mrf.mxu1 }
0x160d   :  { %v4392_v13 = vpop.f32.mrf.mxu1 }
0x160f   :  { %4229 = vadd.xlane.f32.xlu1 %v4228_v8  ;;  %v4998_v14 = vpop.f32.mrf.mxu1 }
0x1613   :  { %4397 = vadd.xlane.f32.xlu1 %v4396_v47 }
0x1694   :  { %v4057_v15 = vpop.xlane.xlu1 %4056 }
0x1695   :  { %v4058_v16 = vsub.f32 %v4053_v54, %v4057_v15 }
0x1697   :  { %v4059_v19 = vmul.f32 1.442695, %v4058_v16 }
0x1698   :  { %v4230_v20 = vpop.xlane.xlu1 %4229 }
0x1699   :  { %5109 = vpow2.f32 %v4059_v19  ;;  %v4231_v21 = vmax.f32 %v4230_v20, 1e-09 }
0x169b   :  { %5111 = vrcp.f32 %v4231_v21 }
0x169c   :  { %v4398_v22 = vpop.xlane.xlu1 %4397 }
0x169d   :  { %v4399_v23 = vmax.f32 %v4398_v22, 1e-09 }
0x169f   :  { %v4401_v26 = vrot.slane %v4399_v23, 1 }
0x16a1   :  { %5113 = vrcp.f32 %v4401_v26 }
0x16a6   :  { %v5110_v25 = vpop.eup %5109 }
0x16a7   :  { %v4061_v5 = vsel %vm4054_vm9, %v5110_v25, 0.0 }
0x16a8   :  { %4062 = vadd.xlane.f32.xlu0 %v4061_v5  ;;  %v5112_v28 = vpop.eup %5111 }
0x16a9   :  { %v4233_v30 = vmul.f32 %v5112_v28, %v4223_v11 }
0x16ac   :  { %4311 = vadd.xlane.f32.xlu0 %v4310_v27 }
0x16ae   :  { %v5114_v29 = vpop.eup %5113 }
0x16af   :  { %v4404_v50 = vmul.f32 %v5114_v29, %v4392_v13 }
0x16b1   :  { %v4410_v55 = vrot.slane %v4404_v50, 7 }
0x16b3   :  { %v4412_v32 = vsel %vm3893_vm8, %v4233_v30, %v4410_v55 }
0x16b4   :  { %v4425_v33 = vmul.f32 %v4412_v32, %v4412_v32 }
0x16b6   :  { %v4426_v34 = vsel %vm4414_vm12, %v4425_v33, 0.0 }
0x16b7   :  { %4427 = vadd.xlane.f32.xlu1 %v4426_v34 }
0x1731   :  { %v4063_v40 = vpop.xlane.xlu0 %4062 }
0x1732   :  { %5115 = vrcp.f32 %v4063_v40 }
0x1733   :  { %5117 = vrcp.f32 %v4147_v9 }
0x1735   :  { %v4312_v42 = vpop.xlane.xlu0 %4311 }
0x1736   :  { %v4313_v43 = vmax.f32 %v4312_v42, 1e-09 }
0x1738   :  { %v4315_v45 = vrot.slane %v4313_v43, 1 }
0x173a   :  { %5119 = vrcp.f32 %v4315_v45 }
0x173f   :  { %v5116_v48 = vpop.eup %5115 }
0x1740   :  { %v4065_v52 = vmul.f32 %v5116_v48, %v5110_v25  ;;  %v5118_v10 = vpop.eup %5117  ;;  %v4428_v63 = vpop.xlane.xlu1 %4427 }
0x1741   :  { %v4149_v58 = vmul.f32 %v5118_v10, %v4139_v35  ;;  %5121 = vrsqrt.f32 %v4428_v63  ;;  %vm4431_vm13 = vcmp.eq.f32.partialorder %v4428_v63, inf  ;;  %v4434_v1 = vand.u32 2147483648, %v4428_v63 }
0x1742   :  { %4446 = vrot.lane.b32.xlu1 %v4065_v52, %s5145_s20  ;;  %vm4433_vm14 = vcmp.eq.f32.partialorder %v4428_v63, 0.0 }
0x1747   :  { %v5120_v56 = vpop.eup %5119 }
0x1748   :  { %v4318_v57 = vmul.f32 %v5120_v56, %v4305_v17 }
0x174a   :  { %v4406_v59 = vrot.slane %v4318_v57, 7 }
0x174c   :  { %v4408_v60 = vsel %vm3893_vm8, %v4149_v58, %v4406_v59 }
0x174d   :  { %v4413_v61 = vmul.f32 %v4408_v60, %v4408_v60  ;;  %v4436_v62 = vmul.f32 %v4412_v32, %v4408_v60 }
0x174e   :  { %v5122_v41 = vpop.eup %5121 }
0x174f   :  { %v4415_v51 = vsel %vm4414_vm12, %v4413_v61, 0.0  ;;  %v4437_v37 = vsel %vm4414_vm12, %v4436_v62, 0.0  ;;  %v4430_v0 = vmul.f32 %v5122_v41, %v4428_v63 }
0x1750   :  { %4416 = vadd.xlane.f32.xlu0 %v4415_v51 }
0x1751   :  { %v4432_v2 = vsel %vm4431_vm13, %v4428_v63, %v4430_v0 }
0x1752   :  { %v4435_v4 = vsel %vm4433_vm14, %v4434_v1, %v4432_v2 }
0x1753   :  { %v4441_v46 = vmax.f32 %v4435_v4, 1e-08 }
0x1754   :  { %4438 = vadd.xlane.f32.xlu0 %v4437_v37 }
0x17b4   :  { %v4447_v49 = vpop.permute.xlu1 %4446 }
0x17d9   :  { %v4417_v24 = vpop.xlane.xlu0 %4416 }
0x17da   :  { %5123 = vrsqrt.f32 %v4417_v24  ;;  %vm4420_vm15 = vcmp.eq.f32.partialorder %v4417_v24, inf  ;;  %v4423_v6 = vand.u32 2147483648, %v4417_v24  ;;  %vm4422_vm0 = vcmp.eq.f32.partialorder %v4417_v24, 0.0 }
0x17dd   :  { %v4439_v8 = vpop.xlane.xlu0 %4438 }
0x17e7   :  { %v5124_v3 = vpop.eup %5123 }
0x17e8   :  { %v4419_v53 = vmul.f32 %v5124_v3, %v4417_v24 }
0x17ea   :  { %v4421_v31 = vsel %vm4420_vm15, %v4417_v24, %v4419_v53 }
0x17eb   :  { %v4424_v38 = vsel %vm4422_vm0, %v4423_v6, %v4421_v31 }
0x17ec   :  { %v4440_v44 = vmax.f32 %v4424_v38, 1e-08 }
0x17ee   :  { %v4442_v54 = vmul.f32 %v4441_v46, %v4440_v44 }
0x17f0   :  { %5125 = vrcp.f32 %v4442_v54 }
0x17fd   :  { %v5126_v7 = vpop.eup %5125 }
0x17fe   :  { %v4444_v47 = vmul.f32 %v5126_v7, %v4439_v8 }
0x1800   :  { %v4450_v11 = vsel %vm4449_vm1, %v4447_v49, %v4444_v47 }
0x1801   :  { %v4452_v12 = vsel %vm4451_vm2, %v4450_v11, 0.0 }
0x1802   :  { %4453 = vst [vmem:[%s6042_s21] sm:$0x3] %v4452_v12 }

</bundles_post_ra>
